<compile_context>
chip_gen: v6e
topology: v6e:2x2x1
jax: 0.10.0
libtpu: 0.0.40
codegen_flags: <defaults>
</compile_context>

<pallas_src>
import math

import jax
import jax.numpy as jnp
from jax.experimental import pallas as pl
from jax.experimental.pallas import tpu as pltpu

# ----------------------------- model config ---------------------------------
PATCH_NUMS = (1, 2, 3, 4)                 # small version of (1,2,...,16)
L = sum(pn * pn for pn in PATCH_NUMS)     # 30
LP = 32                                   # L padded to a multiple of 8
FIRST_L = PATCH_NUMS[0] ** 2              # 1
B = 2
C = 128                                   # embed_dim
H = 4                                     # num_heads
HD = C // H                               # head_dim
CVAE = 32                                 # Cvae
V = 256                                   # vocab_size
DEPTH = 2
MLP_HID = int(C * 4.0)
EPS = 1e-6
INIT_STD = math.sqrt(1.0 / C / 3.0)

# cumulative ends of each scale: level(t) = #{c in CUM : t >= c}
CUM = []
_c = 0
for _pn in PATCH_NUMS:
    _c += _pn * _pn
    CUM.append(_c)                        # e.g. [1, 5, 14, 30]


# ------------------------------ fused Pallas kernel --------------------------
def fused_var_kernel(
    xv_ref, fe_ref, add_ref,
    wm_ref, bm_ref, wi_ref, bi_ref,
    ln1g_ref, ln1b_ref, wq_ref, bq_ref, wk_ref, bk_ref,
    wv_ref, bv_ref, wo_ref, bo_ref, ln2g_ref, ln2b_ref,
    w1_ref, b1_ref, w2_ref, b2_ref, wh_ref, bh_ref,
    o_ref,
):
    """Full VAR.forward for ONE batch element (grid=(B,), batch is parallel).

    xv_ref : (1, LP, CVAE) teacher-forcing latents, zero-padded (+SOS slot).
    fe_ref : (1, LP, CVAE) codebook features of the image tokens, zero-padded.
    add_ref: (1, LP, C)    sos/pos_start + lvl_embed + pos_1LC, zero-padded.
    weights: bf16 matmul weights (depth-stacked for the blocks), f32 biases/LN.
    o_ref  : (1, LP, V)    logits.
    """
    f32 = jnp.float32
    bf16 = jnp.bfloat16
    NEG = f32(-1e30)

    # row / column token indices and static level ids (built in-kernel, no
    # (L,L) bias DMA).
    q_pos = jax.lax.broadcasted_iota(jnp.int32, (LP, 1), 0)     # (LP, 1)
    k_pos = jax.lax.broadcasted_iota(jnp.int32, (1, LP), 1)     # (1, LP)
    lvl_q = jnp.zeros((LP, 1), jnp.int32)
    lvl_k = jnp.zeros((1, LP), jnp.int32)
    for c in CUM:                                   # static python loop
        lvl_q = lvl_q + (q_pos >= c).astype(jnp.int32)
        lvl_k = lvl_k + (k_pos >= c).astype(jnp.int32)
    mask = lvl_q >= lvl_k                           # (LP, LP) block-causal
    # (padded tokens get level len(PATCH_NUMS): real queries never see padded
    #  keys, padded queries see everything -> softmax stays finite.)

    # ---- word_embed_mask on teacher-forcing latents, + sos/lvl/pos ----------
    we = jnp.dot(xv_ref[0].astype(bf16), wm_ref[...],
                 preferred_element_type=f32) + bm_ref[...]        # (LP, C)
    keep = jnp.logical_and(q_pos >= FIRST_L, q_pos < L).astype(f32)
    x = we * keep + add_ref[0]                                    # (LP, C) f32

    # ---- word_embed_img on codebook features --------------------------------
    f = jnp.dot(fe_ref[0].astype(bf16), wi_ref[...],
                preferred_element_type=f32) + bi_ref[...]         # (LP, C)
    f_bf = f.astype(bf16)

    def layernorm(z, g, b):
        mu = jnp.mean(z, axis=-1, keepdims=True)
        var = jnp.mean(jnp.square(z - mu), axis=-1, keepdims=True)
        return (z - mu) * jax.lax.rsqrt(var + EPS) * g + b

    nt = (((1,), (1,)), ((), ()))                   # q @ k^T contraction

    # ---- DEPTH pre-LN cross-attention blocks (static unrolled loop) ---------
    for d in range(DEPTH):
        xn = layernorm(x, ln1g_ref[d], ln1b_ref[d]).astype(bf16)
        # 1/sqrt(HD) is folded into wq / bq by the wrapper.
        q = jnp.dot(xn, wq_ref[d], preferred_element_type=f32) + bq_ref[d]
        k = jnp.dot(f_bf, wk_ref[d], preferred_element_type=f32) + bk_ref[d]
        v = jnp.dot(f_bf, wv_ref[d], preferred_element_type=f32) + bv_ref[d]

        wo_d = wo_ref[d]                              # (C, C) bf16
        attn = jnp.zeros((LP, C), f32)
        for h in range(H):                            # static small head loop
            sl = slice(h * HD, (h + 1) * HD)
            qh = q[:, sl].astype(bf16)
            kh = k[:, sl].astype(bf16)
            vh = v[:, sl].astype(bf16)
            s = jax.lax.dot_general(qh, kh, nt, preferred_element_type=f32)
            s = jnp.where(mask, s, NEG)
            s = s - jnp.max(s, axis=-1, keepdims=True)
            p = jnp.exp(s)
            p = p * pl.reciprocal(jnp.sum(p, axis=-1, keepdims=True),
                                  approx=True)
            oh = jnp.dot(p.astype(bf16), vh, preferred_element_type=f32)
            # accumulate through this head's slice of Wo (no lane concat)
            attn = attn + jnp.dot(oh.astype(bf16), wo_d[sl, :],
                                  preferred_element_type=f32)
        x = x + attn + bo_ref[d]                      # residual 1

        xn2 = layernorm(x, ln2g_ref[d], ln2b_ref[d]).astype(bf16)
        h1 = jnp.dot(xn2, w1_ref[d], preferred_element_type=f32) + b1_ref[d]
        # TODO(synk): torch nn.GELU uses exact erf; tanh approximation here.
        h1 = jax.nn.gelu(h1, approximate=True)
        x = x + jnp.dot(h1.astype(bf16), w2_ref[d],
                        preferred_element_type=f32) + b2_ref[d]   # residual 2

    # ---- head -> logits ------------------------------------------------------
    logits = jnp.dot(x.astype(bf16), wh_ref[...],
                     preferred_element_type=f32) + bh_ref[...]
    o_ref[0] = logits


# ------------------------------ parameter init -------------------------------
def init_params(key):
    keys = iter(jax.random.split(key, 32))

    def nrm(shape, std):
        return jax.random.normal(next(keys), shape, jnp.float32) * std

    z = lambda shape: jnp.zeros(shape, jnp.float32)
    params = {
        "pos_start": nrm((1, FIRST_L, C), INIT_STD),
        "pos_1LC": nrm((1, L, C), INIT_STD),
        "lvl_embed": nrm((len(PATCH_NUMS), C), INIT_STD),
        "codebook_img": nrm((V, CVAE), 0.02),
        "w_mask": nrm((CVAE, C), 0.02), "b_mask": z((1, C)),
        "w_img": nrm((CVAE, C), 0.02), "b_img": z((1, C)),
        "w_head": nrm((C, V), 0.02), "b_head": z((1, V)),
        # depth-stacked block parameters
        "ln1_g": jnp.ones((DEPTH, 1, C), jnp.float32), "ln1_b": z((DEPTH, 1, C)),
        "wq": nrm((DEPTH, C, C), 0.02), "bq": z((DEPTH, 1, C)),
        "wk": nrm((DEPTH, C, C), 0.02), "bk": z((DEPTH, 1, C)),
        "wv": nrm((DEPTH, C, C), 0.02), "bv": z((DEPTH, 1, C)),
        "wo": nrm((DEPTH, C, C), 0.02), "bo": z((DEPTH, 1, C)),
        "ln2_g": jnp.ones((DEPTH, 1, C), jnp.float32), "ln2_b": z((DEPTH, 1, C)),
        "w1": nrm((DEPTH, C, MLP_HID), 0.02), "b1": z((DEPTH, 1, MLP_HID)),
        "w2": nrm((DEPTH, MLP_HID, C), 0.02), "b2": z((DEPTH, 1, C)),
    }
    return params


def build_level_ids():
    return jnp.concatenate(
        [jnp.full((pn * pn,), i, jnp.int32) for i, pn in enumerate(PATCH_NUMS)]
    )                                                 # (L,)


# ------------------------------- forward pass --------------------------------
@jax.jit
def var_forward(x_BLCv_wo_first_l, img_token_ids, params, lvl_1L):
    Bsz = x_BLCv_wo_first_l.shape[0]

    # teacher-forcing latents: reserve first_l SOS slots, pad L -> LP.
    xv = jnp.pad(x_BLCv_wo_first_l.astype(jnp.float32),
                 ((0, 0), (FIRST_L, LP - L), (0, 0)))          # (B, LP, CVAE)

    # image-token conditioning features (codebook gather done in JAX).
    fe = params["codebook_img"][img_token_ids]                 # (B, L, CVAE)
    fe = jnp.pad(fe, ((0, 0), (0, LP - L), (0, 0)))            # (B, LP, CVAE)

    # sos (pos_start) + level embedding + positional embedding, padded.
    add = params["lvl_embed"][lvl_1L][None] + params["pos_1LC"]
    add = add.at[:, :FIRST_L].add(params["pos_start"])
    add = jnp.pad(add, ((0, 0), (0, LP - L), (0, 0)))          # (1, LP, C)

    scale = 1.0 / math.sqrt(HD)
    bf = lambda w: w.astype(jnp.bfloat16)
    weights = (
        bf(params["w_mask"]), params["b_mask"],
        bf(params["w_img"]), params["b_img"],
        params["ln1_g"], params["ln1_b"],
        bf(params["wq"] * scale), params["bq"] * scale,        # fold softmax scale
        bf(params["wk"]), params["bk"],
        bf(params["wv"]), params["bv"],
        bf(params["wo"]), params["bo"],
        params["ln2_g"], params["ln2_b"],
        bf(params["w1"]), params["b1"],
        bf(params["w2"]), params["b2"],
        bf(params["w_head"]), params["b_head"],
    )

    def per_batch(shape):
        nd = len(shape)
        return pl.BlockSpec(shape, lambda b, _nd=nd: (b,) + (0,) * (_nd - 1))

    def shared(shape):
        nd = len(shape)
        return pl.BlockSpec(shape, lambda b, _nd=nd: (0,) * _nd)

    in_specs = [per_batch((1, LP, CVAE)),
                per_batch((1, LP, CVAE)),
                shared((1, LP, C))]
    in_specs += [shared(tuple(w.shape)) for w in weights]

    logits = pl.pallas_call(
        fused_var_kernel,
        out_shape=jax.ShapeDtypeStruct((Bsz, LP, V), jnp.float32),
        grid=(Bsz,),
        in_specs=in_specs,
        out_specs=per_batch((1, LP, V)),
        compiler_params=pltpu.CompilerParams(dimension_semantics=("parallel",)),
    )(xv, fe, add, *weights)

    return logits[:, :L, :]                                    # (B, L, V)


# ----------------------------------- main -------------------------------------
if __name__ == "__main__":
    key = jax.random.PRNGKey(0)
    k_par, k_x, k_tok = jax.random.split(key, 3)

    params = init_params(k_par)
    lvl_1L = build_level_ids()

    # teacher-forcing input (B, L - first_l, Cvae)
    x_BLCv_wo_first_l = jax.random.normal(k_x, (B, L - FIRST_L, CVAE), jnp.float32)
    # synthetic VQ token ids standing in for vae_proxy_img.img_to_idxBl(input_img)
    img_token_ids = jax.random.randint(k_tok, (B, L), 0, V, jnp.int32)

    logits = var_forward(x_BLCv_wo_first_l, img_token_ids, params, lvl_1L)
    logits = jax.block_until_ready(logits)

    assert logits.shape == (B, L, V)
    assert logits.dtype == jnp.float32
    assert bool(jnp.all(jnp.isfinite(logits)))
    print("KERNEL_OK")
</pallas_src>

<mosaic_0001>
module attributes {stable_mosaic.version = 11 : i64} {
  func.func @fused_var_kernel(%arg0: i32, %arg1: memref<1x32x32xf32, #tpu.memory_space<vmem>>, %arg2: memref<1x32x32xf32, #tpu.memory_space<vmem>>, %arg3: memref<1x32x128xf32, #tpu.memory_space<vmem>>, %arg4: memref<32x128xbf16, #tpu.memory_space<vmem>>, %arg5: memref<1x128xf32, #tpu.memory_space<vmem>>, %arg6: memref<32x128xbf16, #tpu.memory_space<vmem>>, %arg7: memref<1x128xf32, #tpu.memory_space<vmem>>, %arg8: memref<2x1x128xf32, #tpu.memory_space<vmem>>, %arg9: memref<2x1x128xf32, #tpu.memory_space<vmem>>, %arg10: memref<2x128x128xbf16, #tpu.memory_space<vmem>>, %arg11: memref<2x1x128xf32, #tpu.memory_space<vmem>>, %arg12: memref<2x128x128xbf16, #tpu.memory_space<vmem>>, %arg13: memref<2x1x128xf32, #tpu.memory_space<vmem>>, %arg14: memref<2x128x128xbf16, #tpu.memory_space<vmem>>, %arg15: memref<2x1x128xf32, #tpu.memory_space<vmem>>, %arg16: memref<2x128x128xbf16, #tpu.memory_space<vmem>>, %arg17: memref<2x1x128xf32, #tpu.memory_space<vmem>>, %arg18: memref<2x1x128xf32, #tpu.memory_space<vmem>>, %arg19: memref<2x1x128xf32, #tpu.memory_space<vmem>>, %arg20: memref<2x128x512xbf16, #tpu.memory_space<vmem>>, %arg21: memref<2x1x512xf32, #tpu.memory_space<vmem>>, %arg22: memref<2x512x128xbf16, #tpu.memory_space<vmem>>, %arg23: memref<2x1x128xf32, #tpu.memory_space<vmem>>, %arg24: memref<128x256xbf16, #tpu.memory_space<vmem>>, %arg25: memref<1x256xf32, #tpu.memory_space<vmem>>, %arg26: memref<1x32x256xf32, #tpu.memory_space<vmem>>) attributes {dimension_semantics = [#tpu.dimension_semantics<parallel>], iteration_bounds = array<i64: 2>, scalar_prefetch = 0 : i64, scratch_operands = 0 : i64, tpu.core_type = #tpu.core_type<tc>, window_params = [{transform_indices = @transform_0, window_bounds = array<i64: 1, 32, 32>}, {transform_indices = @transform_1, window_bounds = array<i64: 1, 32, 32>}, {pipeline_mode = #tpu.pipeline_mode<synchronous>, transform_indices = @transform_2, window_bounds = array<i64: 1, 32, 128>}, {pipeline_mode = #tpu.pipeline_mode<synchronous>, transform_indices = @transform_3, window_bounds = array<i64: 32, 128>}, {pipeline_mode = #tpu.pipeline_mode<synchronous>, transform_indices = @transform_4, window_bounds = array<i64: 1, 128>}, {pipeline_mode = #tpu.pipeline_mode<synchronous>, transform_indices = @transform_5, window_bounds = array<i64: 32, 128>}, {pipeline_mode = #tpu.pipeline_mode<synchronous>, transform_indices = @transform_6, window_bounds = array<i64: 1, 128>}, {pipeline_mode = #tpu.pipeline_mode<synchronous>, transform_indices = @transform_7, window_bounds = array<i64: 2, 1, 128>}, {pipeline_mode = #tpu.pipeline_mode<synchronous>, transform_indices = @transform_8, window_bounds = array<i64: 2, 1, 128>}, {pipeline_mode = #tpu.pipeline_mode<synchronous>, transform_indices = @transform_9, window_bounds = array<i64: 2, 128, 128>}, {pipeline_mode = #tpu.pipeline_mode<synchronous>, transform_indices = @transform_10, window_bounds = array<i64: 2, 1, 128>}, {pipeline_mode = #tpu.pipeline_mode<synchronous>, transform_indices = @transform_11, window_bounds = array<i64: 2, 128, 128>}, {pipeline_mode = #tpu.pipeline_mode<synchronous>, transform_indices = @transform_12, window_bounds = array<i64: 2, 1, 128>}, {pipeline_mode = #tpu.pipeline_mode<synchronous>, transform_indices = @transform_13, window_bounds = array<i64: 2, 128, 128>}, {pipeline_mode = #tpu.pipeline_mode<synchronous>, transform_indices = @transform_14, window_bounds = array<i64: 2, 1, 128>}, {pipeline_mode = #tpu.pipeline_mode<synchronous>, transform_indices = @transform_15, window_bounds = array<i64: 2, 128, 128>}, {pipeline_mode = #tpu.pipeline_mode<synchronous>, transform_indices = @transform_16, window_bounds = array<i64: 2, 1, 128>}, {pipeline_mode = #tpu.pipeline_mode<synchronous>, transform_indices = @transform_17, window_bounds = array<i64: 2, 1, 128>}, {pipeline_mode = #tpu.pipeline_mode<synchronous>, transform_indices = @transform_18, window_bounds = array<i64: 2, 1, 128>}, {pipeline_mode = #tpu.pipeline_mode<synchronous>, transform_indices = @transform_19, window_bounds = array<i64: 2, 128, 512>}, {pipeline_mode = #tpu.pipeline_mode<synchronous>, transform_indices = @transform_20, window_bounds = array<i64: 2, 1, 512>}, {pipeline_mode = #tpu.pipeline_mode<synchronous>, transform_indices = @transform_21, window_bounds = array<i64: 2, 512, 128>}, {pipeline_mode = #tpu.pipeline_mode<synchronous>, transform_indices = @transform_22, window_bounds = array<i64: 2, 1, 128>}, {pipeline_mode = #tpu.pipeline_mode<synchronous>, transform_indices = @transform_23, window_bounds = array<i64: 128, 256>}, {pipeline_mode = #tpu.pipeline_mode<synchronous>, transform_indices = @transform_24, window_bounds = array<i64: 1, 256>}, {transform_indices = @transform_25, window_bounds = array<i64: 1, 32, 256>}]} {
    %0 = tpu.iota {dimensions = array<i32: 0>} : vector<32x1xi32>
    %1 = tpu.iota {dimensions = array<i32: 1>} : vector<1x32xi32>
    %c0_i32 = arith.constant 0 : i32
    %2 = vector.broadcast %c0_i32 : i32 to vector<32x1xi32>
    %c0_i32_0 = arith.constant 0 : i32
    %3 = vector.broadcast %c0_i32_0 : i32 to vector<1x32xi32>
    %c1_i32 = arith.constant 1 : i32
    %4 = vector.broadcast %c1_i32 : i32 to vector<32x1xi32>
    %5 = arith.cmpi sge, %0, %4 : vector<32x1xi32>
    %6 = arith.extui %5 : vector<32x1xi1> to vector<32x1xi32>
    %7 = arith.addi %2, %6 : vector<32x1xi32>
    %c1_i32_1 = arith.constant 1 : i32
    %8 = vector.broadcast %c1_i32_1 : i32 to vector<1x32xi32>
    %9 = arith.cmpi sge, %1, %8 : vector<1x32xi32>
    %10 = arith.extui %9 : vector<1x32xi1> to vector<1x32xi32>
    %11 = arith.addi %3, %10 : vector<1x32xi32>
    %c5_i32 = arith.constant 5 : i32
    %12 = vector.broadcast %c5_i32 : i32 to vector<32x1xi32>
    %13 = arith.cmpi sge, %0, %12 : vector<32x1xi32>
    %14 = arith.extui %13 : vector<32x1xi1> to vector<32x1xi32>
    %15 = arith.addi %7, %14 : vector<32x1xi32>
    %c5_i32_2 = arith.constant 5 : i32
    %16 = vector.broadcast %c5_i32_2 : i32 to vector<1x32xi32>
    %17 = arith.cmpi sge, %1, %16 : vector<1x32xi32>
    %18 = arith.extui %17 : vector<1x32xi1> to vector<1x32xi32>
    %19 = arith.addi %11, %18 : vector<1x32xi32>
    %c14_i32 = arith.constant 14 : i32
    %20 = vector.broadcast %c14_i32 : i32 to vector<32x1xi32>
    %21 = arith.cmpi sge, %0, %20 : vector<32x1xi32>
    %22 = arith.extui %21 : vector<32x1xi1> to vector<32x1xi32>
    %23 = arith.addi %15, %22 : vector<32x1xi32>
    %c14_i32_3 = arith.constant 14 : i32
    %24 = vector.broadcast %c14_i32_3 : i32 to vector<1x32xi32>
    %25 = arith.cmpi sge, %1, %24 : vector<1x32xi32>
    %26 = arith.extui %25 : vector<1x32xi1> to vector<1x32xi32>
    %27 = arith.addi %19, %26 : vector<1x32xi32>
    %c30_i32 = arith.constant 30 : i32
    %28 = vector.broadcast %c30_i32 : i32 to vector<32x1xi32>
    %29 = arith.cmpi sge, %0, %28 : vector<32x1xi32>
    %30 = arith.extui %29 : vector<32x1xi1> to vector<32x1xi32>
    %31 = arith.addi %23, %30 : vector<32x1xi32>
    %c30_i32_4 = arith.constant 30 : i32
    %32 = vector.broadcast %c30_i32_4 : i32 to vector<1x32xi32>
    %33 = arith.cmpi sge, %1, %32 : vector<1x32xi32>
    %34 = arith.extui %33 : vector<1x32xi1> to vector<1x32xi32>
    %35 = arith.addi %27, %34 : vector<1x32xi32>
    %36 = vector.broadcast %31 : vector<32x1xi32> to vector<32x32xi32>
    %37 = vector.broadcast %35 : vector<1x32xi32> to vector<32x32xi32>
    %38 = arith.cmpi sge, %36, %37 : vector<32x32xi32>
    %c0 = arith.constant 0 : index
    %c0_5 = arith.constant 0 : index
    %c0_6 = arith.constant 0 : index
    %39 = vector.load %arg1[%c0, %c0_5, %c0_6] : memref<1x32x32xf32, #tpu.memory_space<vmem>>, vector<1x32x32xf32>
    %40 = vector.shape_cast %39 : vector<1x32x32xf32> to vector<32x32xf32>
    %41 = arith.truncf %40 : vector<32x32xf32> to vector<32x32xbf16>
    %c0_7 = arith.constant 0 : index
    %c0_8 = arith.constant 0 : index
    %42 = vector.load %arg4[%c0_7, %c0_8] : memref<32x128xbf16, #tpu.memory_space<vmem>>, vector<32x128xbf16>
    %cst = arith.constant dense<0.000000e+00> : vector<32x128xf32>
    %43 = tpu.matmul %41, %42, %cst {dimension_numbers = #tpu.dot_dimension_numbers<[1], [0], [0], [1], [0, 0, 1, 1], [], []>} : vector<32x32xbf16>, vector<32x128xbf16>, vector<32x128xf32> -> vector<32x128xf32>
    %c0_9 = arith.constant 0 : index
    %c0_10 = arith.constant 0 : index
    %44 = vector.load %arg5[%c0_9, %c0_10] : memref<1x128xf32, #tpu.memory_space<vmem>>, vector<1x128xf32>
    %45 = vector.broadcast %44 : vector<1x128xf32> to vector<32x128xf32>
    %46 = arith.addf %43, %45 : vector<32x128xf32>
    %c1_i32_11 = arith.constant 1 : i32
    %47 = vector.broadcast %c1_i32_11 : i32 to vector<32x1xi32>
    %48 = arith.cmpi sge, %0, %47 : vector<32x1xi32>
    %c30_i32_12 = arith.constant 30 : i32
    %49 = vector.broadcast %c30_i32_12 : i32 to vector<32x1xi32>
    %50 = arith.cmpi slt, %0, %49 : vector<32x1xi32>
    %51 = arith.andi %48, %50 : vector<32x1xi1>
    %52 = arith.extui %51 : vector<32x1xi1> to vector<32x1xi32>
    %53 = arith.sitofp %52 : vector<32x1xi32> to vector<32x1xf32>
    %54 = vector.broadcast %53 : vector<32x1xf32> to vector<32x128xf32>
    %55 = arith.mulf %46, %54 : vector<32x128xf32>
    %c0_13 = arith.constant 0 : index
    %c0_14 = arith.constant 0 : index
    %c0_15 = arith.constant 0 : index
    %56 = vector.load %arg3[%c0_13, %c0_14, %c0_15] : memref<1x32x128xf32, #tpu.memory_space<vmem>>, vector<1x32x128xf32>
    %57 = vector.shape_cast %56 : vector<1x32x128xf32> to vector<32x128xf32>
    %58 = arith.addf %55, %57 : vector<32x128xf32>
    %c0_16 = arith.constant 0 : index
    %c0_17 = arith.constant 0 : index
    %c0_18 = arith.constant 0 : index
    %59 = vector.load %arg2[%c0_16, %c0_17, %c0_18] : memref<1x32x32xf32, #tpu.memory_space<vmem>>, vector<1x32x32xf32>
    %60 = vector.shape_cast %59 : vector<1x32x32xf32> to vector<32x32xf32>
    %61 = arith.truncf %60 : vector<32x32xf32> to vector<32x32xbf16>
    %c0_19 = arith.constant 0 : index
    %c0_20 = arith.constant 0 : index
    %62 = vector.load %arg6[%c0_19, %c0_20] : memref<32x128xbf16, #tpu.memory_space<vmem>>, vector<32x128xbf16>
    %cst_21 = arith.constant dense<0.000000e+00> : vector<32x128xf32>
    %63 = tpu.matmul %61, %62, %cst_21 {dimension_numbers = #tpu.dot_dimension_numbers<[1], [0], [0], [1], [0, 0, 1, 1], [], []>} : vector<32x32xbf16>, vector<32x128xbf16>, vector<32x128xf32> -> vector<32x128xf32>
    %c0_22 = arith.constant 0 : index
    %c0_23 = arith.constant 0 : index
    %64 = vector.load %arg7[%c0_22, %c0_23] : memref<1x128xf32, #tpu.memory_space<vmem>>, vector<1x128xf32>
    %65 = vector.broadcast %64 : vector<1x128xf32> to vector<32x128xf32>
    %66 = arith.addf %63, %65 : vector<32x128xf32>
    %67 = arith.truncf %66 : vector<32x128xf32> to vector<32x128xbf16>
    %c0_24 = arith.constant 0 : index
    %c0_25 = arith.constant 0 : index
    %c0_26 = arith.constant 0 : index
    %68 = vector.load %arg8[%c0_24, %c0_25, %c0_26] : memref<2x1x128xf32, #tpu.memory_space<vmem>>, vector<1x1x128xf32>
    %69 = vector.shape_cast %68 : vector<1x1x128xf32> to vector<1x128xf32>
    %c0_27 = arith.constant 0 : index
    %c0_28 = arith.constant 0 : index
    %c0_29 = arith.constant 0 : index
    %70 = vector.load %arg9[%c0_27, %c0_28, %c0_29] : memref<2x1x128xf32, #tpu.memory_space<vmem>>, vector<1x1x128xf32>
    %71 = vector.shape_cast %70 : vector<1x1x128xf32> to vector<1x128xf32>
    %cst_30 = arith.constant dense<0.000000e+00> : vector<32xf32>
    %72 = vector.multi_reduction <add>, %58, %cst_30 [1] : vector<32x128xf32> to vector<32xf32>
    %73 = vector.shape_cast %72 : vector<32xf32> to vector<32x1xf32>
    %cst_31 = arith.constant 1.280000e+02 : f32
    %74 = vector.broadcast %cst_31 : f32 to vector<32x1xf32>
    %75 = arith.divf %73, %74 : vector<32x1xf32>
    %76 = vector.broadcast %75 : vector<32x1xf32> to vector<32x128xf32>
    %77 = arith.subf %58, %76 : vector<32x128xf32>
    %78 = arith.mulf %77, %77 : vector<32x128xf32>
    %cst_32 = arith.constant dense<0.000000e+00> : vector<32xf32>
    %79 = vector.multi_reduction <add>, %78, %cst_32 [1] : vector<32x128xf32> to vector<32xf32>
    %80 = vector.shape_cast %79 : vector<32xf32> to vector<32x1xf32>
    %cst_33 = arith.constant 1.280000e+02 : f32
    %81 = vector.broadcast %cst_33 : f32 to vector<32x1xf32>
    %82 = arith.divf %80, %81 : vector<32x1xf32>
    %83 = vector.broadcast %75 : vector<32x1xf32> to vector<32x128xf32>
    %84 = arith.subf %58, %83 : vector<32x128xf32>
    %cst_34 = arith.constant 9.99999997E-7 : f32
    %85 = vector.broadcast %cst_34 : f32 to vector<32x1xf32>
    %86 = arith.addf %82, %85 : vector<32x1xf32>
    %87 = math.rsqrt %86 : vector<32x1xf32>
    %88 = vector.broadcast %87 : vector<32x1xf32> to vector<32x128xf32>
    %89 = arith.mulf %84, %88 : vector<32x128xf32>
    %90 = vector.broadcast %69 : vector<1x128xf32> to vector<32x128xf32>
    %91 = arith.mulf %89, %90 : vector<32x128xf32>
    %92 = vector.broadcast %71 : vector<1x128xf32> to vector<32x128xf32>
    %93 = arith.addf %91, %92 : vector<32x128xf32>
    %94 = arith.truncf %93 : vector<32x128xf32> to vector<32x128xbf16>
    %c0_35 = arith.constant 0 : index
    %c0_36 = arith.constant 0 : index
    %c0_37 = arith.constant 0 : index
    %95 = vector.load %arg10[%c0_35, %c0_36, %c0_37] : memref<2x128x128xbf16, #tpu.memory_space<vmem>>, vector<1x128x128xbf16>
    %96 = vector.shape_cast %95 : vector<1x128x128xbf16> to vector<128x128xbf16>
    %cst_38 = arith.constant dense<0.000000e+00> : vector<32x128xf32>
    %97 = tpu.matmul %94, %96, %cst_38 {dimension_numbers = #tpu.dot_dimension_numbers<[1], [0], [0], [1], [0, 0, 1, 1], [], []>} : vector<32x128xbf16>, vector<128x128xbf16>, vector<32x128xf32> -> vector<32x128xf32>
    %c0_39 = arith.constant 0 : index
    %c0_40 = arith.constant 0 : index
    %c0_41 = arith.constant 0 : index
    %98 = vector.load %arg11[%c0_39, %c0_40, %c0_41] : memref<2x1x128xf32, #tpu.memory_space<vmem>>, vector<1x1x128xf32>
    %99 = vector.shape_cast %98 : vector<1x1x128xf32> to vector<1x128xf32>
    %100 = vector.broadcast %99 : vector<1x128xf32> to vector<32x128xf32>
    %101 = arith.addf %97, %100 : vector<32x128xf32>
    %c0_42 = arith.constant 0 : index
    %c0_43 = arith.constant 0 : index
    %c0_44 = arith.constant 0 : index
    %102 = vector.load %arg12[%c0_42, %c0_43, %c0_44] : memref<2x128x128xbf16, #tpu.memory_space<vmem>>, vector<1x128x128xbf16>
    %103 = vector.shape_cast %102 : vector<1x128x128xbf16> to vector<128x128xbf16>
    %cst_45 = arith.constant dense<0.000000e+00> : vector<32x128xf32>
    %104 = tpu.matmul %67, %103, %cst_45 {dimension_numbers = #tpu.dot_dimension_numbers<[1], [0], [0], [1], [0, 0, 1, 1], [], []>} : vector<32x128xbf16>, vector<128x128xbf16>, vector<32x128xf32> -> vector<32x128xf32>
    %c0_46 = arith.constant 0 : index
    %c0_47 = arith.constant 0 : index
    %c0_48 = arith.constant 0 : index
    %105 = vector.load %arg13[%c0_46, %c0_47, %c0_48] : memref<2x1x128xf32, #tpu.memory_space<vmem>>, vector<1x1x128xf32>
    %106 = vector.shape_cast %105 : vector<1x1x128xf32> to vector<1x128xf32>
    %107 = vector.broadcast %106 : vector<1x128xf32> to vector<32x128xf32>
    %108 = arith.addf %104, %107 : vector<32x128xf32>
    %c0_49 = arith.constant 0 : index
    %c0_50 = arith.constant 0 : index
    %c0_51 = arith.constant 0 : index
    %109 = vector.load %arg14[%c0_49, %c0_50, %c0_51] : memref<2x128x128xbf16, #tpu.memory_space<vmem>>, vector<1x128x128xbf16>
    %110 = vector.shape_cast %109 : vector<1x128x128xbf16> to vector<128x128xbf16>
    %cst_52 = arith.constant dense<0.000000e+00> : vector<32x128xf32>
    %111 = tpu.matmul %67, %110, %cst_52 {dimension_numbers = #tpu.dot_dimension_numbers<[1], [0], [0], [1], [0, 0, 1, 1], [], []>} : vector<32x128xbf16>, vector<128x128xbf16>, vector<32x128xf32> -> vector<32x128xf32>
    %c0_53 = arith.constant 0 : index
    %c0_54 = arith.constant 0 : index
    %c0_55 = arith.constant 0 : index
    %112 = vector.load %arg15[%c0_53, %c0_54, %c0_55] : memref<2x1x128xf32, #tpu.memory_space<vmem>>, vector<1x1x128xf32>
    %113 = vector.shape_cast %112 : vector<1x1x128xf32> to vector<1x128xf32>
    %114 = vector.broadcast %113 : vector<1x128xf32> to vector<32x128xf32>
    %115 = arith.addf %111, %114 : vector<32x128xf32>
    %c0_56 = arith.constant 0 : index
    %c0_57 = arith.constant 0 : index
    %c0_58 = arith.constant 0 : index
    %116 = vector.load %arg16[%c0_56, %c0_57, %c0_58] : memref<2x128x128xbf16, #tpu.memory_space<vmem>>, vector<1x128x128xbf16>
    %117 = vector.shape_cast %116 : vector<1x128x128xbf16> to vector<128x128xbf16>
    %cst_59 = arith.constant 0.000000e+00 : f32
    %118 = vector.broadcast %cst_59 : f32 to vector<32x128xf32>
    %119 = vector.extract_strided_slice %101 {offsets = [0, 0], sizes = [32, 32], strides = [1, 1]} : vector<32x128xf32> to vector<32x32xf32>
    %120 = arith.truncf %119 : vector<32x32xf32> to vector<32x32xbf16>
    %121 = vector.extract_strided_slice %108 {offsets = [0, 0], sizes = [32, 32], strides = [1, 1]} : vector<32x128xf32> to vector<32x32xf32>
    %122 = arith.truncf %121 : vector<32x32xf32> to vector<32x32xbf16>
    %123 = vector.extract_strided_slice %115 {offsets = [0, 0], sizes = [32, 32], strides = [1, 1]} : vector<32x128xf32> to vector<32x32xf32>
    %124 = arith.truncf %123 : vector<32x32xf32> to vector<32x32xbf16>
    %cst_60 = arith.constant dense<0.000000e+00> : vector<32x32xf32>
    %125 = tpu.matmul %120, %122, %cst_60 {dimension_numbers = #tpu.dot_dimension_numbers<[1], [1], [0], [0], [0, 0, 1, 0], [], []>} : vector<32x32xbf16>, vector<32x32xbf16>, vector<32x32xf32> -> vector<32x32xf32>
    %cst_61 = arith.constant -1.000000e+30 : f32
    %126 = vector.broadcast %cst_61 : f32 to vector<32x32xf32>
    %127 = arith.select %38, %125, %126 : vector<32x32xi1>, vector<32x32xf32>
    %cst_62 = arith.constant dense<0xFF800000> : vector<32xf32>
    %128 = vector.multi_reduction <maximumf>, %127, %cst_62 [1] : vector<32x32xf32> to vector<32xf32>
    %129 = vector.shape_cast %128 : vector<32xf32> to vector<32x1xf32>
    %130 = vector.broadcast %129 : vector<32x1xf32> to vector<32x32xf32>
    %131 = arith.subf %127, %130 : vector<32x32xf32>
    %132 = math.exp %131 : vector<32x32xf32>
    %cst_63 = arith.constant dense<0.000000e+00> : vector<32xf32>
    %133 = vector.multi_reduction <add>, %132, %cst_63 [1] : vector<32x32xf32> to vector<32xf32>
    %134 = vector.shape_cast %133 : vector<32xf32> to vector<32x1xf32>
    %135 = tpu.reciprocal %134 {approx = true} : vector<32x1xf32> -> vector<32x1xf32>
    %136 = vector.broadcast %135 : vector<32x1xf32> to vector<32x32xf32>
    %137 = arith.mulf %132, %136 : vector<32x32xf32>
    %138 = arith.truncf %137 : vector<32x32xf32> to vector<32x32xbf16>
    %cst_64 = arith.constant dense<0.000000e+00> : vector<32x32xf32>
    %139 = tpu.matmul %138, %124, %cst_64 {dimension_numbers = #tpu.dot_dimension_numbers<[1], [0], [0], [1], [0, 0, 1, 1], [], []>} : vector<32x32xbf16>, vector<32x32xbf16>, vector<32x32xf32> -> vector<32x32xf32>
    %140 = arith.truncf %139 : vector<32x32xf32> to vector<32x32xbf16>
    %141 = vector.extract_strided_slice %117 {offsets = [0, 0], sizes = [32, 128], strides = [1, 1]} : vector<128x128xbf16> to vector<32x128xbf16>
    %cst_65 = arith.constant dense<0.000000e+00> : vector<32x128xf32>
    %142 = tpu.matmul %140, %141, %cst_65 {dimension_numbers = #tpu.dot_dimension_numbers<[1], [0], [0], [1], [0, 0, 1, 1], [], []>} : vector<32x32xbf16>, vector<32x128xbf16>, vector<32x128xf32> -> vector<32x128xf32>
    %143 = arith.addf %118, %142 : vector<32x128xf32>
    %144 = vector.extract_strided_slice %101 {offsets = [0, 32], sizes = [32, 32], strides = [1, 1]} : vector<32x128xf32> to vector<32x32xf32>
    %145 = arith.truncf %144 : vector<32x32xf32> to vector<32x32xbf16>
    %146 = vector.extract_strided_slice %108 {offsets = [0, 32], sizes = [32, 32], strides = [1, 1]} : vector<32x128xf32> to vector<32x32xf32>
    %147 = arith.truncf %146 : vector<32x32xf32> to vector<32x32xbf16>
    %148 = vector.extract_strided_slice %115 {offsets = [0, 32], sizes = [32, 32], strides = [1, 1]} : vector<32x128xf32> to vector<32x32xf32>
    %149 = arith.truncf %148 : vector<32x32xf32> to vector<32x32xbf16>
    %cst_66 = arith.constant dense<0.000000e+00> : vector<32x32xf32>
    %150 = tpu.matmul %145, %147, %cst_66 {dimension_numbers = #tpu.dot_dimension_numbers<[1], [1], [0], [0], [0, 0, 1, 0], [], []>} : vector<32x32xbf16>, vector<32x32xbf16>, vector<32x32xf32> -> vector<32x32xf32>
    %cst_67 = arith.constant -1.000000e+30 : f32
    %151 = vector.broadcast %cst_67 : f32 to vector<32x32xf32>
    %152 = arith.select %38, %150, %151 : vector<32x32xi1>, vector<32x32xf32>
    %cst_68 = arith.constant dense<0xFF800000> : vector<32xf32>
    %153 = vector.multi_reduction <maximumf>, %152, %cst_68 [1] : vector<32x32xf32> to vector<32xf32>
    %154 = vector.shape_cast %153 : vector<32xf32> to vector<32x1xf32>
    %155 = vector.broadcast %154 : vector<32x1xf32> to vector<32x32xf32>
    %156 = arith.subf %152, %155 : vector<32x32xf32>
    %157 = math.exp %156 : vector<32x32xf32>
    %cst_69 = arith.constant dense<0.000000e+00> : vector<32xf32>
    %158 = vector.multi_reduction <add>, %157, %cst_69 [1] : vector<32x32xf32> to vector<32xf32>
    %159 = vector.shape_cast %158 : vector<32xf32> to vector<32x1xf32>
    %160 = tpu.reciprocal %159 {approx = true} : vector<32x1xf32> -> vector<32x1xf32>
    %161 = vector.broadcast %160 : vector<32x1xf32> to vector<32x32xf32>
    %162 = arith.mulf %157, %161 : vector<32x32xf32>
    %163 = arith.truncf %162 : vector<32x32xf32> to vector<32x32xbf16>
    %cst_70 = arith.constant dense<0.000000e+00> : vector<32x32xf32>
    %164 = tpu.matmul %163, %149, %cst_70 {dimension_numbers = #tpu.dot_dimension_numbers<[1], [0], [0], [1], [0, 0, 1, 1], [], []>} : vector<32x32xbf16>, vector<32x32xbf16>, vector<32x32xf32> -> vector<32x32xf32>
    %165 = arith.truncf %164 : vector<32x32xf32> to vector<32x32xbf16>
    %166 = vector.extract_strided_slice %117 {offsets = [32, 0], sizes = [32, 128], strides = [1, 1]} : vector<128x128xbf16> to vector<32x128xbf16>
    %cst_71 = arith.constant dense<0.000000e+00> : vector<32x128xf32>
    %167 = tpu.matmul %165, %166, %cst_71 {dimension_numbers = #tpu.dot_dimension_numbers<[1], [0], [0], [1], [0, 0, 1, 1], [], []>} : vector<32x32xbf16>, vector<32x128xbf16>, vector<32x128xf32> -> vector<32x128xf32>
    %168 = arith.addf %143, %167 : vector<32x128xf32>
    %169 = vector.extract_strided_slice %101 {offsets = [0, 64], sizes = [32, 32], strides = [1, 1]} : vector<32x128xf32> to vector<32x32xf32>
    %170 = arith.truncf %169 : vector<32x32xf32> to vector<32x32xbf16>
    %171 = vector.extract_strided_slice %108 {offsets = [0, 64], sizes = [32, 32], strides = [1, 1]} : vector<32x128xf32> to vector<32x32xf32>
    %172 = arith.truncf %171 : vector<32x32xf32> to vector<32x32xbf16>
    %173 = vector.extract_strided_slice %115 {offsets = [0, 64], sizes = [32, 32], strides = [1, 1]} : vector<32x128xf32> to vector<32x32xf32>
    %174 = arith.truncf %173 : vector<32x32xf32> to vector<32x32xbf16>
    %cst_72 = arith.constant dense<0.000000e+00> : vector<32x32xf32>
    %175 = tpu.matmul %170, %172, %cst_72 {dimension_numbers = #tpu.dot_dimension_numbers<[1], [1], [0], [0], [0, 0, 1, 0], [], []>} : vector<32x32xbf16>, vector<32x32xbf16>, vector<32x32xf32> -> vector<32x32xf32>
    %cst_73 = arith.constant -1.000000e+30 : f32
    %176 = vector.broadcast %cst_73 : f32 to vector<32x32xf32>
    %177 = arith.select %38, %175, %176 : vector<32x32xi1>, vector<32x32xf32>
    %cst_74 = arith.constant dense<0xFF800000> : vector<32xf32>
    %178 = vector.multi_reduction <maximumf>, %177, %cst_74 [1] : vector<32x32xf32> to vector<32xf32>
    %179 = vector.shape_cast %178 : vector<32xf32> to vector<32x1xf32>
    %180 = vector.broadcast %179 : vector<32x1xf32> to vector<32x32xf32>
    %181 = arith.subf %177, %180 : vector<32x32xf32>
    %182 = math.exp %181 : vector<32x32xf32>
    %cst_75 = arith.constant dense<0.000000e+00> : vector<32xf32>
    %183 = vector.multi_reduction <add>, %182, %cst_75 [1] : vector<32x32xf32> to vector<32xf32>
    %184 = vector.shape_cast %183 : vector<32xf32> to vector<32x1xf32>
    %185 = tpu.reciprocal %184 {approx = true} : vector<32x1xf32> -> vector<32x1xf32>
    %186 = vector.broadcast %185 : vector<32x1xf32> to vector<32x32xf32>
    %187 = arith.mulf %182, %186 : vector<32x32xf32>
    %188 = arith.truncf %187 : vector<32x32xf32> to vector<32x32xbf16>
    %cst_76 = arith.constant dense<0.000000e+00> : vector<32x32xf32>
    %189 = tpu.matmul %188, %174, %cst_76 {dimension_numbers = #tpu.dot_dimension_numbers<[1], [0], [0], [1], [0, 0, 1, 1], [], []>} : vector<32x32xbf16>, vector<32x32xbf16>, vector<32x32xf32> -> vector<32x32xf32>
    %190 = arith.truncf %189 : vector<32x32xf32> to vector<32x32xbf16>
    %191 = vector.extract_strided_slice %117 {offsets = [64, 0], sizes = [32, 128], strides = [1, 1]} : vector<128x128xbf16> to vector<32x128xbf16>
    %cst_77 = arith.constant dense<0.000000e+00> : vector<32x128xf32>
    %192 = tpu.matmul %190, %191, %cst_77 {dimension_numbers = #tpu.dot_dimension_numbers<[1], [0], [0], [1], [0, 0, 1, 1], [], []>} : vector<32x32xbf16>, vector<32x128xbf16>, vector<32x128xf32> -> vector<32x128xf32>
    %193 = arith.addf %168, %192 : vector<32x128xf32>
    %194 = vector.extract_strided_slice %101 {offsets = [0, 96], sizes = [32, 32], strides = [1, 1]} : vector<32x128xf32> to vector<32x32xf32>
    %195 = arith.truncf %194 : vector<32x32xf32> to vector<32x32xbf16>
    %196 = vector.extract_strided_slice %108 {offsets = [0, 96], sizes = [32, 32], strides = [1, 1]} : vector<32x128xf32> to vector<32x32xf32>
    %197 = arith.truncf %196 : vector<32x32xf32> to vector<32x32xbf16>
    %198 = vector.extract_strided_slice %115 {offsets = [0, 96], sizes = [32, 32], strides = [1, 1]} : vector<32x128xf32> to vector<32x32xf32>
    %199 = arith.truncf %198 : vector<32x32xf32> to vector<32x32xbf16>
    %cst_78 = arith.constant dense<0.000000e+00> : vector<32x32xf32>
    %200 = tpu.matmul %195, %197, %cst_78 {dimension_numbers = #tpu.dot_dimension_numbers<[1], [1], [0], [0], [0, 0, 1, 0], [], []>} : vector<32x32xbf16>, vector<32x32xbf16>, vector<32x32xf32> -> vector<32x32xf32>
    %cst_79 = arith.constant -1.000000e+30 : f32
    %201 = vector.broadcast %cst_79 : f32 to vector<32x32xf32>
    %202 = arith.select %38, %200, %201 : vector<32x32xi1>, vector<32x32xf32>
    %cst_80 = arith.constant dense<0xFF800000> : vector<32xf32>
    %203 = vector.multi_reduction <maximumf>, %202, %cst_80 [1] : vector<32x32xf32> to vector<32xf32>
    %204 = vector.shape_cast %203 : vector<32xf32> to vector<32x1xf32>
    %205 = vector.broadcast %204 : vector<32x1xf32> to vector<32x32xf32>
    %206 = arith.subf %202, %205 : vector<32x32xf32>
    %207 = math.exp %206 : vector<32x32xf32>
    %cst_81 = arith.constant dense<0.000000e+00> : vector<32xf32>
    %208 = vector.multi_reduction <add>, %207, %cst_81 [1] : vector<32x32xf32> to vector<32xf32>
    %209 = vector.shape_cast %208 : vector<32xf32> to vector<32x1xf32>
    %210 = tpu.reciprocal %209 {approx = true} : vector<32x1xf32> -> vector<32x1xf32>
    %211 = vector.broadcast %210 : vector<32x1xf32> to vector<32x32xf32>
    %212 = arith.mulf %207, %211 : vector<32x32xf32>
    %213 = arith.truncf %212 : vector<32x32xf32> to vector<32x32xbf16>
    %cst_82 = arith.constant dense<0.000000e+00> : vector<32x32xf32>
    %214 = tpu.matmul %213, %199, %cst_82 {dimension_numbers = #tpu.dot_dimension_numbers<[1], [0], [0], [1], [0, 0, 1, 1], [], []>} : vector<32x32xbf16>, vector<32x32xbf16>, vector<32x32xf32> -> vector<32x32xf32>
    %215 = arith.truncf %214 : vector<32x32xf32> to vector<32x32xbf16>
    %216 = vector.extract_strided_slice %117 {offsets = [96, 0], sizes = [32, 128], strides = [1, 1]} : vector<128x128xbf16> to vector<32x128xbf16>
    %cst_83 = arith.constant dense<0.000000e+00> : vector<32x128xf32>
    %217 = tpu.matmul %215, %216, %cst_83 {dimension_numbers = #tpu.dot_dimension_numbers<[1], [0], [0], [1], [0, 0, 1, 1], [], []>} : vector<32x32xbf16>, vector<32x128xbf16>, vector<32x128xf32> -> vector<32x128xf32>
    %218 = arith.addf %193, %217 : vector<32x128xf32>
    %219 = arith.addf %58, %218 : vector<32x128xf32>
    %c0_84 = arith.constant 0 : index
    %c0_85 = arith.constant 0 : index
    %c0_86 = arith.constant 0 : index
    %220 = vector.load %arg17[%c0_84, %c0_85, %c0_86] : memref<2x1x128xf32, #tpu.memory_space<vmem>>, vector<1x1x128xf32>
    %221 = vector.shape_cast %220 : vector<1x1x128xf32> to vector<1x128xf32>
    %222 = vector.broadcast %221 : vector<1x128xf32> to vector<32x128xf32>
    %223 = arith.addf %219, %222 : vector<32x128xf32>
    %c0_87 = arith.constant 0 : index
    %c0_88 = arith.constant 0 : index
    %c0_89 = arith.constant 0 : index
    %224 = vector.load %arg18[%c0_87, %c0_88, %c0_89] : memref<2x1x128xf32, #tpu.memory_space<vmem>>, vector<1x1x128xf32>
    %225 = vector.shape_cast %224 : vector<1x1x128xf32> to vector<1x128xf32>
    %c0_90 = arith.constant 0 : index
    %c0_91 = arith.constant 0 : index
    %c0_92 = arith.constant 0 : index
    %226 = vector.load %arg19[%c0_90, %c0_91, %c0_92] : memref<2x1x128xf32, #tpu.memory_space<vmem>>, vector<1x1x128xf32>
    %227 = vector.shape_cast %226 : vector<1x1x128xf32> to vector<1x128xf32>
    %cst_93 = arith.constant dense<0.000000e+00> : vector<32xf32>
    %228 = vector.multi_reduction <add>, %223, %cst_93 [1] : vector<32x128xf32> to vector<32xf32>
    %229 = vector.shape_cast %228 : vector<32xf32> to vector<32x1xf32>
    %cst_94 = arith.constant 1.280000e+02 : f32
    %230 = vector.broadcast %cst_94 : f32 to vector<32x1xf32>
    %231 = arith.divf %229, %230 : vector<32x1xf32>
    %232 = vector.broadcast %231 : vector<32x1xf32> to vector<32x128xf32>
    %233 = arith.subf %223, %232 : vector<32x128xf32>
    %234 = arith.mulf %233, %233 : vector<32x128xf32>
    %cst_95 = arith.constant dense<0.000000e+00> : vector<32xf32>
    %235 = vector.multi_reduction <add>, %234, %cst_95 [1] : vector<32x128xf32> to vector<32xf32>
    %236 = vector.shape_cast %235 : vector<32xf32> to vector<32x1xf32>
    %cst_96 = arith.constant 1.280000e+02 : f32
    %237 = vector.broadcast %cst_96 : f32 to vector<32x1xf32>
    %238 = arith.divf %236, %237 : vector<32x1xf32>
    %239 = vector.broadcast %231 : vector<32x1xf32> to vector<32x128xf32>
    %240 = arith.subf %223, %239 : vector<32x128xf32>
    %cst_97 = arith.constant 9.99999997E-7 : f32
    %241 = vector.broadcast %cst_97 : f32 to vector<32x1xf32>
    %242 = arith.addf %238, %241 : vector<32x1xf32>
    %243 = math.rsqrt %242 : vector<32x1xf32>
    %244 = vector.broadcast %243 : vector<32x1xf32> to vector<32x128xf32>
    %245 = arith.mulf %240, %244 : vector<32x128xf32>
    %246 = vector.broadcast %225 : vector<1x128xf32> to vector<32x128xf32>
    %247 = arith.mulf %245, %246 : vector<32x128xf32>
    %248 = vector.broadcast %227 : vector<1x128xf32> to vector<32x128xf32>
    %249 = arith.addf %247, %248 : vector<32x128xf32>
    %250 = arith.truncf %249 : vector<32x128xf32> to vector<32x128xbf16>
    %c0_98 = arith.constant 0 : index
    %c0_99 = arith.constant 0 : index
    %c0_100 = arith.constant 0 : index
    %251 = vector.load %arg20[%c0_98, %c0_99, %c0_100] : memref<2x128x512xbf16, #tpu.memory_space<vmem>>, vector<1x128x512xbf16>
    %252 = vector.shape_cast %251 : vector<1x128x512xbf16> to vector<128x512xbf16>
    %cst_101 = arith.constant dense<0.000000e+00> : vector<32x512xf32>
    %253 = tpu.matmul %250, %252, %cst_101 {dimension_numbers = #tpu.dot_dimension_numbers<[1], [0], [0], [1], [0, 0, 1, 1], [], []>} : vector<32x128xbf16>, vector<128x512xbf16>, vector<32x512xf32> -> vector<32x512xf32>
    %c0_102 = arith.constant 0 : index
    %c0_103 = arith.constant 0 : index
    %c0_104 = arith.constant 0 : index
    %254 = vector.load %arg21[%c0_102, %c0_103, %c0_104] : memref<2x1x512xf32, #tpu.memory_space<vmem>>, vector<1x1x512xf32>
    %255 = vector.shape_cast %254 : vector<1x1x512xf32> to vector<1x512xf32>
    %256 = vector.broadcast %255 : vector<1x512xf32> to vector<32x512xf32>
    %257 = arith.addf %253, %256 : vector<32x512xf32>
    %258 = arith.mulf %257, %257 : vector<32x512xf32>
    %259 = arith.mulf %257, %258 : vector<32x512xf32>
    %cst_105 = arith.constant 4.471500e-02 : f32
    %260 = vector.broadcast %cst_105 : f32 to vector<32x512xf32>
    %261 = arith.mulf %260, %259 : vector<32x512xf32>
    %262 = arith.addf %257, %261 : vector<32x512xf32>
    %cst_106 = arith.constant 0.797884583 : f32
    %263 = vector.broadcast %cst_106 : f32 to vector<32x512xf32>
    %264 = arith.mulf %263, %262 : vector<32x512xf32>
    %265 = math.tanh %264 : vector<32x512xf32>
    %cst_107 = arith.constant 1.000000e+00 : f32
    %266 = vector.broadcast %cst_107 : f32 to vector<32x512xf32>
    %267 = arith.addf %266, %265 : vector<32x512xf32>
    %cst_108 = arith.constant 5.000000e-01 : f32
    %268 = vector.broadcast %cst_108 : f32 to vector<32x512xf32>
    %269 = arith.mulf %268, %267 : vector<32x512xf32>
    %270 = arith.mulf %257, %269 : vector<32x512xf32>
    %271 = arith.truncf %270 : vector<32x512xf32> to vector<32x512xbf16>
    %c0_109 = arith.constant 0 : index
    %c0_110 = arith.constant 0 : index
    %c0_111 = arith.constant 0 : index
    %272 = vector.load %arg22[%c0_109, %c0_110, %c0_111] : memref<2x512x128xbf16, #tpu.memory_space<vmem>>, vector<1x512x128xbf16>
    %273 = vector.shape_cast %272 : vector<1x512x128xbf16> to vector<512x128xbf16>
    %cst_112 = arith.constant dense<0.000000e+00> : vector<32x128xf32>
    %274 = tpu.matmul %271, %273, %cst_112 {dimension_numbers = #tpu.dot_dimension_numbers<[1], [0], [0], [1], [0, 0, 1, 1], [], []>} : vector<32x512xbf16>, vector<512x128xbf16>, vector<32x128xf32> -> vector<32x128xf32>
    %275 = arith.addf %223, %274 : vector<32x128xf32>
    %c0_113 = arith.constant 0 : index
    %c0_114 = arith.constant 0 : index
    %c0_115 = arith.constant 0 : index
    %276 = vector.load %arg23[%c0_113, %c0_114, %c0_115] : memref<2x1x128xf32, #tpu.memory_space<vmem>>, vector<1x1x128xf32>
    %277 = vector.shape_cast %276 : vector<1x1x128xf32> to vector<1x128xf32>
    %278 = vector.broadcast %277 : vector<1x128xf32> to vector<32x128xf32>
    %279 = arith.addf %275, %278 : vector<32x128xf32>
    %c1 = arith.constant 1 : index
    %c0_116 = arith.constant 0 : index
    %c0_117 = arith.constant 0 : index
    %280 = vector.load %arg8[%c1, %c0_116, %c0_117] : memref<2x1x128xf32, #tpu.memory_space<vmem>>, vector<1x1x128xf32>
    %281 = vector.shape_cast %280 : vector<1x1x128xf32> to vector<1x128xf32>
    %c1_118 = arith.constant 1 : index
    %c0_119 = arith.constant 0 : index
    %c0_120 = arith.constant 0 : index
    %282 = vector.load %arg9[%c1_118, %c0_119, %c0_120] : memref<2x1x128xf32, #tpu.memory_space<vmem>>, vector<1x1x128xf32>
    %283 = vector.shape_cast %282 : vector<1x1x128xf32> to vector<1x128xf32>
    %cst_121 = arith.constant dense<0.000000e+00> : vector<32xf32>
    %284 = vector.multi_reduction <add>, %279, %cst_121 [1] : vector<32x128xf32> to vector<32xf32>
    %285 = vector.shape_cast %284 : vector<32xf32> to vector<32x1xf32>
    %cst_122 = arith.constant 1.280000e+02 : f32
    %286 = vector.broadcast %cst_122 : f32 to vector<32x1xf32>
    %287 = arith.divf %285, %286 : vector<32x1xf32>
    %288 = vector.broadcast %287 : vector<32x1xf32> to vector<32x128xf32>
    %289 = arith.subf %279, %288 : vector<32x128xf32>
    %290 = arith.mulf %289, %289 : vector<32x128xf32>
    %cst_123 = arith.constant dense<0.000000e+00> : vector<32xf32>
    %291 = vector.multi_reduction <add>, %290, %cst_123 [1] : vector<32x128xf32> to vector<32xf32>
    %292 = vector.shape_cast %291 : vector<32xf32> to vector<32x1xf32>
    %cst_124 = arith.constant 1.280000e+02 : f32
    %293 = vector.broadcast %cst_124 : f32 to vector<32x1xf32>
    %294 = arith.divf %292, %293 : vector<32x1xf32>
    %295 = vector.broadcast %287 : vector<32x1xf32> to vector<32x128xf32>
    %296 = arith.subf %279, %295 : vector<32x128xf32>
    %cst_125 = arith.constant 9.99999997E-7 : f32
    %297 = vector.broadcast %cst_125 : f32 to vector<32x1xf32>
    %298 = arith.addf %294, %297 : vector<32x1xf32>
    %299 = math.rsqrt %298 : vector<32x1xf32>
    %300 = vector.broadcast %299 : vector<32x1xf32> to vector<32x128xf32>
    %301 = arith.mulf %296, %300 : vector<32x128xf32>
    %302 = vector.broadcast %281 : vector<1x128xf32> to vector<32x128xf32>
    %303 = arith.mulf %301, %302 : vector<32x128xf32>
    %304 = vector.broadcast %283 : vector<1x128xf32> to vector<32x128xf32>
    %305 = arith.addf %303, %304 : vector<32x128xf32>
    %306 = arith.truncf %305 : vector<32x128xf32> to vector<32x128xbf16>
    %c1_126 = arith.constant 1 : index
    %c0_127 = arith.constant 0 : index
    %c0_128 = arith.constant 0 : index
    %307 = vector.load %arg10[%c1_126, %c0_127, %c0_128] : memref<2x128x128xbf16, #tpu.memory_space<vmem>>, vector<1x128x128xbf16>
    %308 = vector.shape_cast %307 : vector<1x128x128xbf16> to vector<128x128xbf16>
    %cst_129 = arith.constant dense<0.000000e+00> : vector<32x128xf32>
    %309 = tpu.matmul %306, %308, %cst_129 {dimension_numbers = #tpu.dot_dimension_numbers<[1], [0], [0], [1], [0, 0, 1, 1], [], []>} : vector<32x128xbf16>, vector<128x128xbf16>, vector<32x128xf32> -> vector<32x128xf32>
    %c1_130 = arith.constant 1 : index
    %c0_131 = arith.constant 0 : index
    %c0_132 = arith.constant 0 : index
    %310 = vector.load %arg11[%c1_130, %c0_131, %c0_132] : memref<2x1x128xf32, #tpu.memory_space<vmem>>, vector<1x1x128xf32>
    %311 = vector.shape_cast %310 : vector<1x1x128xf32> to vector<1x128xf32>
    %312 = vector.broadcast %311 : vector<1x128xf32> to vector<32x128xf32>
    %313 = arith.addf %309, %312 : vector<32x128xf32>
    %c1_133 = arith.constant 1 : index
    %c0_134 = arith.constant 0 : index
    %c0_135 = arith.constant 0 : index
    %314 = vector.load %arg12[%c1_133, %c0_134, %c0_135] : memref<2x128x128xbf16, #tpu.memory_space<vmem>>, vector<1x128x128xbf16>
    %315 = vector.shape_cast %314 : vector<1x128x128xbf16> to vector<128x128xbf16>
    %cst_136 = arith.constant dense<0.000000e+00> : vector<32x128xf32>
    %316 = tpu.matmul %67, %315, %cst_136 {dimension_numbers = #tpu.dot_dimension_numbers<[1], [0], [0], [1], [0, 0, 1, 1], [], []>} : vector<32x128xbf16>, vector<128x128xbf16>, vector<32x128xf32> -> vector<32x128xf32>
    %c1_137 = arith.constant 1 : index
    %c0_138 = arith.constant 0 : index
    %c0_139 = arith.constant 0 : index
    %317 = vector.load %arg13[%c1_137, %c0_138, %c0_139] : memref<2x1x128xf32, #tpu.memory_space<vmem>>, vector<1x1x128xf32>
    %318 = vector.shape_cast %317 : vector<1x1x128xf32> to vector<1x128xf32>
    %319 = vector.broadcast %318 : vector<1x128xf32> to vector<32x128xf32>
    %320 = arith.addf %316, %319 : vector<32x128xf32>
    %c1_140 = arith.constant 1 : index
    %c0_141 = arith.constant 0 : index
    %c0_142 = arith.constant 0 : index
    %321 = vector.load %arg14[%c1_140, %c0_141, %c0_142] : memref<2x128x128xbf16, #tpu.memory_space<vmem>>, vector<1x128x128xbf16>
    %322 = vector.shape_cast %321 : vector<1x128x128xbf16> to vector<128x128xbf16>
    %cst_143 = arith.constant dense<0.000000e+00> : vector<32x128xf32>
    %323 = tpu.matmul %67, %322, %cst_143 {dimension_numbers = #tpu.dot_dimension_numbers<[1], [0], [0], [1], [0, 0, 1, 1], [], []>} : vector<32x128xbf16>, vector<128x128xbf16>, vector<32x128xf32> -> vector<32x128xf32>
    %c1_144 = arith.constant 1 : index
    %c0_145 = arith.constant 0 : index
    %c0_146 = arith.constant 0 : index
    %324 = vector.load %arg15[%c1_144, %c0_145, %c0_146] : memref<2x1x128xf32, #tpu.memory_space<vmem>>, vector<1x1x128xf32>
    %325 = vector.shape_cast %324 : vector<1x1x128xf32> to vector<1x128xf32>
    %326 = vector.broadcast %325 : vector<1x128xf32> to vector<32x128xf32>
    %327 = arith.addf %323, %326 : vector<32x128xf32>
    %c1_147 = arith.constant 1 : index
    %c0_148 = arith.constant 0 : index
    %c0_149 = arith.constant 0 : index
    %328 = vector.load %arg16[%c1_147, %c0_148, %c0_149] : memref<2x128x128xbf16, #tpu.memory_space<vmem>>, vector<1x128x128xbf16>
    %329 = vector.shape_cast %328 : vector<1x128x128xbf16> to vector<128x128xbf16>
    %cst_150 = arith.constant 0.000000e+00 : f32
    %330 = vector.broadcast %cst_150 : f32 to vector<32x128xf32>
    %331 = vector.extract_strided_slice %313 {offsets = [0, 0], sizes = [32, 32], strides = [1, 1]} : vector<32x128xf32> to vector<32x32xf32>
    %332 = arith.truncf %331 : vector<32x32xf32> to vector<32x32xbf16>
    %333 = vector.extract_strided_slice %320 {offsets = [0, 0], sizes = [32, 32], strides = [1, 1]} : vector<32x128xf32> to vector<32x32xf32>
    %334 = arith.truncf %333 : vector<32x32xf32> to vector<32x32xbf16>
    %335 = vector.extract_strided_slice %327 {offsets = [0, 0], sizes = [32, 32], strides = [1, 1]} : vector<32x128xf32> to vector<32x32xf32>
    %336 = arith.truncf %335 : vector<32x32xf32> to vector<32x32xbf16>
    %cst_151 = arith.constant dense<0.000000e+00> : vector<32x32xf32>
    %337 = tpu.matmul %332, %334, %cst_151 {dimension_numbers = #tpu.dot_dimension_numbers<[1], [1], [0], [0], [0, 0, 1, 0], [], []>} : vector<32x32xbf16>, vector<32x32xbf16>, vector<32x32xf32> -> vector<32x32xf32>
    %cst_152 = arith.constant -1.000000e+30 : f32
    %338 = vector.broadcast %cst_152 : f32 to vector<32x32xf32>
    %339 = arith.select %38, %337, %338 : vector<32x32xi1>, vector<32x32xf32>
    %cst_153 = arith.constant dense<0xFF800000> : vector<32xf32>
    %340 = vector.multi_reduction <maximumf>, %339, %cst_153 [1] : vector<32x32xf32> to vector<32xf32>
    %341 = vector.shape_cast %340 : vector<32xf32> to vector<32x1xf32>
    %342 = vector.broadcast %341 : vector<32x1xf32> to vector<32x32xf32>
    %343 = arith.subf %339, %342 : vector<32x32xf32>
    %344 = math.exp %343 : vector<32x32xf32>
    %cst_154 = arith.constant dense<0.000000e+00> : vector<32xf32>
    %345 = vector.multi_reduction <add>, %344, %cst_154 [1] : vector<32x32xf32> to vector<32xf32>
    %346 = vector.shape_cast %345 : vector<32xf32> to vector<32x1xf32>
    %347 = tpu.reciprocal %346 {approx = true} : vector<32x1xf32> -> vector<32x1xf32>
    %348 = vector.broadcast %347 : vector<32x1xf32> to vector<32x32xf32>
    %349 = arith.mulf %344, %348 : vector<32x32xf32>
    %350 = arith.truncf %349 : vector<32x32xf32> to vector<32x32xbf16>
    %cst_155 = arith.constant dense<0.000000e+00> : vector<32x32xf32>
    %351 = tpu.matmul %350, %336, %cst_155 {dimension_numbers = #tpu.dot_dimension_numbers<[1], [0], [0], [1], [0, 0, 1, 1], [], []>} : vector<32x32xbf16>, vector<32x32xbf16>, vector<32x32xf32> -> vector<32x32xf32>
    %352 = arith.truncf %351 : vector<32x32xf32> to vector<32x32xbf16>
    %353 = vector.extract_strided_slice %329 {offsets = [0, 0], sizes = [32, 128], strides = [1, 1]} : vector<128x128xbf16> to vector<32x128xbf16>
    %cst_156 = arith.constant dense<0.000000e+00> : vector<32x128xf32>
    %354 = tpu.matmul %352, %353, %cst_156 {dimension_numbers = #tpu.dot_dimension_numbers<[1], [0], [0], [1], [0, 0, 1, 1], [], []>} : vector<32x32xbf16>, vector<32x128xbf16>, vector<32x128xf32> -> vector<32x128xf32>
    %355 = arith.addf %330, %354 : vector<32x128xf32>
    %356 = vector.extract_strided_slice %313 {offsets = [0, 32], sizes = [32, 32], strides = [1, 1]} : vector<32x128xf32> to vector<32x32xf32>
    %357 = arith.truncf %356 : vector<32x32xf32> to vector<32x32xbf16>
    %358 = vector.extract_strided_slice %320 {offsets = [0, 32], sizes = [32, 32], strides = [1, 1]} : vector<32x128xf32> to vector<32x32xf32>
    %359 = arith.truncf %358 : vector<32x32xf32> to vector<32x32xbf16>
    %360 = vector.extract_strided_slice %327 {offsets = [0, 32], sizes = [32, 32], strides = [1, 1]} : vector<32x128xf32> to vector<32x32xf32>
    %361 = arith.truncf %360 : vector<32x32xf32> to vector<32x32xbf16>
    %cst_157 = arith.constant dense<0.000000e+00> : vector<32x32xf32>
    %362 = tpu.matmul %357, %359, %cst_157 {dimension_numbers = #tpu.dot_dimension_numbers<[1], [1], [0], [0], [0, 0, 1, 0], [], []>} : vector<32x32xbf16>, vector<32x32xbf16>, vector<32x32xf32> -> vector<32x32xf32>
    %cst_158 = arith.constant -1.000000e+30 : f32
    %363 = vector.broadcast %cst_158 : f32 to vector<32x32xf32>
    %364 = arith.select %38, %362, %363 : vector<32x32xi1>, vector<32x32xf32>
    %cst_159 = arith.constant dense<0xFF800000> : vector<32xf32>
    %365 = vector.multi_reduction <maximumf>, %364, %cst_159 [1] : vector<32x32xf32> to vector<32xf32>
    %366 = vector.shape_cast %365 : vector<32xf32> to vector<32x1xf32>
    %367 = vector.broadcast %366 : vector<32x1xf32> to vector<32x32xf32>
    %368 = arith.subf %364, %367 : vector<32x32xf32>
    %369 = math.exp %368 : vector<32x32xf32>
    %cst_160 = arith.constant dense<0.000000e+00> : vector<32xf32>
    %370 = vector.multi_reduction <add>, %369, %cst_160 [1] : vector<32x32xf32> to vector<32xf32>
    %371 = vector.shape_cast %370 : vector<32xf32> to vector<32x1xf32>
    %372 = tpu.reciprocal %371 {approx = true} : vector<32x1xf32> -> vector<32x1xf32>
    %373 = vector.broadcast %372 : vector<32x1xf32> to vector<32x32xf32>
    %374 = arith.mulf %369, %373 : vector<32x32xf32>
    %375 = arith.truncf %374 : vector<32x32xf32> to vector<32x32xbf16>
    %cst_161 = arith.constant dense<0.000000e+00> : vector<32x32xf32>
    %376 = tpu.matmul %375, %361, %cst_161 {dimension_numbers = #tpu.dot_dimension_numbers<[1], [0], [0], [1], [0, 0, 1, 1], [], []>} : vector<32x32xbf16>, vector<32x32xbf16>, vector<32x32xf32> -> vector<32x32xf32>
    %377 = arith.truncf %376 : vector<32x32xf32> to vector<32x32xbf16>
    %378 = vector.extract_strided_slice %329 {offsets = [32, 0], sizes = [32, 128], strides = [1, 1]} : vector<128x128xbf16> to vector<32x128xbf16>
    %cst_162 = arith.constant dense<0.000000e+00> : vector<32x128xf32>
    %379 = tpu.matmul %377, %378, %cst_162 {dimension_numbers = #tpu.dot_dimension_numbers<[1], [0], [0], [1], [0, 0, 1, 1], [], []>} : vector<32x32xbf16>, vector<32x128xbf16>, vector<32x128xf32> -> vector<32x128xf32>
    %380 = arith.addf %355, %379 : vector<32x128xf32>
    %381 = vector.extract_strided_slice %313 {offsets = [0, 64], sizes = [32, 32], strides = [1, 1]} : vector<32x128xf32> to vector<32x32xf32>
    %382 = arith.truncf %381 : vector<32x32xf32> to vector<32x32xbf16>
    %383 = vector.extract_strided_slice %320 {offsets = [0, 64], sizes = [32, 32], strides = [1, 1]} : vector<32x128xf32> to vector<32x32xf32>
    %384 = arith.truncf %383 : vector<32x32xf32> to vector<32x32xbf16>
    %385 = vector.extract_strided_slice %327 {offsets = [0, 64], sizes = [32, 32], strides = [1, 1]} : vector<32x128xf32> to vector<32x32xf32>
    %386 = arith.truncf %385 : vector<32x32xf32> to vector<32x32xbf16>
    %cst_163 = arith.constant dense<0.000000e+00> : vector<32x32xf32>
    %387 = tpu.matmul %382, %384, %cst_163 {dimension_numbers = #tpu.dot_dimension_numbers<[1], [1], [0], [0], [0, 0, 1, 0], [], []>} : vector<32x32xbf16>, vector<32x32xbf16>, vector<32x32xf32> -> vector<32x32xf32>
    %cst_164 = arith.constant -1.000000e+30 : f32
    %388 = vector.broadcast %cst_164 : f32 to vector<32x32xf32>
    %389 = arith.select %38, %387, %388 : vector<32x32xi1>, vector<32x32xf32>
    %cst_165 = arith.constant dense<0xFF800000> : vector<32xf32>
    %390 = vector.multi_reduction <maximumf>, %389, %cst_165 [1] : vector<32x32xf32> to vector<32xf32>
    %391 = vector.shape_cast %390 : vector<32xf32> to vector<32x1xf32>
    %392 = vector.broadcast %391 : vector<32x1xf32> to vector<32x32xf32>
    %393 = arith.subf %389, %392 : vector<32x32xf32>
    %394 = math.exp %393 : vector<32x32xf32>
    %cst_166 = arith.constant dense<0.000000e+00> : vector<32xf32>
    %395 = vector.multi_reduction <add>, %394, %cst_166 [1] : vector<32x32xf32> to vector<32xf32>
    %396 = vector.shape_cast %395 : vector<32xf32> to vector<32x1xf32>
    %397 = tpu.reciprocal %396 {approx = true} : vector<32x1xf32> -> vector<32x1xf32>
    %398 = vector.broadcast %397 : vector<32x1xf32> to vector<32x32xf32>
    %399 = arith.mulf %394, %398 : vector<32x32xf32>
    %400 = arith.truncf %399 : vector<32x32xf32> to vector<32x32xbf16>
    %cst_167 = arith.constant dense<0.000000e+00> : vector<32x32xf32>
    %401 = tpu.matmul %400, %386, %cst_167 {dimension_numbers = #tpu.dot_dimension_numbers<[1], [0], [0], [1], [0, 0, 1, 1], [], []>} : vector<32x32xbf16>, vector<32x32xbf16>, vector<32x32xf32> -> vector<32x32xf32>
    %402 = arith.truncf %401 : vector<32x32xf32> to vector<32x32xbf16>
    %403 = vector.extract_strided_slice %329 {offsets = [64, 0], sizes = [32, 128], strides = [1, 1]} : vector<128x128xbf16> to vector<32x128xbf16>
    %cst_168 = arith.constant dense<0.000000e+00> : vector<32x128xf32>
    %404 = tpu.matmul %402, %403, %cst_168 {dimension_numbers = #tpu.dot_dimension_numbers<[1], [0], [0], [1], [0, 0, 1, 1], [], []>} : vector<32x32xbf16>, vector<32x128xbf16>, vector<32x128xf32> -> vector<32x128xf32>
    %405 = arith.addf %380, %404 : vector<32x128xf32>
    %406 = vector.extract_strided_slice %313 {offsets = [0, 96], sizes = [32, 32], strides = [1, 1]} : vector<32x128xf32> to vector<32x32xf32>
    %407 = arith.truncf %406 : vector<32x32xf32> to vector<32x32xbf16>
    %408 = vector.extract_strided_slice %320 {offsets = [0, 96], sizes = [32, 32], strides = [1, 1]} : vector<32x128xf32> to vector<32x32xf32>
    %409 = arith.truncf %408 : vector<32x32xf32> to vector<32x32xbf16>
    %410 = vector.extract_strided_slice %327 {offsets = [0, 96], sizes = [32, 32], strides = [1, 1]} : vector<32x128xf32> to vector<32x32xf32>
    %411 = arith.truncf %410 : vector<32x32xf32> to vector<32x32xbf16>
    %cst_169 = arith.constant dense<0.000000e+00> : vector<32x32xf32>
    %412 = tpu.matmul %407, %409, %cst_169 {dimension_numbers = #tpu.dot_dimension_numbers<[1], [1], [0], [0], [0, 0, 1, 0], [], []>} : vector<32x32xbf16>, vector<32x32xbf16>, vector<32x32xf32> -> vector<32x32xf32>
    %cst_170 = arith.constant -1.000000e+30 : f32
    %413 = vector.broadcast %cst_170 : f32 to vector<32x32xf32>
    %414 = arith.select %38, %412, %413 : vector<32x32xi1>, vector<32x32xf32>
    %cst_171 = arith.constant dense<0xFF800000> : vector<32xf32>
    %415 = vector.multi_reduction <maximumf>, %414, %cst_171 [1] : vector<32x32xf32> to vector<32xf32>
    %416 = vector.shape_cast %415 : vector<32xf32> to vector<32x1xf32>
    %417 = vector.broadcast %416 : vector<32x1xf32> to vector<32x32xf32>
    %418 = arith.subf %414, %417 : vector<32x32xf32>
    %419 = math.exp %418 : vector<32x32xf32>
    %cst_172 = arith.constant dense<0.000000e+00> : vector<32xf32>
    %420 = vector.multi_reduction <add>, %419, %cst_172 [1] : vector<32x32xf32> to vector<32xf32>
    %421 = vector.shape_cast %420 : vector<32xf32> to vector<32x1xf32>
    %422 = tpu.reciprocal %421 {approx = true} : vector<32x1xf32> -> vector<32x1xf32>
    %423 = vector.broadcast %422 : vector<32x1xf32> to vector<32x32xf32>
    %424 = arith.mulf %419, %423 : vector<32x32xf32>
    %425 = arith.truncf %424 : vector<32x32xf32> to vector<32x32xbf16>
    %cst_173 = arith.constant dense<0.000000e+00> : vector<32x32xf32>
    %426 = tpu.matmul %425, %411, %cst_173 {dimension_numbers = #tpu.dot_dimension_numbers<[1], [0], [0], [1], [0, 0, 1, 1], [], []>} : vector<32x32xbf16>, vector<32x32xbf16>, vector<32x32xf32> -> vector<32x32xf32>
    %427 = arith.truncf %426 : vector<32x32xf32> to vector<32x32xbf16>
    %428 = vector.extract_strided_slice %329 {offsets = [96, 0], sizes = [32, 128], strides = [1, 1]} : vector<128x128xbf16> to vector<32x128xbf16>
    %cst_174 = arith.constant dense<0.000000e+00> : vector<32x128xf32>
    %429 = tpu.matmul %427, %428, %cst_174 {dimension_numbers = #tpu.dot_dimension_numbers<[1], [0], [0], [1], [0, 0, 1, 1], [], []>} : vector<32x32xbf16>, vector<32x128xbf16>, vector<32x128xf32> -> vector<32x128xf32>
    %430 = arith.addf %405, %429 : vector<32x128xf32>
    %431 = arith.addf %279, %430 : vector<32x128xf32>
    %c1_175 = arith.constant 1 : index
    %c0_176 = arith.constant 0 : index
    %c0_177 = arith.constant 0 : index
    %432 = vector.load %arg17[%c1_175, %c0_176, %c0_177] : memref<2x1x128xf32, #tpu.memory_space<vmem>>, vector<1x1x128xf32>
    %433 = vector.shape_cast %432 : vector<1x1x128xf32> to vector<1x128xf32>
    %434 = vector.broadcast %433 : vector<1x128xf32> to vector<32x128xf32>
    %435 = arith.addf %431, %434 : vector<32x128xf32>
    %c1_178 = arith.constant 1 : index
    %c0_179 = arith.constant 0 : index
    %c0_180 = arith.constant 0 : index
    %436 = vector.load %arg18[%c1_178, %c0_179, %c0_180] : memref<2x1x128xf32, #tpu.memory_space<vmem>>, vector<1x1x128xf32>
    %437 = vector.shape_cast %436 : vector<1x1x128xf32> to vector<1x128xf32>
    %c1_181 = arith.constant 1 : index
    %c0_182 = arith.constant 0 : index
    %c0_183 = arith.constant 0 : index
    %438 = vector.load %arg19[%c1_181, %c0_182, %c0_183] : memref<2x1x128xf32, #tpu.memory_space<vmem>>, vector<1x1x128xf32>
    %439 = vector.shape_cast %438 : vector<1x1x128xf32> to vector<1x128xf32>
    %cst_184 = arith.constant dense<0.000000e+00> : vector<32xf32>
    %440 = vector.multi_reduction <add>, %435, %cst_184 [1] : vector<32x128xf32> to vector<32xf32>
    %441 = vector.shape_cast %440 : vector<32xf32> to vector<32x1xf32>
    %cst_185 = arith.constant 1.280000e+02 : f32
    %442 = vector.broadcast %cst_185 : f32 to vector<32x1xf32>
    %443 = arith.divf %441, %442 : vector<32x1xf32>
    %444 = vector.broadcast %443 : vector<32x1xf32> to vector<32x128xf32>
    %445 = arith.subf %435, %444 : vector<32x128xf32>
    %446 = arith.mulf %445, %445 : vector<32x128xf32>
    %cst_186 = arith.constant dense<0.000000e+00> : vector<32xf32>
    %447 = vector.multi_reduction <add>, %446, %cst_186 [1] : vector<32x128xf32> to vector<32xf32>
    %448 = vector.shape_cast %447 : vector<32xf32> to vector<32x1xf32>
    %cst_187 = arith.constant 1.280000e+02 : f32
    %449 = vector.broadcast %cst_187 : f32 to vector<32x1xf32>
    %450 = arith.divf %448, %449 : vector<32x1xf32>
    %451 = vector.broadcast %443 : vector<32x1xf32> to vector<32x128xf32>
    %452 = arith.subf %435, %451 : vector<32x128xf32>
    %cst_188 = arith.constant 9.99999997E-7 : f32
    %453 = vector.broadcast %cst_188 : f32 to vector<32x1xf32>
    %454 = arith.addf %450, %453 : vector<32x1xf32>
    %455 = math.rsqrt %454 : vector<32x1xf32>
    %456 = vector.broadcast %455 : vector<32x1xf32> to vector<32x128xf32>
    %457 = arith.mulf %452, %456 : vector<32x128xf32>
    %458 = vector.broadcast %437 : vector<1x128xf32> to vector<32x128xf32>
    %459 = arith.mulf %457, %458 : vector<32x128xf32>
    %460 = vector.broadcast %439 : vector<1x128xf32> to vector<32x128xf32>
    %461 = arith.addf %459, %460 : vector<32x128xf32>
    %462 = arith.truncf %461 : vector<32x128xf32> to vector<32x128xbf16>
    %c1_189 = arith.constant 1 : index
    %c0_190 = arith.constant 0 : index
    %c0_191 = arith.constant 0 : index
    %463 = vector.load %arg20[%c1_189, %c0_190, %c0_191] : memref<2x128x512xbf16, #tpu.memory_space<vmem>>, vector<1x128x512xbf16>
    %464 = vector.shape_cast %463 : vector<1x128x512xbf16> to vector<128x512xbf16>
    %cst_192 = arith.constant dense<0.000000e+00> : vector<32x512xf32>
    %465 = tpu.matmul %462, %464, %cst_192 {dimension_numbers = #tpu.dot_dimension_numbers<[1], [0], [0], [1], [0, 0, 1, 1], [], []>} : vector<32x128xbf16>, vector<128x512xbf16>, vector<32x512xf32> -> vector<32x512xf32>
    %c1_193 = arith.constant 1 : index
    %c0_194 = arith.constant 0 : index
    %c0_195 = arith.constant 0 : index
    %466 = vector.load %arg21[%c1_193, %c0_194, %c0_195] : memref<2x1x512xf32, #tpu.memory_space<vmem>>, vector<1x1x512xf32>
    %467 = vector.shape_cast %466 : vector<1x1x512xf32> to vector<1x512xf32>
    %468 = vector.broadcast %467 : vector<1x512xf32> to vector<32x512xf32>
    %469 = arith.addf %465, %468 : vector<32x512xf32>
    %470 = arith.mulf %469, %469 : vector<32x512xf32>
    %471 = arith.mulf %469, %470 : vector<32x512xf32>
    %cst_196 = arith.constant 4.471500e-02 : f32
    %472 = vector.broadcast %cst_196 : f32 to vector<32x512xf32>
    %473 = arith.mulf %472, %471 : vector<32x512xf32>
    %474 = arith.addf %469, %473 : vector<32x512xf32>
    %cst_197 = arith.constant 0.797884583 : f32
    %475 = vector.broadcast %cst_197 : f32 to vector<32x512xf32>
    %476 = arith.mulf %475, %474 : vector<32x512xf32>
    %477 = math.tanh %476 : vector<32x512xf32>
    %cst_198 = arith.constant 1.000000e+00 : f32
    %478 = vector.broadcast %cst_198 : f32 to vector<32x512xf32>
    %479 = arith.addf %478, %477 : vector<32x512xf32>
    %cst_199 = arith.constant 5.000000e-01 : f32
    %480 = vector.broadcast %cst_199 : f32 to vector<32x512xf32>
    %481 = arith.mulf %480, %479 : vector<32x512xf32>
    %482 = arith.mulf %469, %481 : vector<32x512xf32>
    %483 = arith.truncf %482 : vector<32x512xf32> to vector<32x512xbf16>
    %c1_200 = arith.constant 1 : index
    %c0_201 = arith.constant 0 : index
    %c0_202 = arith.constant 0 : index
    %484 = vector.load %arg22[%c1_200, %c0_201, %c0_202] : memref<2x512x128xbf16, #tpu.memory_space<vmem>>, vector<1x512x128xbf16>
    %485 = vector.shape_cast %484 : vector<1x512x128xbf16> to vector<512x128xbf16>
    %cst_203 = arith.constant dense<0.000000e+00> : vector<32x128xf32>
    %486 = tpu.matmul %483, %485, %cst_203 {dimension_numbers = #tpu.dot_dimension_numbers<[1], [0], [0], [1], [0, 0, 1, 1], [], []>} : vector<32x512xbf16>, vector<512x128xbf16>, vector<32x128xf32> -> vector<32x128xf32>
    %487 = arith.addf %435, %486 : vector<32x128xf32>
    %c1_204 = arith.constant 1 : index
    %c0_205 = arith.constant 0 : index
    %c0_206 = arith.constant 0 : index
    %488 = vector.load %arg23[%c1_204, %c0_205, %c0_206] : memref<2x1x128xf32, #tpu.memory_space<vmem>>, vector<1x1x128xf32>
    %489 = vector.shape_cast %488 : vector<1x1x128xf32> to vector<1x128xf32>
    %490 = vector.broadcast %489 : vector<1x128xf32> to vector<32x128xf32>
    %491 = arith.addf %487, %490 : vector<32x128xf32>
    %492 = arith.truncf %491 : vector<32x128xf32> to vector<32x128xbf16>
    %c0_207 = arith.constant 0 : index
    %c0_208 = arith.constant 0 : index
    %493 = vector.load %arg24[%c0_207, %c0_208] : memref<128x256xbf16, #tpu.memory_space<vmem>>, vector<128x256xbf16>
    %cst_209 = arith.constant dense<0.000000e+00> : vector<32x256xf32>
    %494 = tpu.matmul %492, %493, %cst_209 {dimension_numbers = #tpu.dot_dimension_numbers<[1], [0], [0], [1], [0, 0, 1, 1], [], []>} : vector<32x128xbf16>, vector<128x256xbf16>, vector<32x256xf32> -> vector<32x256xf32>
    %c0_210 = arith.constant 0 : index
    %c0_211 = arith.constant 0 : index
    %495 = vector.load %arg25[%c0_210, %c0_211] : memref<1x256xf32, #tpu.memory_space<vmem>>, vector<1x256xf32>
    %496 = vector.broadcast %495 : vector<1x256xf32> to vector<32x256xf32>
    %497 = arith.addf %494, %496 : vector<32x256xf32>
    %c0_212 = arith.constant 0 : index
    %c0_213 = arith.constant 0 : index
    %c0_214 = arith.constant 0 : index
    %498 = vector.load %arg26[%c0_212, %c0_213, %c0_214] : memref<1x32x256xf32, #tpu.memory_space<vmem>>, vector<1x32x256xf32>
    %499 = vector.shape_cast %498 : vector<1x32x256xf32> to vector<32x256xf32>
    %500 = vector.shape_cast %497 : vector<32x256xf32> to vector<1x32x256xf32>
    tpu.vector_store %arg26[%c0_212, %c0_213, %c0_214], %500 {strides = array<i32>} : memref<1x32x256xf32, #tpu.memory_space<vmem>>, vector<1x32x256xf32>,
    return
  }
  func.func @transform_0(%arg0: i32) -> (i32, i32, i32) {
    %c0_i32 = arith.constant 0 : i32
    %c0_i32_0 = arith.constant 0 : i32
    %c0_i32_1 = arith.constant 0 : i32
    return %arg0, %c0_i32, %c0_i32_0 : i32, i32, i32
  }
  func.func @transform_1(%arg0: i32) -> (i32, i32, i32) {
    %c0_i32 = arith.constant 0 : i32
    %c0_i32_0 = arith.constant 0 : i32
    %c0_i32_1 = arith.constant 0 : i32
    return %arg0, %c0_i32, %c0_i32_0 : i32, i32, i32
  }
  func.func @transform_2(%arg0: i32) -> (i32, i32, i32) {
    %c0_i32 = arith.constant 0 : i32
    %c0_i32_0 = arith.constant 0 : i32
    %c0_i32_1 = arith.constant 0 : i32
    %c0_i32_2 = arith.constant 0 : i32
    return %c0_i32, %c0_i32_0, %c0_i32_1 : i32, i32, i32
  }
  func.func @transform_3(%arg0: i32) -> (i32, i32) {
    %c0_i32 = arith.constant 0 : i32
    %c0_i32_0 = arith.constant 0 : i32
    %c0_i32_1 = arith.constant 0 : i32
    return %c0_i32, %c0_i32_0 : i32, i32
  }
  func.func @transform_4(%arg0: i32) -> (i32, i32) {
    %c0_i32 = arith.constant 0 : i32
    %c0_i32_0 = arith.constant 0 : i32
    %c0_i32_1 = arith.constant 0 : i32
    return %c0_i32, %c0_i32_0 : i32, i32
  }
  func.func @transform_5(%arg0: i32) -> (i32, i32) {
    %c0_i32 = arith.constant 0 : i32
    %c0_i32_0 = arith.constant 0 : i32
    %c0_i32_1 = arith.constant 0 : i32
    return %c0_i32, %c0_i32_0 : i32, i32
  }
  func.func @transform_6(%arg0: i32) -> (i32, i32) {
    %c0_i32 = arith.constant 0 : i32
    %c0_i32_0 = arith.constant 0 : i32
    %c0_i32_1 = arith.constant 0 : i32
    return %c0_i32, %c0_i32_0 : i32, i32
  }
  func.func @transform_7(%arg0: i32) -> (i32, i32, i32) {
    %c0_i32 = arith.constant 0 : i32
    %c0_i32_0 = arith.constant 0 : i32
    %c0_i32_1 = arith.constant 0 : i32
    %c0_i32_2 = arith.constant 0 : i32
    return %c0_i32, %c0_i32_0, %c0_i32_1 : i32, i32, i32
  }
  func.func @transform_8(%arg0: i32) -> (i32, i32, i32) {
    %c0_i32 = arith.constant 0 : i32
    %c0_i32_0 = arith.constant 0 : i32
    %c0_i32_1 = arith.constant 0 : i32
    %c0_i32_2 = arith.constant 0 : i32
    return %c0_i32, %c0_i32_0, %c0_i32_1 : i32, i32, i32
  }
  func.func @transform_9(%arg0: i32) -> (i32, i32, i32) {
    %c0_i32 = arith.constant 0 : i32
    %c0_i32_0 = arith.constant 0 : i32
    %c0_i32_1 = arith.constant 0 : i32
    %c0_i32_2 = arith.constant 0 : i32
    return %c0_i32, %c0_i32_0, %c0_i32_1 : i32, i32, i32
  }
  func.func @transform_10(%arg0: i32) -> (i32, i32, i32) {
    %c0_i32 = arith.constant 0 : i32
    %c0_i32_0 = arith.constant 0 : i32
    %c0_i32_1 = arith.constant 0 : i32
    %c0_i32_2 = arith.constant 0 : i32
    return %c0_i32, %c0_i32_0, %c0_i32_1 : i32, i32, i32
  }
  func.func @transform_11(%arg0: i32) -> (i32, i32, i32) {
    %c0_i32 = arith.constant 0 : i32
    %c0_i32_0 = arith.constant 0 : i32
    %c0_i32_1 = arith.constant 0 : i32
    %c0_i32_2 = arith.constant 0 : i32
    return %c0_i32, %c0_i32_0, %c0_i32_1 : i32, i32, i32
  }
  func.func @transform_12(%arg0: i32) -> (i32, i32, i32) {
    %c0_i32 = arith.constant 0 : i32
    %c0_i32_0 = arith.constant 0 : i32
    %c0_i32_1 = arith.constant 0 : i32
    %c0_i32_2 = arith.constant 0 : i32
    return %c0_i32, %c0_i32_0, %c0_i32_1 : i32, i32, i32
  }
  func.func @transform_13(%arg0: i32) -> (i32, i32, i32) {
    %c0_i32 = arith.constant 0 : i32
    %c0_i32_0 = arith.constant 0 : i32
    %c0_i32_1 = arith.constant 0 : i32
    %c0_i32_2 = arith.constant 0 : i32
    return %c0_i32, %c0_i32_0, %c0_i32_1 : i32, i32, i32
  }
  func.func @transform_14(%arg0: i32) -> (i32, i32, i32) {
    %c0_i32 = arith.constant 0 : i32
    %c0_i32_0 = arith.constant 0 : i32
    %c0_i32_1 = arith.constant 0 : i32
    %c0_i32_2 = arith.constant 0 : i32
    return %c0_i32, %c0_i32_0, %c0_i32_1 : i32, i32, i32
  }
  func.func @transform_15(%arg0: i32) -> (i32, i32, i32) {
    %c0_i32 = arith.constant 0 : i32
    %c0_i32_0 = arith.constant 0 : i32
    %c0_i32_1 = arith.constant 0 : i32
    %c0_i32_2 = arith.constant 0 : i32
    return %c0_i32, %c0_i32_0, %c0_i32_1 : i32, i32, i32
  }
  func.func @transform_16(%arg0: i32) -> (i32, i32, i32) {
    %c0_i32 = arith.constant 0 : i32
    %c0_i32_0 = arith.constant 0 : i32
    %c0_i32_1 = arith.constant 0 : i32
    %c0_i32_2 = arith.constant 0 : i32
    return %c0_i32, %c0_i32_0, %c0_i32_1 : i32, i32, i32
  }
  func.func @transform_17(%arg0: i32) -> (i32, i32, i32) {
    %c0_i32 = arith.constant 0 : i32
    %c0_i32_0 = arith.constant 0 : i32
    %c0_i32_1 = arith.constant 0 : i32
    %c0_i32_2 = arith.constant 0 : i32
    return %c0_i32, %c0_i32_0, %c0_i32_1 : i32, i32, i32
  }
  func.func @transform_18(%arg0: i32) -> (i32, i32, i32) {
    %c0_i32 = arith.constant 0 : i32
    %c0_i32_0 = arith.constant 0 : i32
    %c0_i32_1 = arith.constant 0 : i32
    %c0_i32_2 = arith.constant 0 : i32
    return %c0_i32, %c0_i32_0, %c0_i32_1 : i32, i32, i32
  }
  func.func @transform_19(%arg0: i32) -> (i32, i32, i32) {
    %c0_i32 = arith.constant 0 : i32
    %c0_i32_0 = arith.constant 0 : i32
    %c0_i32_1 = arith.constant 0 : i32
    %c0_i32_2 = arith.constant 0 : i32
    return %c0_i32, %c0_i32_0, %c0_i32_1 : i32, i32, i32
  }
  func.func @transform_20(%arg0: i32) -> (i32, i32, i32) {
    %c0_i32 = arith.constant 0 : i32
    %c0_i32_0 = arith.constant 0 : i32
    %c0_i32_1 = arith.constant 0 : i32
    %c0_i32_2 = arith.constant 0 : i32
    return %c0_i32, %c0_i32_0, %c0_i32_1 : i32, i32, i32
  }
  func.func @transform_21(%arg0: i32) -> (i32, i32, i32) {
    %c0_i32 = arith.constant 0 : i32
    %c0_i32_0 = arith.constant 0 : i32
    %c0_i32_1 = arith.constant 0 : i32
    %c0_i32_2 = arith.constant 0 : i32
    return %c0_i32, %c0_i32_0, %c0_i32_1 : i32, i32, i32
  }
  func.func @transform_22(%arg0: i32) -> (i32, i32, i32) {
    %c0_i32 = arith.constant 0 : i32
    %c0_i32_0 = arith.constant 0 : i32
    %c0_i32_1 = arith.constant 0 : i32
    %c0_i32_2 = arith.constant 0 : i32
    return %c0_i32, %c0_i32_0, %c0_i32_1 : i32, i32, i32
  }
  func.func @transform_23(%arg0: i32) -> (i32, i32) {
    %c0_i32 = arith.constant 0 : i32
    %c0_i32_0 = arith.constant 0 : i32
    %c0_i32_1 = arith.constant 0 : i32
    return %c0_i32, %c0_i32_0 : i32, i32
  }
  func.func @transform_24(%arg0: i32) -> (i32, i32) {
    %c0_i32 = arith.constant 0 : i32
    %c0_i32_0 = arith.constant 0 : i32
    %c0_i32_1 = arith.constant 0 : i32
    return %c0_i32, %c0_i32_0 : i32, i32
  }
  func.func @transform_25(%arg0: i32) -> (i32, i32, i32) {
    %c0_i32 = arith.constant 0 : i32
    %c0_i32_0 = arith.constant 0 : i32
    %c0_i32_1 = arith.constant 0 : i32
    return %arg0, %c0_i32, %c0_i32_0 : i32, i32, i32
  }
}

</mosaic_0001>

<bundles_post_ra>
// kernel: var_forward.1
= control target key start
LH: loop header
LB: loop body
LE: loop exit
PB: predicated region body
PF: predicated region fallthrough
CT: control target
= control target key end

     0   :  { %s7771_s29 = smov 0   ;;  %s9381_s0 = inlined_call_operand.vmem [shape: f32[2,32,32], index: 0, kind: input, shape index: {}]   ;;  %s9382_s1 = inlined_call_operand.vmem [shape: f32[2,32,32], index: 1, kind: input, shape index: {}]   ;;  %s9383_s2 = inlined_call_operand.vmem [shape: f32[1,32,128], index: 2, kind: input, shape index: {}]   ;;  %s9384_s3 = inlined_call_operand.vmem [shape: bf16[32,128], index: 3, kind: input, shape index: {}]   ;;  %s9385_s4 = inlined_call_operand.vmem [shape: f32[1,128], index: 4, kind: input, shape index: {}]   ;;  %s9386_s5 = inlined_call_operand.vmem [shape: bf16[32,128], index: 5, kind: input, shape index: {}]   ;;  %s9387_s6 = inlined_call_operand.vmem [shape: f32[1,128], index: 6, kind: input, shape index: {}]   ;;  %s9388_s7 = inlined_call_operand.vmem [shape: f32[2,1,128], index: 7, kind: input, shape index: {}]   ;;  %s9389_s8 = inlined_call_operand.vmem [shape: f32[2,1,128], index: 8, kind: input, shape index: {}]   ;;  %s9390_s9 = inlined_call_operand.vmem [shape: bf16[2,128,128], index: 9, kind: input, shape index: {}]   ;;  %s9391_s10 = inlined_call_operand.vmem [shape: f32[2,1,128], index: 10, kind: input, shape index: {}]   ;;  %s9392_s11 = inlined_call_operand.vmem [shape: bf16[2,128,128], index: 11, kind: input, shape index: {}]   ;;  %s9393_s12 = inlined_call_operand.vmem [shape: f32[2,1,128], index: 12, kind: input, shape index: {}]   ;;  %s9394_s13 = inlined_call_operand.vmem [shape: bf16[2,128,128], index: 13, kind: input, shape index: {}]   ;;  %s9395_s14 = inlined_call_operand.vmem [shape: f32[2,1,128], index: 14, kind: input, shape index: {}]   ;;  %s9396_s15 = inlined_call_operand.vmem [shape: bf16[2,128,128], index: 15, kind: input, shape index: {}]   ;;  %s9397_s16 = inlined_call_operand.vmem [shape: f32[2,1,128], index: 16, kind: input, shape index: {}]   ;;  %s9398_s17 = inlined_call_operand.vmem [shape: f32[2,1,128], index: 17, kind: input, shape index: {}]   ;;  %s9399_s18 = inlined_call_operand.vmem [shape: f32[2,1,128], index: 18, kind: input, shape index: {}]   ;;  %s9400_s19 = inlined_call_operand.vmem [shape: bf16[2,128,512], index: 19, kind: input, shape index: {}]   ;;  %s9401_s20 = inlined_call_operand.vmem [shape: f32[2,1,512], index: 20, kind: input, shape index: {}]   ;;  %s9402_s21 = inlined_call_operand.vmem [shape: bf16[2,512,128], index: 21, kind: input, shape index: {}]   ;;  %s9403_s22 = inlined_call_operand.vmem [shape: f32[2,1,128], index: 22, kind: input, shape index: {}]   ;;  %s9404_s23 = inlined_call_operand.vmem [shape: bf16[128,256], index: 23, kind: input, shape index: {}]   ;;  %s9405_s24 = inlined_call_operand.vmem [shape: f32[1,256], index: 24, kind: input, shape index: {}]   ;;  %s9406_s25 = inlined_call_operand.vmem [shape: f32[2,32,256], index: 25, kind: output, shape index: {}]  }
   0x1   :  { %9423 = sst [smem:[#allocation3_spill]] %s9381_s0 }
   0x2   :  { %9424 = sst [smem:[#allocation4_spill]] %s9382_s1 }
   0x3   :  { %9425 = sst [smem:[#allocation5_spill]] %s9383_s2 }
   0x4   :  { %9426 = sst [smem:[#allocation6_spill]] %s9384_s3 }
   0x5   :  { %9427 = sst [smem:[#allocation7_spill]] %s9385_s4 }
   0x6   :  { %9428 = sst [smem:[#allocation8_spill]] %s9386_s5 }
   0x7   :  { %9429 = sst [smem:[#allocation9_spill]] %s9387_s6 }
   0x8   :  { %9430 = sst [smem:[#allocation10_spill]] %s9388_s7 }
   0x9   :  { %9431 = sst [smem:[#allocation11_spill]] %s9389_s8 }
   0xa   :  { %9432 = sst [smem:[#allocation12_spill]] %s9390_s9 }
   0xb LB: > { %9433 = sst [smem:[#allocation2_spill]] %s7634_s29  ;;  %s6046_s2 = sadd.s32 4294967295, %s7634_s29   ;;  %s7634_s29 = sphi %s7771_s29, %s35_s29  }
   0xc   : > { %p6050_p0 = scmp.ge.s32.totalorder %s7634_s29, 1  ;;  %p697_p1 = scmp.lt.s32.totalorder %s7634_s29, 3 }
   0xe   : > { %p698_p2 = pnand %p6050_p0, %p697_p1 }
   0xf   : > { %s9434_s7 = sld [smem:[#allocation6_spill]] (!%p698_p2)  ;;  %p770_p3 = scmp.lt.s32.totalorder (!%p698_p2), %s6046_s2, 1 }
  0x10   : > { %701 = sbr.rel (%p698_p2) target bundleno = 7630 (0x1dce), region = 120  ;;  %s9435_s4 = sld [smem:[#allocation3_spill]] (!%p698_p2) }
  0x11   : > { %s9440_s0 = sld [smem:[#allocation8_spill]] (!%p698_p2)  ;;  %s9416_s26 = smov (!%p698_p2), 64  }
  0x12   : > { %s9441_s8 = sld [smem:[#allocation4_spill]] (!%p698_p2)  ;;  %s9450_s29 = smov (!%p698_p2), 96  }
  0x13   : > { %s9442_s9 = sld [smem:[#allocation7_spill]] (!%p698_p2)  ;;  %s9451_s5 = smov (!%p698_p2), 64  }
  0x14   : > { %s9443_s6 = sld [smem:[#allocation5_spill]] (!%p698_p2)  ;;  %s9452_s3 = smov (!%p698_p2), 32  }
  0x15   : > { %v7152_v0 = vld [vmem:[%s9434_s7 + $0x8] sm:$0xff]   ;;  %v7153_v1 = vld [vmem:[%s9434_s7] sm:$0xff]   ;;  %s9455_s2 = smov (!%p770_p3, %s6046_s2), 1  ;;  %vm881_vm0 = vcmask 261120   ;;  %v786_v8 = vlaneseq  ;;  %v7636_v11 = vmov 0   ;;  %v7637_v40 = vmov 0.0  }
  0x16   : > { %6795 = vmatprep.subr.bf16.mxu0 %v7152_v0  ;;  %s6516_s1 = sshll.u32 %s9455_s2, 5  ;;  %v7156_v57 = vld [vmem:[%s9392_s11 + $0x38] sm:$0xff]   ;;  %v7157_v58 = vld [vmem:[%s9392_s11 + $0x30] sm:$0xff]   ;;  %v7158_v59 = vld [vmem:[%s9392_s11 + $0x28] sm:$0xff]   ;;  %s9446_s30 = sld [smem:[#allocation10_spill]] }
  0x17   : > { %6796 = vmatpush3.bf16.msra.mxu0 %v7152_v0  ;;  %s774_s28 = scalar_lea.vmem %s9435_s4, %s6516_s1  ;;  %v7795_v9 = vshrl.u32 %v786_v8, 7  ;;  %v792_v10 = vand.u32 127, %v786_v8  ;;  %v7154_v27 = vld [vmem:[%s9440_s0 + $0x8] sm:$0xff]   ;;  %v7155_v28 = vld [vmem:[%s9440_s0] sm:$0xff]   ;;  %v7160_v61 = vld [vmem:[%s9392_s11 + $0x18] sm:$0xff]  }
  0x18   : > { %6797 = vmatprep.subr.bf16.mxu0 %v7153_v1  ;;  %v852_v2 = vld [vmem:[%s774_s28] sm:$0xff]  ;;  %v853_v3 = vld [vmem:[%s774_s28 + $0x8] sm:$0xff]  ;;  %v854_v4 = vld [vmem:[%s774_s28 + $0x10] sm:$0xff]  ;;  %s779_s27 = scalar_lea.vmem %s9441_s8, %s6516_s1  ;;  %6803 = vmatprep.subr.bf16.mxu1 %v7154_v27  ;;  %s9447_s8 = sld [smem:[#allocation11_spill]] }
  0x19   : > { %v856_v5 = vpack.c.bf16 %v853_v3, %v852_v2  ;;  %v855_v6 = vld [vmem:[%s774_s28 + $0x18] sm:$0xff]  ;;  %vm793_vm1 = vcmp.ge.s32.totalorder %v7795_v9, 1  ;;  %vm803_vm2 = vcmp.ge.s32.totalorder %v7795_v9, 5  ;;  %v790_v14 = vadd.s32 24, %v7795_v9  ;;  %v965_v29 = vld [vmem:[%s779_s27] sm:$0xff]  ;;  %v966_v30 = vld [vmem:[%s779_s27 + $0x8] sm:$0xff]  ;;  %6804 = vmatpush3.bf16.msra.mxu1 %v7154_v27 }
  0x1a   : > { %v857_v7 = vpack.c.bf16 %v855_v6, %v854_v4  ;;  %v797_v12 = vsel %vm793_vm1, 1, %v7636_v11  ;;  %v807_v13 = vsel %vm803_vm2, 1, %v7636_v11  ;;  %vm801_vm3 = vcmp.ge.s32.totalorder %v792_v10, 1  ;;  %v967_v31 = vld [vmem:[%s779_s27 + $0x10] sm:$0xff]  ;;  %v968_v33 = vld [vmem:[%s779_s27 + $0x18] sm:$0xff]  ;;  %6805 = vmatprep.subr.bf16.mxu1 %v7155_v28  ;;  %v957_v46 = vld [vmem:[%s9443_s6] sm:$0xff] }
  0x1b   : > { %6798 = vmatpush3.bf16.msra.mxu0 %v7153_v1  ;;  %6799 = vmatprep.mubr.msk.bf16.mxu0 %vm881_vm0, %v856_v5  ;;  %vm815_vm4 = vcmp.ge.s32.totalorder %v792_v10, 5  ;;  %vm830_vm5 = vcmp.ge.s32.totalorder %v792_v10, 14  ;;  %v802_v15 = vsel %vm801_vm3, 1, %v7636_v11  ;;  %vm845_vm6 = vcmp.ge.s32.totalorder %v792_v10, 30  ;;  %v6058_v35 = vld [vmem:[%s9442_s9] ss:$0 sm:$0xff] }
  0x1c   : > { %v816_v16 = vsel %vm815_vm4, 1, %v7636_v11  ;;  %v831_v17 = vsel %vm830_vm5, 1, %v7636_v11  ;;  %vm836_vm7 = vcmp.ge.s32.totalorder %v790_v14, 30  ;;  %v846_v19 = vsel %vm845_vm6, 1, %v7636_v11  ;;  %v959_v37 = vld [vmem:[%s9443_s6 + $0x10] sm:$0xff]  ;;  %v960_v50 = vld [vmem:[%s9443_s6 + $0x18] sm:$0xff] }
  0x1d   : > { %v817_v18 = vadd.s32 %v816_v16, %v802_v15  ;;  %v840_v20 = vsel %vm836_vm7, 1, %v7636_v11  ;;  %v811_v21 = vadd.s32 %v807_v13, %v797_v12  ;;  %v969_v32 = vpack.c.bf16 %v966_v30, %v965_v29  ;;  %6806 = vmatpush3.bf16.msra.mxu1 %v7155_v28  ;;  %v958_v54 = vld [vmem:[%s9443_s6 + $0x8] sm:$0xff]  ;;  %v7159_v60 = vld [vmem:[%s9392_s11 + $0x20] sm:$0xff]   ;;  %v7161_v62 = vld [vmem:[%s9392_s11 + $0x10] sm:$0xff]   ;;  %s9444_s27 = sld [smem:[#allocation9_spill]]  ;;  %s9418_s28 = smov 96  }
  0x1e   : > { %6800 = vmatmul.mubr.msk.bf16.vlgmr.msra.gmra.mxu0 %vm881_vm0, %v857_v7  ;;  %v844_v23 = vadd.s32 3, %v840_v20  ;;  %v970_v34 = vpack.c.bf16 %v968_v33, %v967_v31  ;;  %vm940_vm10 = vcmp.lt.s32.totalorder %v790_v14, 30  ;;  %v6063_v41 = vsel %vm793_vm1, 1.0, %v7637_v40  ;;  %6831 = vmatprep.subr.bf16.mxu1 %v7156_v57  ;;  %v7162_v63 = vld [vmem:[%s9392_s11 + $0x8] sm:$0xff]   ;;  %v7163_v0 = vld [vmem:[%s9392_s11] sm:$0xff]   ;;  %s9445_s9 = sld [smem:[#allocation12_spill]] }
  0x1f   : > { %v832_v22 = vadd.s32 %v831_v17, %v817_v18  ;;  %6807 = vmatprep.mubr.msk.bf16.mxu1 %vm881_vm0, %v969_v32  ;;  %v6064_v45 = vsel %vm940_vm10, 1.0, %v7637_v40  ;;  %s6518_s1 = sshll.u32 %s9455_s2, 6 }
  0x20   : > { %6808 = vmatmul.mubr.msk.bf16.vlgmr.msra.gmra.mxu1 %vm881_vm0, %v970_v34  ;;  %s784_s7 = scalar_lea.vmem %s9406_s25, %s6518_s1 }
  0x21   : > { %v7809_v24 = vadd.s32 %v846_v19, %v832_v22  ;;  %6832 = vmatpush3.bf16.msra.mxu1 %v7156_v57 }
  0x22   : > { %6833 = vmatprep.subr.bf16.mxu1 %v7157_v58 }
  0x23   : > { %vm7812_vm8 = vcmp.ge.s32.totalorder %v811_v21, %v7809_v24  ;;  %vm7817_vm9 = vcmp.ge.s32.totalorder %v844_v23, %v7809_v24  ;;  %v6065_v2 = vld [vmem:[%s9444_s27] ss:$0 sm:$0xff]  ;;  %vm6057_vm12 = vcmp.le.s32.totalorder %v7809_v24, 3  ;;  %s9414_s27 = smov 32  }
  0x24   : > { %v7164_v33 = vld [vmem:[%s9445_s9 + $0x38] sm:$0xff]   ;;  %v7165_v34 = vld [vmem:[%s9445_s9 + $0x30] sm:$0xff]   ;;  %v7171_v40 = vld [vmem:[%s9445_s9] sm:$0xff]  }
  0x25   : > { %6834 = vmatpush3.bf16.msra.mxu1 %v7157_v58  ;;  %6811 = vmatprep.subr.bf16.mxu0 %v7164_v33 }
  0x26   : > { %6835 = vmatprep.subr.bf16.mxu1 %v7158_v59  ;;  %6812 = vmatpush3.bf16.msra.mxu0 %v7164_v33 }
  0x27   : > { %6813 = vmatprep.subr.bf16.mxu0 %v7165_v34 }
  0x29   : > { %6836 = vmatpush3.bf16.msra.mxu1 %v7158_v59 }
  0x2a   : > { %6837 = vmatprep.subr.bf16.mxu1 %v7159_v60  ;;  %6814 = vmatpush3.bf16.msra.mxu0 %v7165_v34 }
  0x2d   : > { %6838 = vmatpush3.bf16.msra.mxu1 %v7159_v60 }
  0x2e   : > { %6839 = vmatprep.subr.bf16.mxu1 %v7160_v61 }
  0x31   : > { %6840 = vmatpush3.bf16.msra.mxu1 %v7160_v61 }
  0x32   : > { %6841 = vmatprep.subr.bf16.mxu1 %v7161_v62 }
  0x35   : > { %6842 = vmatpush3.bf16.msra.mxu1 %v7161_v62 }
  0x36   : > { %6843 = vmatprep.subr.bf16.mxu1 %v7162_v63 }
  0x39   : > { %6844 = vmatpush3.bf16.msra.mxu1 %v7162_v63 }
  0x3a   : > { %6845 = vmatprep.subr.bf16.mxu1 %v7163_v0 }
  0x3d   : > { %6846 = vmatpush3.bf16.msra.mxu1 %v7163_v0 }
  0xde   : > { %v6801_v36 = vpop.f32.mrf.mxu0 }
  0xdf   : > { %v931_v38 = vadd.f32 %v6801_v36, %v6058_v35  ;;  %v7167_v36 = vld [vmem:[%s9445_s9 + $0x20] sm:$0xff]  }
  0xe0   : > { %v922_v39 = vpop.f32.mrf.mxu0  ;;  %v6809_v1 = vpop.f32.mrf.mxu1 }
  0xe1   : > { %v7842_v42 = vadd.f32 %v959_v37, %v931_v38  ;;  %v923_v43 = vadd.f32 %v6058_v35, %v922_v39  ;;  %v1043_v4 = vadd.f32 %v6809_v1, %v6065_v2  ;;  %v7168_v37 = vld [vmem:[%s9445_s9 + $0x18] sm:$0xff]   ;;  %v7169_v38 = vld [vmem:[%s9445_s9 + $0x10] sm:$0xff]   ;;  %v7170_v39 = vld [vmem:[%s9445_s9 + $0x8] sm:$0xff]  }
  0xe2   : > { %v6802_v44 = vpop.f32.mrf.mxu0  ;;  %v1034_v3 = vpop.f32.mrf.mxu1 }
  0xe3   : > { %v953_v47 = vmul.f32 %v6063_v41, %v923_v43  ;;  %v934_v48 = vadd.f32 %v6802_v44, %v6058_v35  ;;  %1057 = vadd.xlane.f32.xlu1 %v7842_v42  ;;  %v1035_v6 = vadd.f32 %v6065_v2, %v1034_v3  ;;  %v7172_v41 = vld [vmem:[%s9394_s13 + $0x38] sm:$0xff]  }
  0xe4   : > { %v925_v49 = vpop.f32.mrf.mxu0  ;;  %v6810_v5 = vpop.f32.mrf.mxu1 }
  0xe5   : > { %v956_v51 = vmul.f32 %v6064_v45, %v934_v48  ;;  %v926_v52 = vadd.f32 %v6058_v35, %v925_v49  ;;  %v7851_v53 = vadd.f32 %v957_v46, %v953_v47  ;;  %v1046_v7 = vadd.f32 %v6810_v5, %v6065_v2  ;;  %v7166_v35 = vld [vmem:[%s9445_s9 + $0x28] sm:$0xff]   ;;  %v6081_v46 = vld [vmem:[%s9393_s12] ss:$0 sm:$0xff] }
  0xe6   : > { %v1037_v8 = vpop.f32.mrf.mxu1  ;;  %6815 = vmatprep.subr.bf16.mxu0 %v7166_v35 }
  0xe7   : > { %1053 = vadd.xlane.f32.xlu0 %v7851_v53  ;;  %v7857_v55 = vadd.f32 %v960_v50, %v956_v51  ;;  %v7859_v56 = vadd.f32 %v958_v54, %v926_v52  ;;  %v1038_v10 = vadd.f32 %v6065_v2, %v1037_v8  ;;  %v7890_v12 = vpack.c.bf16 %v1046_v7, %v1043_v4 }
  0xe8   : > { %6816 = vmatpush3.bf16.msra.mxu0 %v7166_v35 }
  0xe9   : > { %1059 = vadd.xlane.f32.xlu1 %v7857_v55  ;;  %v7892_v13 = vpack.c.bf16 %v1038_v10, %v1035_v6  ;;  %6817 = vmatprep.subr.bf16.mxu0 %v7167_v36  ;;  %v6070_v10 = vld [vmem:[%s9446_s30] ss:$0 sm:$0xff] }
  0xeb   : > { %1055 = vadd.xlane.f32.xlu0 %v7859_v56  ;;  %6847 = vmatprep.mubr.bf16.mxu1 %v7892_v13 }
  0xec   : > { %6848 = vmatmul.mubr.bf16.vlgmr.msra.gmra.mxu1 %v7890_v12  ;;  %6818 = vmatpush3.bf16.msra.mxu0 %v7167_v36  ;;  %v7173_v36 = vld [vmem:[%s9394_s13 + $0x30] sm:$0xff]  }
  0xed   : > { %6819 = vmatprep.subr.bf16.mxu0 %v7168_v37 }
  0xf0   : > { %6820 = vmatpush3.bf16.msra.mxu0 %v7168_v37  ;;  %v7176_v37 = vld [vmem:[%s9394_s13 + $0x18] sm:$0xff]  }
  0xf1   : > { %6821 = vmatprep.subr.bf16.mxu0 %v7169_v38 }
  0xf4   : > { %6822 = vmatpush3.bf16.msra.mxu0 %v7169_v38  ;;  %v7177_v38 = vld [vmem:[%s9394_s13 + $0x10] sm:$0xff]  }
  0xf5   : > { %6823 = vmatprep.subr.bf16.mxu0 %v7170_v39 }
  0xf8   : > { %6824 = vmatpush3.bf16.msra.mxu0 %v7170_v39  ;;  %v7178_v39 = vld [vmem:[%s9394_s13 + $0x8] sm:$0xff]  }
  0xf9   : > { %6825 = vmatprep.subr.bf16.mxu0 %v7171_v40 }
  0xfc   : > { %6826 = vmatpush3.bf16.msra.mxu0 %v7171_v40  ;;  %v7179_v40 = vld [vmem:[%s9394_s13] sm:$0xff]  }
  0xfd   : > { %6851 = vmatprep.subr.bf16.mxu0 %v7172_v41 }
 0x16c   : > { %v1058_v14 = vpop.xlane.xlu1 %1057 }
 0x16d   : > { %v1064_v16 = vmul.f32 0.0078125, %v1058_v14 }
 0x16f   : > { %v7902_v27 = vsub.f32 %v7842_v42, %v1064_v16 }
 0x170   : > { %v1054_v15 = vpop.xlane.xlu0 %1053 }
 0x171   : > { %v1062_v17 = vmul.f32 0.0078125, %v1054_v15  ;;  %v1072_v29 = vmul.f32 %v7902_v27, %v7902_v27 }
 0x172   : > { %v1060_v18 = vpop.xlane.xlu1 %1059 }
 0x173   : > { %v7897_v19 = vsub.f32 %v7851_v53, %v1062_v17  ;;  %v1065_v21 = vmul.f32 0.0078125, %v1060_v18  ;;  %v6071_v18 = vld [vmem:[%s9447_s8] ss:$0 sm:$0xff] }
 0x174   : > { %v1056_v20 = vpop.xlane.xlu0 %1055 }
 0x175   : > { %v1063_v22 = vmul.f32 0.0078125, %v1056_v20  ;;  %v1070_v23 = vmul.f32 %v7897_v19, %v7897_v19  ;;  %v7912_v31 = vsub.f32 %v7857_v55, %v1065_v21 }
 0x177   : > { %1074 = vadd.xlane.f32.xlu0 %v1070_v23  ;;  %v7905_v28 = vsub.f32 %v7859_v56, %v1063_v22  ;;  %v1073_v32 = vmul.f32 %v7912_v31, %v7912_v31 }
 0x179   : > { %v1071_v30 = vmul.f32 %v7905_v28, %v7905_v28 }
 0x17b   : > { %1078 = vadd.xlane.f32.xlu0 %v1072_v29  ;;  %1076 = vadd.xlane.f32.xlu1 %v1071_v30 }
 0x17f   : > { %1080 = vadd.xlane.f32.xlu1 %v1073_v32 }
 0x1ac   : > { %v6849_v45 = vpop.f32.mrf.mxu1 }
 0x1ad   : > { %v1354_v51 = vadd.f32 %v6849_v45, %v6081_v46  ;;  %v6072_v45 = vld [vmem:[%s9391_s10] ss:$0 sm:$0xff] }
 0x1ae   : > { %v1345_v48 = vpop.f32.mrf.mxu1 }
 0x1af   : > { %v1346_v58 = vadd.f32 %v6081_v46, %v1345_v48 }
 0x1b0   : > { %v6850_v57 = vpop.f32.mrf.mxu1 }
 0x1b1   : > { %v1357_v59 = vadd.f32 %v6850_v57, %v6081_v46  ;;  %v6090_v57 = vld [vmem:[%s9395_s14] ss:$0 sm:$0xff] }
 0x1b2   : > { %v1348_v62 = vpop.f32.mrf.mxu1 }
 0x1b3   : > { %v7946_v0 = vpack.c.bf16 %v1357_v59, %v1354_v51  ;;  %v1349_v1 = vadd.f32 %v6081_v46, %v1348_v62 }
 0x1b5   : > { %7123 = vmatprep.subr.msk.bf16.mxu1 %vm881_vm0, %v7946_v0  ;;  %v1512_v3 = vsel %vm881_vm0, %v7946_v0, 0  ;;  %v7952_v4 = vpack.c.bf16 %v1349_v1, %v1346_v58 }
 0x1b6   : > { %6872 = vmatpush3.bf16.xpose.msra.mxu1 %v1512_v3 }
 0x1b7   : > { %7124 = vmatprep.subr.msk.bf16.mxu1 %vm881_vm0, %v7952_v4  ;;  %v1509_v6 = vsel %vm881_vm0, %v7952_v4, 0 }
 0x1be   : > { %6874 = vmatpush3.bf16.xpose.msra.mxu1 %v1509_v6 }
 0x200   : > { %v1075_v43 = vpop.xlane.xlu0 %1074 }
 0x201   : > { %v1082_v44 = vmul.f32 0.0078125, %v1075_v43 }
 0x203   : > { %v1086_v47 = vadd.f32 1e-06, %v1082_v44 }
 0x204   : > { %v1077_v49 = vpop.xlane.xlu1 %1076  ;;  %v1079_v50 = vpop.xlane.xlu0 %1078 }
 0x205   : > { %7404 = vrsqrt.f32 %v1086_v47  ;;  %v1083_v52 = vmul.f32 0.0078125, %v1077_v49  ;;  %v1084_v54 = vmul.f32 0.0078125, %v1079_v50 }
 0x207   : > { %v1087_v60 = vadd.f32 1e-06, %v1083_v52  ;;  %v1088_v61 = vadd.f32 1e-06, %v1084_v54 }
 0x208   : > { %v1081_v63 = vpop.xlane.xlu1 %1080 }
 0x209   : > { %7406 = vrsqrt.f32 %v1087_v60  ;;  %v1085_v2 = vmul.f32 0.0078125, %v1081_v63 }
 0x20a   : > { %7408 = vrsqrt.f32 %v1088_v61 }
 0x20b   : > { %v1089_v5 = vadd.f32 1e-06, %v1085_v2 }
 0x20d   : > { %7410 = vrsqrt.f32 %v1089_v5  ;;  %v788_v5 = vadd.s32 8, %v7795_v9 }
 0x20f   : > { %vm819_vm11 = vcmp.ge.s32.totalorder %v788_v5, 14 }
 0x210   : > { %v823_v6 = vsel %vm819_vm11, 1, %v7636_v11 }
 0x212   : > { %v7405_v7 = vpop.eup %7404 }
 0x213   : > { %v1094_v8 = vmul.f32 %v7405_v7, %v7897_v19 }
 0x215   : > { %v1104_v17 = vmul.f32 %v6070_v10, %v1094_v8  ;;  %v827_v8 = vadd.s32 2, %v823_v6 }
 0x216   : > { %v7407_v14 = vpop.eup %7406 }
 0x217   : > { %v7409_v15 = vpop.eup %7408  ;;  %v1095_v16 = vmul.f32 %v7407_v14, %v7905_v28  ;;  %v1114_v23 = vadd.f32 %v6071_v18, %v1104_v17  ;;  %vm8020_vm13 = vcmp.ge.s32.totalorder %v827_v8, %v7809_v24 }
 0x218   : > { %v1096_v20 = vmul.f32 %v7409_v15, %v7902_v27  ;;  %v7174_v27 = vld [vmem:[%s9394_s13 + $0x28] sm:$0xff]  }
 0x219   : > { %v1105_v21 = vmul.f32 %v6070_v10, %v1095_v16 }
 0x21a   : > { %v7411_v22 = vpop.eup %7410  ;;  %v1106_v30 = vmul.f32 %v6070_v10, %v1096_v20 }
 0x21b   : > { %v1115_v19 = vadd.f32 %v6071_v18, %v1105_v21  ;;  %v1097_v29 = vmul.f32 %v7411_v22, %v7912_v31  ;;  %v7175_v31 = vld [vmem:[%s9394_s13 + $0x20] sm:$0xff]  }
 0x21c   : > { %v1116_v34 = vadd.f32 %v6071_v18, %v1106_v30 }
 0x21d   : > { %v1118_v32 = vpack.c.bf16 %v1115_v19, %v1114_v23  ;;  %v1107_v33 = vmul.f32 %v6070_v10, %v1097_v29 }
 0x21f   : > { %6827 = vmatprep.mubr.bf16.mxu0 %v1118_v32  ;;  %v1117_v35 = vadd.f32 %v6071_v18, %v1107_v33 }
 0x221   : > { %v1119_v28 = vpack.c.bf16 %v1117_v35, %v1116_v34 }
 0x223   : > { %6828 = vmatmul.mubr.bf16.vlgmr.msra.gmra.mxu0 %v1119_v28 }
 0x224   : > { %6852 = vmatpush3.bf16.msra.mxu0 %v7172_v41  ;;  %6867 = vmatprep.mubr.bf16.mxu0 %v7892_v13 }
 0x225   : > { %6853 = vmatprep.subr.bf16.mxu0 %v7173_v36 }
 0x228   : > { %6854 = vmatpush3.bf16.msra.mxu0 %v7173_v36 }
 0x229   : > { %6855 = vmatprep.subr.bf16.mxu0 %v7174_v27 }
 0x22c   : > { %6856 = vmatpush3.bf16.msra.mxu0 %v7174_v27 }
 0x22d   : > { %6857 = vmatprep.subr.bf16.mxu0 %v7175_v31 }
 0x230   : > { %6858 = vmatpush3.bf16.msra.mxu0 %v7175_v31 }
 0x231   : > { %6859 = vmatprep.subr.bf16.mxu0 %v7176_v37 }
 0x234   : > { %6860 = vmatpush3.bf16.msra.mxu0 %v7176_v37 }
 0x235   : > { %6861 = vmatprep.subr.bf16.mxu0 %v7177_v38 }
 0x238   : > { %6862 = vmatpush3.bf16.msra.mxu0 %v7177_v38 }
 0x239   : > { %6863 = vmatprep.subr.bf16.mxu0 %v7178_v39 }
 0x23c   : > { %6864 = vmatpush3.bf16.msra.mxu0 %v7178_v39 }
 0x23d   : > { %6865 = vmatprep.subr.bf16.mxu0 %v7179_v40 }
 0x240   : > { %6866 = vmatpush3.bf16.msra.mxu0 %v7179_v40 }
 0x243   : > { %6868 = vmatmul.mubr.bf16.vlgmr.msra.gmra.mxu0 %v7890_v12 }
 0x2e3   : > { %v6829_v41 = vpop.f32.mrf.mxu0 }
 0x2e4   : > { %v1234_v50 = vadd.f32 %v6829_v41, %v6072_v45 }
 0x2e5   : > { %v1225_v43 = vpop.f32.mrf.mxu0 }
 0x2e6   : > { %v1226_v48 = vadd.f32 %v6072_v45, %v1225_v43 }
 0x2e7   : > { %v6830_v44 = vpop.f32.mrf.mxu0 }
 0x2e8   : > { %v1237_v46 = vadd.f32 %v6830_v44, %v6072_v45 }
 0x2e9   : > { %v1228_v47 = vpop.f32.mrf.mxu0 }
 0x2ea   : > { %v1229_v49 = vadd.f32 %v6072_v45, %v1228_v47  ;;  %v7996_v52 = vpack.c.bf16 %v1237_v46, %v1234_v50 }
 0x2ec   : > { %v7994_v51 = vpack.c.bf16 %v1229_v49, %v1226_v48 }
 0x2ee   : > { %6875 = vmatprep.mubr.msk.bf16.mxu1 %vm881_vm0, %v7994_v51 }
 0x2ef   : > { %6876 = vmatmul.mubr.msk.bf16.vlgmr.msra.gmra.mxu1 %vm881_vm0, %v7996_v52 }
 0x303   : > { %v6869_v54 = vpop.f32.mrf.mxu0 }
 0x304   : > { %v1474_v60 = vadd.f32 %v6869_v54, %v6090_v57 }
 0x305   : > { %v1465_v58 = vpop.f32.mrf.mxu0 }
 0x306   : > { %v1466_v63 = vadd.f32 %v6090_v57, %v1465_v58 }
 0x307   : > { %v6870_v59 = vpop.f32.mrf.mxu0 }
 0x308   : > { %v1477_v61 = vadd.f32 %v6870_v59, %v6090_v57 }
 0x309   : > { %v1468_v62 = vpop.f32.mrf.mxu0 }
 0x30a   : > { %v8005_v1 = vpack.c.bf16 %v1477_v61, %v1474_v60  ;;  %v1469_v2 = vadd.f32 %v6090_v57, %v1468_v62 }
 0x30c   : > { %v8007_v3 = vpack.c.bf16 %v1469_v2, %v1466_v63  ;;  %6879 = vmatprep.subr.bf16.mxu1 %v8005_v1 }
 0x30d   : > { %6880 = vmatpush3.bf16.msra.mxu1 %v8005_v1 }
 0x30e   : > { %6881 = vmatprep.subr.bf16.mxu1 %v8007_v3 }
 0x311   : > { %6882 = vmatpush3.bf16.msra.mxu1 %v8007_v3 }
 0x3af   : > { %v6877_v7 = vpop.f32.mrf.mxu1 }
 0x3b0   : > { %v1565_v18 = vsel %vm6057_vm12, %v6877_v7, -1e+30 }
 0x3b1   : > { %v1548_v10 = vpop.f32.mrf.mxu1  ;;  %v1573_v22 = vsel %vm881_vm0, %v1565_v18, -inf }
 0x3b2   : > { %v1563_v14 = vsel %vm7812_vm8, %v1548_v10, -1e+30 }
 0x3b3   : > { %v6878_v15 = vpop.f32.mrf.mxu1  ;;  %v1567_v16 = vsel %vm881_vm0, %v1563_v14, -inf }
 0x3b4   : > { %1568 = vmax.xlane.f32.xlu0 %v1567_v16  ;;  %v1566_v19 = vsel %vm7817_vm9, %v6878_v15, -1e+30 }
 0x3b5   : > { %v1551_v20 = vpop.f32.mrf.mxu1  ;;  %v1576_v29 = vsel %vm881_vm0, %v1566_v19, -inf }
 0x3b6   : > { %v1564_v21 = vsel %vm8020_vm13, %v1551_v20, -1e+30  ;;  %v7180_v20 = vld [vmem:[%s9396_s15 + $0x8] sm:$0xff]  }
 0x3b7   : > { %v1570_v23 = vsel %vm881_vm0, %v1564_v21, -inf }
 0x3b8   : > { %1574 = vmax.xlane.f32.xlu0 %v1573_v22  ;;  %1571 = vmax.xlane.f32.xlu1 %v1570_v23 }
 0x3bc   : > { %1577 = vmax.xlane.f32.xlu1 %v1576_v29 }
 0x43d   : > { %v1569_v30 = vpop.xlane.xlu0 %1568 }
 0x43e   : > { %v1579_v32 = vsub.f32 %v1563_v14, %v1569_v30 }
 0x440   : > { %v1583_v36 = vmul.f32 1.442695, %v1579_v32 }
 0x441   : > { %v1575_v33 = vpop.xlane.xlu0 %1574  ;;  %v1572_v34 = vpop.xlane.xlu1 %1571 }
 0x442   : > { %v1581_v35 = vsub.f32 %v1565_v18, %v1575_v33  ;;  %v1580_v28 = vsub.f32 %v1564_v21, %v1572_v34  ;;  %v7181_v21 = vld [vmem:[%s9396_s15] sm:$0xff]  }
 0x444   : > { %v1587_v27 = vmul.f32 1.442695, %v1581_v35  ;;  %v1585_v31 = vmul.f32 1.442695, %v1580_v28 }
 0x445   : > { %v1578_v37 = vpop.xlane.xlu1 %1577 }
 0x446   : > { %7412 = vpow2.f32 %v1587_v27  ;;  %v1582_v38 = vsub.f32 %v1566_v19, %v1578_v37 }
 0x447   : > { %7414 = vpow2.f32 %v1585_v31 }
 0x448   : > { %7416 = vpow2.f32 %v1583_v36  ;;  %v1589_v39 = vmul.f32 1.442695, %v1582_v38 }
 0x44a   : > { %7418 = vpow2.f32 %v1589_v39 }
 0x453   : > { %v7413_v40 = vpop.eup %7412 }
 0x454   : > { %v7415_v41 = vpop.eup %7414  ;;  %v1597_v43 = vsel %vm881_vm0, %v7413_v40, 0.0 }
 0x455   : > { %v7417_v44 = vpop.eup %7416  ;;  %1598 = vadd.xlane.f32.xlu0 %v1597_v43  ;;  %v1594_v45 = vsel %vm881_vm0, %v7415_v41, 0.0 }
 0x456   : > { %1595 = vadd.xlane.f32.xlu1 %v1594_v45  ;;  %v1591_v47 = vsel %vm881_vm0, %v7417_v44, 0.0 }
 0x457   : > { %v7419_v46 = vpop.eup %7418 }
 0x458   : > { %v1600_v48 = vsel %vm881_vm0, %v7419_v46, 0.0 }
 0x459   : > { %1592 = vadd.xlane.f32.xlu0 %v1591_v47 }
 0x45a   : > { %1601 = vadd.xlane.f32.xlu1 %v1600_v48 }
 0x46b   : > { %1678 = vrot.lane.b32.xlu1 %v7952_v4, %s9418_s28 }
 0x46f   : > { %1672 = vrot.lane.b32.xlu1 %v7994_v51, %s9418_s28  ;;  %1680 = vrot.lane.b32.xlu0 %v7946_v0, %s9418_s28 }
 0x473   : > { %1674 = vrot.lane.b32.xlu1 %v7996_v52, %s9418_s28 }
 0x4de   : > { %v1599_v49 = vpop.xlane.xlu0 %1598 }
 0x4df   : > { %v1596_v50 = vpop.xlane.xlu1 %1595 }
 0x4e0   : > { %7420 = vrcp.f32 %v1596_v50 }
 0x4e1   : > { %7422 = vrcp.f32 %v1599_v49 }
 0x4e2   : > { %v1593_v54 = vpop.xlane.xlu0 %1592 }
 0x4e3   : > { %7424 = vrcp.f32 %v1593_v54  ;;  %v1602_v57 = vpop.xlane.xlu1 %1601 }
 0x4e4   : > { %7426 = vrcp.f32 %v1602_v57 }
 0x4e6   : > { %v1681_v58 = vpop.permute.xlu0 %1680 }
 0x4e7   : > { %7125 = vmatprep.subr.msk.bf16.mxu1 %vm881_vm0, %v1681_v58  ;;  %v1679_v62 = vpop.permute.xlu1 %1678  ;;  %v1692_v15 = vsel %vm881_vm0, %v1681_v58, 0 }
 0x4e8   : > { %v1689_v16 = vsel %vm881_vm0, %v1679_v62, 0 }
 0x4eb   : > { %v1673_v14 = vpop.permute.xlu1 %1672 }
 0x4ed   : > { %v7421_v59 = vpop.eup %7420 }
 0x4ee   : > { %v7423_v60 = vpop.eup %7422  ;;  %v1608_v5 = vmul.f32 %v7421_v59, %v7415_v41 }
 0x4ef   : > { %v1609_v6 = vmul.f32 %v7423_v60, %v7413_v40  ;;  %v1675_v18 = vpop.permute.xlu1 %1674 }
 0x4f0   : > { %v7425_v61 = vpop.eup %7424 }
 0x4f1   : > { %v7427_v63 = vpop.eup %7426  ;;  %v1607_v2 = vmul.f32 %v7425_v61, %v7417_v44 }
 0x4f2   : > { %v1610_v7 = vmul.f32 %v7427_v63, %v7419_v46 }
 0x4f3   : > { %v1611_v8 = vpack.c.bf16 %v1608_v5, %v1607_v2 }
 0x4f4   : > { %v1612_v10 = vpack.c.bf16 %v1610_v7, %v1609_v6 }
 0x4f5   : > { %6883 = vmatprep.mubr.msk.bf16.mxu1 %vm881_vm0, %v1611_v8 }
 0x4f6   : > { %6884 = vmatmul.mubr.msk.bf16.vlgmr.msra.gmra.mxu1 %vm881_vm0, %v1612_v10 }
 0x4f7   : > { %6888 = vmatpush3.bf16.xpose.msra.mxu1 %v1692_v15  ;;  %6891 = vmatprep.mubr.msk.bf16.mxu1 %vm881_vm0, %v1673_v14  ;;  %v7182_v14 = vld [vmem:[%s9396_s15 + $0x18] sm:$0xff]  }
 0x4f8   : > { %7126 = vmatprep.subr.msk.bf16.mxu1 %vm881_vm0, %v1679_v62 }
 0x4ff   : > { %6890 = vmatpush3.bf16.xpose.msra.mxu1 %v1689_v16 }
 0x500   : > { %6911 = vmatprep.subr.bf16.mxu1 %v7180_v20 }
 0x506   : > { %6892 = vmatmul.mubr.msk.bf16.vlgmr.msra.gmra.mxu1 %vm881_vm0, %v1675_v18 }
 0x507   : > { %6912 = vmatpush3.bf16.msra.mxu1 %v7180_v20 }
 0x508   : > { %6913 = vmatprep.subr.bf16.mxu1 %v7181_v21 }
 0x50b   : > { %6914 = vmatpush3.bf16.msra.mxu1 %v7181_v21 }
 0x5b6   : > { %v6885_v22 = vpop.f32.mrf.mxu1 }
 0x5b8   : > { %v1653_v23 = vpop.f32.mrf.mxu1 }
 0x5ba   : > { %v6886_v19 = vpop.f32.mrf.mxu1 }
 0x5bb   : > { %v1669_v32 = vpack.c.bf16 %v6886_v19, %v6885_v22 }
 0x5bc   : > { %v1656_v29 = vpop.f32.mrf.mxu1 }
 0x5bd   : > { %v1668_v30 = vpack.c.bf16 %v1656_v29, %v1653_v23 }
 0x5bf   : > { %6915 = vmatprep.mubr.msk.bf16.mxu1 %vm881_vm0, %v1668_v30 }
 0x5c0   : > { %6916 = vmatmul.mubr.msk.bf16.vlgmr.msra.gmra.mxu1 %vm881_vm0, %v1669_v32 }
 0x5c6   : > { %v6893_v33 = vpop.f32.mrf.mxu1 }
 0x5c7   : > { %v1745_v27 = vsel %vm6057_vm12, %v6893_v33, -1e+30 }
 0x5c8   : > { %v1728_v34 = vpop.f32.mrf.mxu1  ;;  %v1753_v38 = vsel %vm881_vm0, %v1745_v27, -inf }
 0x5c9   : > { %v1743_v35 = vsel %vm7812_vm8, %v1728_v34, -1e+30 }
 0x5ca   : > { %v6894_v28 = vpop.f32.mrf.mxu1  ;;  %v1747_v36 = vsel %vm881_vm0, %v1743_v35, -inf }
 0x5cb   : > { %1748 = vmax.xlane.f32.xlu0 %v1747_v36  ;;  %v1746_v40 = vsel %vm7817_vm9, %v6894_v28, -1e+30 }
 0x5cc   : > { %v1731_v31 = vpop.f32.mrf.mxu1  ;;  %v1756_v41 = vsel %vm881_vm0, %v1746_v40, -inf }
 0x5cd   : > { %v1744_v37 = vsel %vm8020_vm13, %v1731_v31, -1e+30 }
 0x5ce   : > { %v1750_v39 = vsel %vm881_vm0, %v1744_v37, -inf }
 0x5cf   : > { %1754 = vmax.xlane.f32.xlu0 %v1753_v38  ;;  %1751 = vmax.xlane.f32.xlu1 %v1750_v39 }
 0x5d3   : > { %1757 = vmax.xlane.f32.xlu0 %v1756_v41 }
 0x5e0   : > { %1797 = vrot.lane.b32.xlu1 %v8005_v1, %s9418_s28 }
 0x5e4   : > { %1795 = vrot.lane.b32.xlu1 %v8007_v3, %s9418_s28 }
 0x654   : > { %v1749_v43 = vpop.xlane.xlu0 %1748 }
 0x655   : > { %v1759_v44 = vsub.f32 %v1743_v35, %v1749_v43 }
 0x657   : > { %v1763_v48 = vmul.f32 1.442695, %v1759_v44 }
 0x658   : > { %v1755_v45 = vpop.xlane.xlu0 %1754  ;;  %v1752_v46 = vpop.xlane.xlu1 %1751 }
 0x659   : > { %v1761_v47 = vsub.f32 %v1745_v27, %v1755_v45  ;;  %v1760_v50 = vsub.f32 %v1744_v37, %v1752_v46  ;;  %v7183_v27 = vld [vmem:[%s9396_s15 + $0x10] sm:$0xff]  }
 0x65b   : > { %v1767_v49 = vmul.f32 1.442695, %v1761_v47  ;;  %v1765_v59 = vmul.f32 1.442695, %v1760_v50 }
 0x65c   : > { %v1758_v54 = vpop.xlane.xlu0 %1757  ;;  %v1798_v57 = vpop.permute.xlu1 %1797 }
 0x65d   : > { %7428 = vpow2.f32 %v1767_v49  ;;  %v1762_v58 = vsub.f32 %v1746_v40, %v1758_v54  ;;  %6895 = vmatprep.subr.bf16.mxu0 %v1798_v57 }
 0x65e   : > { %6896 = vmatpush3.bf16.msra.mxu0 %v1798_v57  ;;  %7430 = vpow2.f32 %v1763_v48 }
 0x65f   : > { %v1769_v60 = vmul.f32 1.442695, %v1762_v58 }
 0x660   : > { %v1796_v61 = vpop.permute.xlu1 %1795 }
 0x661   : > { %7432 = vpow2.f32 %v1769_v60  ;;  %6897 = vmatprep.subr.bf16.mxu0 %v1796_v61 }
 0x662   : > { %6898 = vmatpush3.bf16.msra.mxu0 %v1796_v61  ;;  %7434 = vpow2.f32 %v1765_v59 }
 0x663   : > { %6903 = vmatprep.subr.bf16.mxu0 %v7182_v14 }
 0x66a   : > { %v7429_v62 = vpop.eup %7428 }
 0x66b   : > { %v1777_v63 = vsel %vm881_vm0, %v7429_v62, 0.0  ;;  %v7431_v2 = vpop.eup %7430 }
 0x66c   : > { %1778 = vadd.xlane.f32.xlu0 %v1777_v63  ;;  %v1771_v6 = vsel %vm881_vm0, %v7431_v2, 0.0 }
 0x66e   : > { %v7433_v5 = vpop.eup %7432 }
 0x66f   : > { %v1780_v7 = vsel %vm881_vm0, %v7433_v5, 0.0  ;;  %v7435_v8 = vpop.eup %7434 }
 0x670   : > { %1772 = vadd.xlane.f32.xlu0 %v1771_v6  ;;  %1781 = vadd.xlane.f32.xlu1 %v1780_v7  ;;  %v1774_v10 = vsel %vm881_vm0, %v7435_v8, 0.0 }
 0x674   : > { %1775 = vadd.xlane.f32.xlu1 %v1774_v10 }
 0x680   : > { %v8112_v37 = vpop.f32.mrf.mxu1 }
 0x682   : > { %v8114_v38 = vpop.f32.mrf.mxu1 }
 0x684   : > { %v8116_v39 = vpop.f32.mrf.mxu1 }
 0x685   : > { %1996 = vrot.lane.b32.xlu1 %v7952_v4, %s9416_s26 }
 0x686   : > { %1998 = vrot.lane.b32.xlu0 %v7946_v0, %s9416_s26  ;;  %v8118_v40 = vpop.f32.mrf.mxu1 }
 0x689   : > { %1994 = vrot.lane.b32.xlu1 %v7996_v52, %s9416_s26 }
 0x68a   : > { %1992 = vrot.lane.b32.xlu0 %v7994_v51, %s9416_s26 }
 0x68d   : > { %2249 = vrot.lane.b32.xlu1 %v7952_v4, %s9414_s27 }
 0x68e   : > { %2251 = vrot.lane.b32.xlu0 %v7946_v0, %s9414_s27 }
 0x691   : > { %2247 = vrot.lane.b32.xlu1 %v7996_v52, %s9414_s27 }
 0x692   : > { %2245 = vrot.lane.b32.xlu0 %v7994_v51, %s9414_s27 }
 0x6f5   : > { %v1779_v15 = vpop.xlane.xlu0 %1778 }
 0x6f9   : > { %v1773_v16 = vpop.xlane.xlu0 %1772  ;;  %v1782_v18 = vpop.xlane.xlu1 %1781 }
 0x6fa   : > { %7436 = vrcp.f32 %v1782_v18 }
 0x6fb   : > { %7438 = vrcp.f32 %v1773_v16 }
 0x6fc   : > { %7440 = vrcp.f32 %v1779_v15 }
 0x6fd   : > { %v1999_v4 = vpop.permute.xlu0 %1998  ;;  %v1776_v20 = vpop.xlane.xlu1 %1775 }
 0x6fe   : > { %7442 = vrcp.f32 %v1776_v20  ;;  %7127 = vmatprep.subr.msk.bf16.mxu1 %vm881_vm0, %v1999_v4  ;;  %v2010_v0 = vsel %vm881_vm0, %v1999_v4, 0 }
 0x6ff   : > { %6920 = vmatpush3.bf16.xpose.msra.mxu1 %v2010_v0 }
 0x701   : > { %v1993_v21 = vpop.permute.xlu0 %1992  ;;  %v1997_v52 = vpop.permute.xlu1 %1996 }
 0x702   : > { %7128 = vmatprep.subr.msk.bf16.mxu1 %vm881_vm0, %v1997_v52  ;;  %6923 = vmatprep.mubr.msk.bf16.mxu1 %vm881_vm0, %v1993_v21  ;;  %v2007_v51 = vsel %vm881_vm0, %v1997_v52, 0 }
 0x705   : > { %v1995_v34 = vpop.permute.xlu1 %1994  ;;  %v2252_v31 = vpop.permute.xlu0 %2251 }
 0x706   : > { %v2263_v6 = vsel %vm881_vm0, %v2252_v31, 0 }
 0x707   : > { %6922 = vmatpush3.bf16.xpose.msra.mxu1 %v2007_v51  ;;  %v7437_v22 = vpop.eup %7436 }
 0x708   : > { %v7439_v23 = vpop.eup %7438  ;;  %v1790_v30 = vmul.f32 %v7437_v22, %v7433_v5 }
 0x709   : > { %v7441_v19 = vpop.eup %7440  ;;  %v1787_v32 = vmul.f32 %v7439_v23, %v7431_v2  ;;  %v2246_v5 = vpop.permute.xlu0 %2245 }
 0x70a   : > { %v1789_v35 = vmul.f32 %v7441_v19, %v7429_v62  ;;  %v2250_v7 = vpop.permute.xlu1 %2249 }
 0x70b   : > { %v7443_v29 = vpop.eup %7442 }
 0x70c   : > { %v1788_v33 = vmul.f32 %v7443_v29, %v7435_v8  ;;  %v1792_v36 = vpack.c.bf16 %v1790_v30, %v1789_v35  ;;  %v2260_v8 = vsel %vm881_vm0, %v2250_v7, 0 }
 0x70e   : > { %6924 = vmatmul.mubr.msk.bf16.vlgmr.msra.gmra.mxu1 %vm881_vm0, %v1995_v34  ;;  %v1791_v28 = vpack.c.bf16 %v1788_v33, %v1787_v32  ;;  %v2248_v10 = vpop.permute.xlu1 %2247 }
 0x710   : > { %6899 = vmatprep.mubr.msk.bf16.mxu0 %vm881_vm0, %v1791_v28 }
 0x711   : > { %6900 = vmatmul.mubr.msk.bf16.vlgmr.msra.gmra.mxu0 %vm881_vm0, %v1792_v36 }
 0x712   : > { %6904 = vmatpush3.bf16.msra.mxu0 %v7182_v14 }
 0x713   : > { %6905 = vmatprep.subr.bf16.mxu0 %v7183_v27 }
 0x716   : > { %6906 = vmatpush3.bf16.msra.mxu0 %v7183_v27 }
 0x717   : > { %7129 = vmatprep.subr.msk.bf16.mxu0 %vm881_vm0, %v2252_v31 }
 0x7ce   : > { %v6925_v41 = vpop.f32.mrf.mxu1 }
 0x7cf   : > { %v2063_v48 = vsel %vm6057_vm12, %v6925_v41, -1e+30 }
 0x7d0   : > { %v2046_v43 = vpop.f32.mrf.mxu1  ;;  %v2071_v58 = vsel %vm881_vm0, %v2063_v48, -inf }
 0x7d1   : > { %v2061_v44 = vsel %vm7812_vm8, %v2046_v43, -1e+30  ;;  %v6901_v45 = vpop.f32.mrf.mxu0 }
 0x7d2   : > { %v6926_v46 = vpop.f32.mrf.mxu1  ;;  %v2065_v47 = vsel %vm881_vm0, %v2061_v44, -inf }
 0x7d3   : > { %v1841_v49 = vpop.f32.mrf.mxu0  ;;  %2066 = vmax.xlane.f32.xlu0 %v2065_v47  ;;  %v2064_v60 = vsel %vm7817_vm9, %v6926_v46, -1e+30 }
 0x7d4   : > { %v2049_v50 = vpop.f32.mrf.mxu1  ;;  %v2074_v2 = vsel %vm881_vm0, %v2064_v60, -inf }
 0x7d5   : > { %v2062_v54 = vsel %vm8020_vm13, %v2049_v50, -1e+30  ;;  %v6902_v57 = vpop.f32.mrf.mxu0 }
 0x7d6   : > { %v2068_v59 = vsel %vm881_vm0, %v2062_v54, -inf  ;;  %v1857_v63 = vpack.c.bf16 %v6902_v57, %v6901_v45 }
 0x7d7   : > { %v1844_v61 = vpop.f32.mrf.mxu0  ;;  %2072 = vmax.xlane.f32.xlu0 %v2071_v58  ;;  %2069 = vmax.xlane.f32.xlu1 %v2068_v59 }
 0x7d8   : > { %v1856_v62 = vpack.c.bf16 %v1844_v61, %v1841_v49 }
 0x7da   : > { %6907 = vmatprep.mubr.msk.bf16.mxu0 %vm881_vm0, %v1856_v62 }
 0x7db   : > { %6908 = vmatmul.mubr.msk.bf16.vlgmr.msra.gmra.mxu0 %vm881_vm0, %v1857_v63  ;;  %2075 = vmax.xlane.f32.xlu0 %v2074_v2 }
 0x7dc   : > { %6944 = vmatpush3.bf16.xpose.msra.mxu0 %v2263_v6  ;;  %6947 = vmatprep.mubr.msk.bf16.mxu0 %vm881_vm0, %v2246_v5 }
 0x7dd   : > { %7130 = vmatprep.subr.msk.bf16.mxu0 %vm881_vm0, %v2250_v7 }
 0x7e4   : > { %6946 = vmatpush3.bf16.xpose.msra.mxu0 %v2260_v8 }
 0x7eb   : > { %6948 = vmatmul.mubr.msk.bf16.vlgmr.msra.gmra.mxu0 %vm881_vm0, %v2248_v10 }
 0x7ec   : > { %2827 = vmatprep.mubr.bf16.mxu0 %v7636_v11 }
 0x85c   : > { %v2067_v14 = vpop.xlane.xlu0 %2066 }
 0x85d   : > { %v2077_v15 = vsub.f32 %v2061_v44, %v2067_v14 }
 0x85f   : > { %v2081_v20 = vmul.f32 1.442695, %v2077_v15 }
 0x860   : > { %v2073_v16 = vpop.xlane.xlu0 %2072  ;;  %v2070_v18 = vpop.xlane.xlu1 %2069 }
 0x861   : > { %v2079_v4 = vsub.f32 %v2063_v48, %v2073_v16  ;;  %v2078_v21 = vsub.f32 %v2062_v54, %v2070_v18 }
 0x863   : > { %v2085_v0 = vmul.f32 1.442695, %v2079_v4  ;;  %v2083_v22 = vmul.f32 1.442695, %v2078_v21 }
 0x864   : > { %v2076_v52 = vpop.xlane.xlu0 %2075 }
 0x865   : > { %7444 = vpow2.f32 %v2085_v0  ;;  %v2080_v51 = vsub.f32 %v2064_v60, %v2076_v52 }
 0x866   : > { %7446 = vpow2.f32 %v2081_v20 }
 0x867   : > { %v2087_v23 = vmul.f32 1.442695, %v2080_v51 }
 0x869   : > { %7448 = vpow2.f32 %v2087_v23 }
 0x86a   : > { %7450 = vpow2.f32 %v2083_v22 }
 0x872   : > { %v7445_v19 = vpop.eup %7444 }
 0x873   : > { %v2095_v29 = vsel %vm881_vm0, %v7445_v19, 0.0  ;;  %v7447_v30 = vpop.eup %7446 }
 0x874   : > { %2096 = vadd.xlane.f32.xlu0 %v2095_v29  ;;  %v2089_v33 = vsel %vm881_vm0, %v7447_v30, 0.0 }
 0x876   : > { %v7449_v32 = vpop.eup %7448 }
 0x877   : > { %v2098_v34 = vsel %vm881_vm0, %v7449_v32, 0.0  ;;  %v7451_v35 = vpop.eup %7450 }
 0x878   : > { %2090 = vadd.xlane.f32.xlu0 %v2089_v33  ;;  %2099 = vadd.xlane.f32.xlu1 %v2098_v34  ;;  %v2092_v28 = vsel %vm881_vm0, %v7451_v35, 0.0 }
 0x87c   : > { %2093 = vadd.xlane.f32.xlu1 %v2092_v28 }
 0x88d   : > { %2111 = vrot.lane.b32.xlu1 %v8007_v3, %s9416_s26 }
 0x88e   : > { %2113 = vrot.lane.b32.xlu0 %v8005_v1, %s9416_s26 }
 0x89b   : > { %v8148_v36 = vpop.f32.mrf.mxu0 }
 0x89d   : > { %v8150_v27 = vpop.f32.mrf.mxu0 }
 0x89f   : > { %v8152_v31 = vpop.f32.mrf.mxu0 }
 0x8a1   : > { %v8154_v41 = vpop.f32.mrf.mxu0 }
 0x8ab   : > { %v6949_v43 = vpop.f32.mrf.mxu0 }
 0x8ac   : > { %v2316_v57 = vsel %vm6057_vm12, %v6949_v43, -1e+30 }
 0x8ad   : > { %v2299_v44 = vpop.f32.mrf.mxu0  ;;  %v2324_v59 = vsel %vm881_vm0, %v2316_v57, -inf }
 0x8ae   : > { %v2314_v45 = vsel %vm7812_vm8, %v2299_v44, -1e+30 }
 0x8af   : > { %v6950_v46 = vpop.f32.mrf.mxu0  ;;  %v2318_v47 = vsel %vm881_vm0, %v2314_v45, -inf }
 0x8b0   : > { %v2317_v48 = vsel %vm7817_vm9, %v6950_v46, -1e+30 }
 0x8b1   : > { %v2302_v49 = vpop.f32.mrf.mxu0  ;;  %2319 = vmax.xlane.f32.xlu1 %v2318_v47  ;;  %v2327_v58 = vsel %vm881_vm0, %v2317_v48, -inf }
 0x8b2   : > { %v2315_v50 = vsel %vm8020_vm13, %v2302_v49, -1e+30  ;;  %v7184_v49 = vld [vmem:[%s9396_s15 + $0x28] sm:$0xff]  }
 0x8b3   : > { %v2321_v54 = vsel %vm881_vm0, %v2315_v50, -inf }
 0x8b4   : > { %2322 = vmax.xlane.f32.xlu0 %v2321_v54 }
 0x8b5   : > { %2328 = vmax.xlane.f32.xlu1 %v2327_v58 }
 0x8b8   : > { %2325 = vmax.xlane.f32.xlu0 %v2324_v59 }
 0x8fd   : > { %v2097_v60 = vpop.xlane.xlu0 %2096 }
 0x901   : > { %v2091_v61 = vpop.xlane.xlu0 %2090  ;;  %v2100_v62 = vpop.xlane.xlu1 %2099 }
 0x902   : > { %7452 = vrcp.f32 %v2100_v62 }
 0x903   : > { %7454 = vrcp.f32 %v2091_v61 }
 0x904   : > { %7456 = vrcp.f32 %v2097_v60 }
 0x905   : > { %v2114_v63 = vpop.permute.xlu0 %2113  ;;  %v2094_v2 = vpop.xlane.xlu1 %2093 }
 0x906   : > { %7458 = vrcp.f32 %v2094_v2  ;;  %6927 = vmatprep.subr.bf16.mxu1 %v2114_v63 }
 0x907   : > { %6928 = vmatpush3.bf16.msra.mxu1 %v2114_v63 }
 0x909   : > { %v2112_v5 = vpop.permute.xlu1 %2111 }
 0x90a   : > { %6929 = vmatprep.subr.bf16.mxu1 %v2112_v5 }
 0x90b   : > { %6930 = vmatpush3.bf16.msra.mxu1 %v2112_v5 }
 0x90c   : > { %6935 = vmatprep.subr.bf16.mxu1 %v7184_v49 }
 0x90f   : > { %v7453_v6 = vpop.eup %7452 }
 0x910   : > { %v7455_v7 = vpop.eup %7454  ;;  %v2108_v14 = vmul.f32 %v7453_v6, %v7449_v32 }
 0x911   : > { %v7457_v8 = vpop.eup %7456  ;;  %v2105_v15 = vmul.f32 %v7455_v7, %v7447_v30 }
 0x912   : > { %v2107_v18 = vmul.f32 %v7457_v8, %v7445_v19 }
 0x913   : > { %v7459_v10 = vpop.eup %7458 }
 0x914   : > { %v2106_v16 = vmul.f32 %v7459_v10, %v7451_v35  ;;  %v2110_v20 = vpack.c.bf16 %v2108_v14, %v2107_v18 }
 0x916   : > { %v2109_v4 = vpack.c.bf16 %v2106_v16, %v2105_v15 }
 0x918   : > { %6931 = vmatprep.mubr.msk.bf16.mxu1 %vm881_vm0, %v2109_v4 }
 0x919   : > { %6932 = vmatmul.mubr.msk.bf16.vlgmr.msra.gmra.mxu1 %vm881_vm0, %v2110_v20 }
 0x91a   : > { %6936 = vmatpush3.bf16.msra.mxu1 %v7184_v49 }
 0x93a   : > { %v2320_v0 = vpop.xlane.xlu1 %2319 }
 0x93b   : > { %v2330_v23 = vsub.f32 %v2314_v45, %v2320_v0  ;;  %v7186_v0 = vld [vmem:[%s9396_s15 + $0x38] sm:$0xff]  }
 0x93d   : > { %v2323_v21 = vpop.xlane.xlu0 %2322  ;;  %v2334_v30 = vmul.f32 1.442695, %v2330_v23 }
 0x93e   : > { %v2331_v52 = vsub.f32 %v2315_v50, %v2323_v21  ;;  %v2329_v51 = vpop.xlane.xlu1 %2328  ;;  %v7185_v50 = vld [vmem:[%s9396_s15 + $0x20] sm:$0xff]   ;;  %v7187_v21 = vld [vmem:[%s9396_s15 + $0x30] sm:$0xff]  }
 0x93f   : > { %v2333_v22 = vsub.f32 %v2317_v48, %v2329_v51  ;;  %6937 = vmatprep.subr.bf16.mxu1 %v7185_v50 }
 0x940   : > { %v2336_v29 = vmul.f32 1.442695, %v2331_v52  ;;  %6938 = vmatpush3.bf16.msra.mxu1 %v7185_v50  ;;  %v1986_v52 = vadd.f32 %v8112_v37, %v8148_v36 }
 0x941   : > { %v2340_v33 = vmul.f32 1.442695, %v2333_v22  ;;  %v2326_v34 = vpop.xlane.xlu0 %2325  ;;  %v1978_v22 = vadd.f32 %v8114_v38, %v8150_v27 }
 0x942   : > { %v2332_v28 = vsub.f32 %v2316_v57, %v2326_v34 }
 0x943   : > { %7460 = vpow2.f32 %v2340_v33  ;;  %v1989_v33 = vadd.f32 %v8116_v39, %v8152_v31 }
 0x944   : > { %v2338_v32 = vmul.f32 1.442695, %v2332_v28  ;;  %7462 = vpow2.f32 %v2336_v29 }
 0x946   : > { %7464 = vpow2.f32 %v2338_v32 }
 0x947   : > { %7466 = vpow2.f32 %v2334_v30  ;;  %v1981_v30 = vadd.f32 %v8118_v40, %v8154_v41 }
 0x950   : > { %v7461_v19 = vpop.eup %7460 }
 0x951   : > { %v2351_v35 = vsel %vm881_vm0, %v7461_v19, 0.0  ;;  %v7463_v43 = vpop.eup %7462 }
 0x952   : > { %2352 = vadd.xlane.f32.xlu1 %v2351_v35  ;;  %v2345_v45 = vsel %vm881_vm0, %v7463_v43, 0.0 }
 0x953   : > { %v7465_v44 = vpop.eup %7464 }
 0x954   : > { %v2348_v46 = vsel %vm881_vm0, %v7465_v44, 0.0  ;;  %v7467_v47 = vpop.eup %7466 }
 0x955   : > { %2349 = vadd.xlane.f32.xlu0 %v2348_v46  ;;  %v2342_v48 = vsel %vm881_vm0, %v7467_v47, 0.0 }
 0x956   : > { %2346 = vadd.xlane.f32.xlu1 %v2345_v45 }
 0x959   : > { %2343 = vadd.xlane.f32.xlu0 %v2342_v48  ;;  %v6131_v48 = vld [vmem:[%s9397_s16] ss:$0 sm:$0xff] }
 0x967   : > { %2364 = vrot.lane.b32.xlu1 %v8007_v3, %s9414_s27 }
 0x96f   : > { %2366 = vrot.lane.b32.xlu0 %v8005_v1, %s9414_s27 }
 0x9d9   : > { %v6933_v54 = vpop.f32.mrf.mxu1 }
 0x9db   : > { %v2157_v57 = vpop.f32.mrf.mxu1  ;;  %v2353_v58 = vpop.xlane.xlu1 %2352 }
 0x9dd   : > { %v6934_v59 = vpop.f32.mrf.mxu1 }
 0x9de   : > { %v2350_v60 = vpop.xlane.xlu0 %2349  ;;  %v2173_v2 = vpack.c.bf16 %v6934_v59, %v6933_v54 }
 0x9df   : > { %v2160_v61 = vpop.f32.mrf.mxu1  ;;  %v2347_v62 = vpop.xlane.xlu1 %2346  ;;  %7468 = vrcp.f32 %v2350_v60 }
 0x9e0   : > { %v2172_v63 = vpack.c.bf16 %v2160_v61, %v2157_v57  ;;  %7470 = vrcp.f32 %v2347_v62  ;;  %v7193_v62 = vld [vmem:[%s9400_s19 + $0xec] ss:$16 sps:$4 sm:$0xff]  }
 0x9e1   : > { %7472 = vrcp.f32 %v2353_v58 }
 0x9e2   : > { %v2344_v5 = vpop.xlane.xlu0 %2343  ;;  %6939 = vmatprep.mubr.msk.bf16.mxu1 %vm881_vm0, %v2172_v63 }
 0x9e3   : > { %7474 = vrcp.f32 %v2344_v5  ;;  %6940 = vmatmul.mubr.msk.bf16.vlgmr.msra.gmra.mxu1 %vm881_vm0, %v2173_v2  ;;  %v2365_v1 = vpop.permute.xlu1 %2364 }
 0x9e6   : > { %v2367_v3 = vpop.permute.xlu0 %2366 }
 0x9e7   : > { %6951 = vmatprep.subr.bf16.mxu1 %v2367_v3 }
 0x9e8   : > { %6952 = vmatpush3.bf16.msra.mxu1 %v2367_v3 }
 0x9e9   : > { %6953 = vmatprep.subr.bf16.mxu1 %v2365_v1 }
 0x9ec   : > { %6954 = vmatpush3.bf16.msra.mxu1 %v2365_v1  ;;  %v7469_v6 = vpop.eup %7468 }
 0x9ed   : > { %v7471_v7 = vpop.eup %7470  ;;  %v2360_v14 = vmul.f32 %v7469_v6, %v7465_v44  ;;  %6959 = vmatprep.subr.bf16.mxu1 %v7186_v0 }
 0x9ee   : > { %v7473_v8 = vpop.eup %7472  ;;  %v2359_v16 = vmul.f32 %v7471_v7, %v7463_v43 }
 0x9ef   : > { %v2361_v18 = vmul.f32 %v7473_v8, %v7461_v19 }
 0x9f0   : > { %v7475_v10 = vpop.eup %7474 }
 0x9f1   : > { %v2358_v15 = vmul.f32 %v7475_v10, %v7467_v47  ;;  %v2363_v20 = vpack.c.bf16 %v2361_v18, %v2360_v14 }
 0x9f3   : > { %v2362_v4 = vpack.c.bf16 %v2359_v16, %v2358_v15 }
 0x9f5   : > { %6955 = vmatprep.mubr.msk.bf16.mxu1 %vm881_vm0, %v2362_v4 }
 0x9f6   : > { %6956 = vmatmul.mubr.msk.bf16.vlgmr.msra.gmra.mxu1 %vm881_vm0, %v2363_v20 }
 0x9f7   : > { %6960 = vmatpush3.bf16.msra.mxu1 %v7186_v0 }
 0x9f8   : > { %6961 = vmatprep.subr.bf16.mxu1 %v7187_v21 }
 0x9fb   : > { %6962 = vmatpush3.bf16.msra.mxu1 %v7187_v21  ;;  %v7196_v21 = vld [vmem:[%s9400_s19 + $0xc4] ss:$16 sps:$4 sm:$0xff]  }
 0x9fc   : > { %2848 = vmatprep.subr.bf16.mxu1 %v7193_v62 }
 0xaa3   : > { %v6941_v51 = vpop.f32.mrf.mxu1 }
 0xaa4   : > { %v2243_v23 = vadd.f32 %v6941_v51, %v1986_v52  ;;  %v7199_v52 = vld [vmem:[%s9400_s19 + $0xcc] ss:$16 sps:$4 sm:$0xff]   ;;  %v7194_v51 = vld [vmem:[%s9400_s19 + $0xc0] ss:$16 sps:$4 sm:$0xff]  }
 0xaa5   : > { %v2226_v29 = vpop.f32.mrf.mxu1 }
 0xaa6   : > { %v2241_v34 = vadd.f32 %v2226_v29, %v1978_v22  ;;  %v7197_v22 = vld [vmem:[%s9400_s19 + $0xc8] ss:$16 sps:$4 sm:$0xff]   ;;  %v7205_v29 = vld [vmem:[%s9400_s19 + $0xac] ss:$16 sps:$4 sm:$0xff]  }
 0xaa7   : > { %v6942_v28 = vpop.f32.mrf.mxu1 }
 0xaa8   : > { %v2244_v32 = vadd.f32 %v6942_v28, %v1989_v33  ;;  %v7200_v33 = vld [vmem:[%s9400_s19 + $0xa0] ss:$16 sps:$4 sm:$0xff]   ;;  %v7208_v28 = vld [vmem:[%s9400_s19 + $0x84] ss:$16 sps:$4 sm:$0xff]  }
 0xaa9   : > { %v2229_v19 = vpop.f32.mrf.mxu1 }
 0xaaa   : > { %v2242_v35 = vadd.f32 %v2229_v19, %v1981_v30  ;;  %v7211_v30 = vld [vmem:[%s9400_s19 + $0x8c] ss:$16 sps:$4 sm:$0xff]   ;;  %v7209_v19 = vld [vmem:[%s9400_s19 + $0x88] ss:$16 sps:$4 sm:$0xff]  }
 0xab6   : > { %v6957_v43 = vpop.f32.mrf.mxu1 }
 0xab8   : > { %v2410_v44 = vpop.f32.mrf.mxu1 }
 0xaba   : > { %v6958_v37 = vpop.f32.mrf.mxu1 }
 0xabb   : > { %v2426_v47 = vpack.c.bf16 %v6958_v37, %v6957_v43  ;;  %v7214_v43 = vld [vmem:[%s9400_s19 + $0x64] ss:$16 sps:$4 sm:$0xff]   ;;  %v7217_v37 = vld [vmem:[%s9400_s19 + $0x6c] ss:$16 sps:$4 sm:$0xff]  }
 0xabc   : > { %v2413_v36 = vpop.f32.mrf.mxu1 }
 0xabd   : > { %v2425_v46 = vpack.c.bf16 %v2413_v36, %v2410_v44  ;;  %v7215_v44 = vld [vmem:[%s9400_s19 + $0x68] ss:$16 sps:$4 sm:$0xff]   ;;  %v7220_v36 = vld [vmem:[%s9400_s19 + $0x44] ss:$16 sps:$4 sm:$0xff]  }
 0xabf   : > { %6963 = vmatprep.mubr.msk.bf16.mxu1 %vm881_vm0, %v2425_v46  ;;  %v7223_v46 = vld [vmem:[%s9400_s19 + $0x4c] ss:$16 sps:$4 sm:$0xff]  }
 0xac0   : > { %6964 = vmatmul.mubr.msk.bf16.vlgmr.msra.gmra.mxu1 %vm881_vm0, %v2426_v47  ;;  %v7218_v47 = vld [vmem:[%s9400_s19 + $0x40] ss:$16 sps:$4 sm:$0xff]  }
 0xac1   : > { %2880 = vmatprep.mubr.bf16.mxu1 %v7636_v11 }
 0xb80   : > { %v6965_v38 = vpop.f32.mrf.mxu1 }
 0xb81   : > { %v2496_v49 = vadd.f32 %v6965_v38, %v2243_v23  ;;  %v7202_v23 = vld [vmem:[%s9400_s19 + $0xa4] ss:$16 sps:$4 sm:$0xff]   ;;  %v7221_v38 = vld [vmem:[%s9400_s19 + $0x48] ss:$16 sps:$4 sm:$0xff]  }
 0xb82   : > { %v2479_v39 = vpop.f32.mrf.mxu1 }
 0xb83   : > { %v2494_v27 = vadd.f32 %v2479_v39, %v2241_v34  ;;  %v2500_v59 = vadd.f32 %v2496_v49, %v7842_v42  ;;  %v7190_v42 = vld [vmem:[%s9400_s19 + $0xe4] ss:$16 sps:$4 sm:$0xff]   ;;  %v7203_v34 = vld [vmem:[%s9400_s19 + $0xa8] ss:$16 sps:$4 sm:$0xff]  }
 0xb84   : > { %v6966_v31 = vpop.f32.mrf.mxu1  ;;  %2795 = vmatprep.subr.bf16.mxu0 %v7190_v42  ;;  %v7226_v39 = vld [vmem:[%s9400_s19 + $0x24] ss:$16 sps:$4 sm:$0xff]   ;;  %v7233_v49 = vld [vmem:[%s9400_s19 + $0x8] ss:$16 sps:$4 sm:$0xff]  }
 0xb85   : > { %v2498_v40 = vadd.f32 %v2494_v27, %v7851_v53  ;;  %v2497_v41 = vadd.f32 %v6966_v31, %v2244_v32  ;;  %v8221_v61 = vadd.f32 %v6131_v48, %v2500_v59  ;;  %v7206_v32 = vld [vmem:[%s9400_s19 + $0x80] ss:$16 sps:$4 sm:$0xff]   ;;  %v7229_v27 = vld [vmem:[%s9400_s19 + $0x2c] ss:$16 sps:$4 sm:$0xff]  }
 0xb86   : > { %v2482_v45 = vpop.f32.mrf.mxu1  ;;  %v7224_v31 = vld [vmem:[%s9400_s19 + $0x20] ss:$16 sps:$4 sm:$0xff]  }
 0xb87   : > { %v2501_v50 = vadd.f32 %v2497_v41, %v7857_v55  ;;  %v2495_v54 = vadd.f32 %v2482_v45, %v2242_v35  ;;  %v8210_v57 = vadd.f32 %v6131_v48, %v2498_v40  ;;  %v7188_v55 = vld [vmem:[%s9400_s19 + $0xe0] ss:$16 sps:$4 sm:$0xff]   ;;  %v7227_v40 = vld [vmem:[%s9400_s19 + $0x28] ss:$16 sps:$4 sm:$0xff]   ;;  %v7232_v41 = vld [vmem:[%s9400_s19 + $0x4] ss:$16 sps:$4 sm:$0xff]  }
 0xb88   : > { %2796 = vmatpush1.bf16.msra.mxu0 %v7188_v55  ;;  %v7212_v35 = vld [vmem:[%s9400_s19 + $0x60] ss:$16 sps:$4 sm:$0xff]   ;;  %v7235_v45 = vld [vmem:[%s9400_s19 + $0xc] ss:$16 sps:$4 sm:$0xff]  }
 0xb89   : > { %v2499_v58 = vadd.f32 %v2495_v54, %v7859_v56  ;;  %2515 = vadd.xlane.f32.xlu1 %v8210_v57  ;;  %v8215_v60 = vadd.f32 %v6131_v48, %v2501_v50  ;;  %v7191_v56 = vld [vmem:[%s9400_s19 + $0xe8] ss:$16 sps:$4 sm:$0xff]   ;;  %2797 = vmatprep.subr.bf16.mxu0 %v7196_v21 }
 0xb8a   : > { %2849 = vmatpush1.bf16.msra.mxu1 %v7191_v56 }
 0xb8b   : > { %v8217_v53 = vadd.f32 %v6131_v48, %v2499_v58  ;;  %2850 = vmatprep.subr.bf16.mxu1 %v7199_v52  ;;  %v7230_v48 = vld [vmem:[%s9400_s19] ss:$16 sps:$4 sm:$0xff]  }
 0xb8c   : > { %2798 = vmatpush1.bf16.msra.mxu0 %v7194_v51 }
 0xb8d   : > { %2521 = vadd.xlane.f32.xlu1 %v8215_v60  ;;  %2517 = vadd.xlane.f32.xlu0 %v8217_v53 }
 0xb8e   : > { %2851 = vmatpush1.bf16.msra.mxu1 %v7197_v22  ;;  %2799 = vmatprep.subr.bf16.mxu0 %v7202_v23 }
 0xb8f   : > { %2852 = vmatprep.subr.bf16.mxu1 %v7205_v29 }
 0xb90   : > { %2800 = vmatpush1.bf16.msra.mxu0 %v7200_v33 }
 0xb91   : > { %2519 = vadd.xlane.f32.xlu0 %v8221_v61  ;;  %2801 = vmatprep.subr.bf16.mxu0 %v7208_v28 }
 0xb92   : > { %2853 = vmatpush1.bf16.msra.mxu1 %v7203_v34 }
 0xb93   : > { %2854 = vmatprep.subr.bf16.mxu1 %v7211_v30 }
 0xb94   : > { %2802 = vmatpush1.bf16.msra.mxu0 %v7206_v32  ;;  %v7238_v32 = vld [vmem:[%s9402_s21 + $0xb8] sm:$0xff]  }
 0xb95   : > { %2803 = vmatprep.subr.bf16.mxu0 %v7214_v43  ;;  %v7241_v43 = vld [vmem:[%s9402_s21 + $0x70] sm:$0xff]  }
 0xb96   : > { %2855 = vmatpush1.bf16.msra.mxu1 %v7209_v19  ;;  %v7239_v19 = vld [vmem:[%s9402_s21 + $0x38] sm:$0xff]  }
 0xb97   : > { %2856 = vmatprep.subr.bf16.mxu1 %v7217_v37  ;;  %v7243_v37 = vld [vmem:[%s9402_s21 + $0x30] sm:$0xff]  }
 0xb98   : > { %2804 = vmatpush1.bf16.msra.mxu0 %v7212_v35  ;;  %v7240_v35 = vld [vmem:[%s9402_s21 + $0xf0] sm:$0xff]  }
 0xb99   : > { %2805 = vmatprep.subr.bf16.mxu0 %v7220_v36  ;;  %v7244_v36 = vld [vmem:[%s9402_s21 + $0xe8] sm:$0xff]  }
 0xb9a   : > { %2857 = vmatpush1.bf16.msra.mxu1 %v7215_v44  ;;  %v7242_v44 = vld [vmem:[%s9402_s21 + $0xb0] sm:$0xff]  }
 0xb9b   : > { %2858 = vmatprep.subr.bf16.mxu1 %v7223_v46  ;;  %v7245_v46 = vld [vmem:[%s9402_s21 + $0x68] sm:$0xff]  }
 0xb9c   : > { %2806 = vmatpush1.bf16.msra.mxu0 %v7218_v47  ;;  %v7246_v47 = vld [vmem:[%s9402_s21 + $0xa8] sm:$0xff]  }
 0xb9d   : > { %2807 = vmatprep.subr.bf16.mxu0 %v7226_v39  ;;  %v7248_v39 = vld [vmem:[%s9402_s21 + $0xe0] sm:$0xff]  }
 0xb9e   : > { %2859 = vmatpush1.bf16.msra.mxu1 %v7221_v38  ;;  %v7247_v38 = vld [vmem:[%s9402_s21 + $0x28] sm:$0xff]  }
 0xb9f   : > { %2860 = vmatprep.subr.bf16.mxu1 %v7229_v27  ;;  %v7249_v27 = vld [vmem:[%s9402_s21 + $0x60] sm:$0xff]  }
 0xba0   : > { %2808 = vmatpush1.bf16.msra.mxu0 %v7224_v31  ;;  %v7250_v31 = vld [vmem:[%s9402_s21 + $0xa0] sm:$0xff]  }
 0xba1   : > { %2809 = vmatprep.subr.bf16.mxu0 %v7232_v41  ;;  %v7252_v41 = vld [vmem:[%s9402_s21 + $0xd8] sm:$0xff]  }
 0xba2   : > { %2861 = vmatpush1.bf16.msra.mxu1 %v7227_v40  ;;  %v7251_v40 = vld [vmem:[%s9402_s21 + $0x20] sm:$0xff]  }
 0xba3   : > { %2862 = vmatprep.subr.bf16.mxu1 %v7235_v45  ;;  %v7253_v45 = vld [vmem:[%s9402_s21 + $0x58] sm:$0xff]  }
 0xba4   : > { %2810 = vmatpush1.bf16.msra.mxu0 %v7230_v48  ;;  %v7254_v48 = vld [vmem:[%s9402_s21 + $0x98] sm:$0xff]  }
 0xba6   : > { %2863 = vmatpush1.bf16.msra.mxu1 %v7233_v49  ;;  %v7255_v49 = vld [vmem:[%s9402_s21 + $0x18] sm:$0xff]  }
 0xc12   : > { %v2516_v63 = vpop.xlane.xlu1 %2515 }
 0xc13   : > { %v2523_v2 = vmul.f32 0.0078125, %v2516_v63 }
 0xc15   : > { %v8237_v5 = vsub.f32 %v8210_v57, %v2523_v2 }
 0xc16   : > { %v2522_v3 = vpop.xlane.xlu1 %2521  ;;  %v2518_v1 = vpop.xlane.xlu0 %2517 }
 0xc17   : > { %v2526_v6 = vmul.f32 0.0078125, %v2522_v3  ;;  %v2524_v7 = vmul.f32 0.0078125, %v2518_v1  ;;  %v2531_v8 = vmul.f32 %v8237_v5, %v8237_v5 }
 0xc19   : > { %v8242_v10 = vsub.f32 %v8217_v53, %v2524_v7  ;;  %2535 = vadd.xlane.f32.xlu0 %v2531_v8  ;;  %v8245_v15 = vsub.f32 %v8215_v60, %v2526_v6  ;;  %v6132_v8 = vld [vmem:[%s9398_s17] ss:$0 sm:$0xff] }
 0xc1a   : > { %v2520_v14 = vpop.xlane.xlu0 %2519 }
 0xc1b   : > { %v2525_v16 = vmul.f32 0.0078125, %v2520_v14  ;;  %v2532_v18 = vmul.f32 %v8242_v10, %v8242_v10  ;;  %v2534_v20 = vmul.f32 %v8245_v15, %v8245_v15 }
 0xc1d   : > { %v8250_v4 = vsub.f32 %v8221_v61, %v2525_v16  ;;  %2537 = vadd.xlane.f32.xlu1 %v2532_v18 }
 0xc1f   : > { %v2533_v0 = vmul.f32 %v8250_v4, %v8250_v4 }
 0xc21   : > { %2541 = vadd.xlane.f32.xlu1 %v2534_v20  ;;  %2539 = vadd.xlane.f32.xlu0 %v2533_v0  ;;  %v6133_v20 = vld [vmem:[%s9399_s18] ss:$0 sm:$0xff] }
 0xca2   : > { %v2536_v50 = vpop.xlane.xlu0 %2535 }
 0xca3   : > { %v2543_v54 = vmul.f32 0.0078125, %v2536_v50  ;;  %v7256_v50 = vld [vmem:[%s9402_s21 + $0xd0] sm:$0xff]  }
 0xca5   : > { %v2547_v58 = vadd.f32 1e-06, %v2543_v54  ;;  %v7257_v54 = vld [vmem:[%s9402_s21 + $0x50] sm:$0xff]  }
 0xca6   : > { %v2538_v59 = vpop.xlane.xlu1 %2537 }
 0xca7   : > { %7476 = vrsqrt.f32 %v2547_v58  ;;  %v2544_v55 = vmul.f32 0.0078125, %v2538_v59  ;;  %v7258_v58 = vld [vmem:[%s9402_s21 + $0x90] sm:$0xff]  }
 0xca8   : > { %v7259_v59 = vld [vmem:[%s9402_s21 + $0x10] sm:$0xff]  }
 0xca9   : > { %v2548_v42 = vadd.f32 1e-06, %v2544_v55  ;;  %v7260_v55 = vld [vmem:[%s9402_s21 + $0xc8] sm:$0xff]  }
 0xcaa   : > { %v2542_v56 = vpop.xlane.xlu1 %2541  ;;  %v2540_v62 = vpop.xlane.xlu0 %2539 }
 0xcab   : > { %7478 = vrsqrt.f32 %v2548_v42  ;;  %v2546_v63 = vmul.f32 0.0078125, %v2542_v56  ;;  %v2545_v2 = vmul.f32 0.0078125, %v2540_v62  ;;  %v7261_v42 = vld [vmem:[%s9402_s21 + $0x48] sm:$0xff]  }
 0xcac   : > { %v7262_v56 = vld [vmem:[%s9402_s21 + $0x88] sm:$0xff]  }
 0xcad   : > { %v2550_v3 = vadd.f32 1e-06, %v2546_v63  ;;  %v2549_v1 = vadd.f32 1e-06, %v2545_v2  ;;  %v7263_v62 = vld [vmem:[%s9402_s21 + $0x8] sm:$0xff]   ;;  %v7264_v63 = vld [vmem:[%s9402_s21 + $0xc0] sm:$0xff]  }
 0xcae   : > { %v7265_v2 = vld [vmem:[%s9402_s21 + $0x40] sm:$0xff]  }
 0xcaf   : > { %7480 = vrsqrt.f32 %v2550_v3  ;;  %v7266_v3 = vld [vmem:[%s9402_s21 + $0x80] sm:$0xff]  }
 0xcb0   : > { %7482 = vrsqrt.f32 %v2549_v1  ;;  %v7267_v1 = vld [vmem:[%s9402_s21] sm:$0xff]  }
 0xcb4   : > { %v7477_v6 = vpop.eup %7476 }
 0xcb5   : > { %v2555_v7 = vmul.f32 %v7477_v6, %v8237_v5  ;;  %v8451_v6 = vld [vmem:[%s9392_s11 + $0x78] sm:$0xff]  }
 0xcb7   : > { %v2565_v18 = vmul.f32 %v6132_v8, %v2555_v7  ;;  %v8455_v7 = vsub.s32 0, %v7795_v9 }
 0xcb8   : > { %v7479_v14 = vpop.eup %7478 }
 0xcb9   : > { %v2556_v16 = vmul.f32 %v7479_v14, %v8242_v10  ;;  %v2575_v51 = vadd.f32 %v6133_v20, %v2565_v18  ;;  %v2613_v14 = vld [vmem:[%s9401_s20] sm:$0xf]  ;;  %v2629_v18 = vsub.s32 3, %v7795_v9 }
 0xcbb   : > { %v2566_v0 = vmul.f32 %v6132_v8, %v2556_v16  ;;  %v8462_v16 = vsub.s32 1, %v7795_v9 }
 0xcbc   : > { %v7481_v21 = vpop.eup %7480 }
 0xcbd   : > { %v7483_v52 = vpop.eup %7482  ;;  %v2576_v22 = vadd.f32 %v6133_v20, %v2566_v0  ;;  %v2558_v23 = vmul.f32 %v7481_v21, %v8245_v15  ;;  %v7236_v15 = vld [vmem:[%s9402_s21 + $0xf8] sm:$0xff]   ;;  %v8473_v21 = vrot.slane %v2613_v14, %v8462_v16 }
 0xcbe   : > { %v2557_v5 = vmul.f32 %v7483_v52, %v8250_v4  ;;  %6633 = vmatprep.subr.bf16.mxu1 %v7236_v15  ;;  %v7237_v4 = vld [vmem:[%s9402_s21 + $0x78] sm:$0xff]   ;;  %v8477_v52 = vrot.slane %v2613_v14, %v2629_v18 }
 0xcbf   : > { %v2579_v29 = vpack.c.bf16 %v2576_v22, %v2575_v51  ;;  %v2568_v33 = vmul.f32 %v6132_v8, %v2558_v23  ;;  %6605 = vmatprep.subr.bf16.mxu0 %v7237_v4 }
 0xcc0   : > { %v2567_v34 = vmul.f32 %v6132_v8, %v2557_v5  ;;  %v2625_v8 = vsub.s32 2, %v7795_v9 }
 0xcc1   : > { %2828 = vmatmul.mubr.bf16.vlgmr.msra.gmra.mxu0 %v2579_v29  ;;  %2881 = vmatmul.mubr.bf16.vlgmr.msra.gmra.mxu1 %v2579_v29  ;;  %v2578_v28 = vadd.f32 %v6133_v20, %v2568_v33 }
 0xcc2   : > { %2837 = vmatprep.mubr.bf16.mxu0 %v7636_v11  ;;  %2890 = vmatprep.mubr.bf16.mxu1 %v7636_v11  ;;  %v2577_v10 = vadd.f32 %v6133_v20, %v2567_v34  ;;  %v8466_v20 = vrot.slane %v2613_v14, %v8455_v7  ;;  %v8470_v0 = vrot.slane %v2613_v14, %v2625_v8 }
 0xcc3   : > { %6634 = vmatpush3.bf16.msra.mxu1 %v7238_v32  ;;  %6606 = vmatpush3.bf16.msra.mxu0 %v7239_v19 }
 0xcc4   : > { %v2580_v30 = vpack.c.bf16 %v2578_v28, %v2577_v10  ;;  %6635 = vmatprep.subr.bf16.mxu1 %v7240_v35  ;;  %6607 = vmatprep.subr.bf16.mxu0 %v7241_v43 }
 0xcc7   : > { %6636 = vmatpush3.bf16.msra.mxu1 %v7242_v44  ;;  %6608 = vmatpush3.bf16.msra.mxu0 %v7243_v37 }
 0xcc8   : > { %6637 = vmatprep.subr.bf16.mxu1 %v7244_v36  ;;  %6609 = vmatprep.subr.bf16.mxu0 %v7245_v46 }
 0xcc9   : > { %2838 = vmatmul.mubr.bf16.gmra.mxu0 %v2580_v30  ;;  %2891 = vmatmul.mubr.bf16.gmra.mxu1 %v2580_v30 }
 0xccb   : > { %6638 = vmatpush3.bf16.msra.mxu1 %v7246_v47  ;;  %6610 = vmatpush3.bf16.msra.mxu0 %v7247_v38 }
 0xccc   : > { %6639 = vmatprep.subr.bf16.mxu1 %v7248_v39  ;;  %6611 = vmatprep.subr.bf16.mxu0 %v7249_v27 }
 0xccf   : > { %6640 = vmatpush3.bf16.msra.mxu1 %v7250_v31  ;;  %6612 = vmatpush3.bf16.msra.mxu0 %v7251_v40 }
 0xcd0   : > { %6641 = vmatprep.subr.bf16.mxu1 %v7252_v41  ;;  %6613 = vmatprep.subr.bf16.mxu0 %v7253_v45 }
 0xcd3   : > { %6642 = vmatpush3.bf16.msra.mxu1 %v7254_v48  ;;  %6614 = vmatpush3.bf16.msra.mxu0 %v7255_v49 }
 0xcd4   : > { %6643 = vmatprep.subr.bf16.mxu1 %v7256_v50  ;;  %6615 = vmatprep.subr.bf16.mxu0 %v7257_v54 }
 0xcd7   : > { %6644 = vmatpush3.bf16.msra.mxu1 %v7258_v58  ;;  %6616 = vmatpush3.bf16.msra.mxu0 %v7259_v59 }
 0xcd8   : > { %6645 = vmatprep.subr.bf16.mxu1 %v7260_v55  ;;  %6617 = vmatprep.subr.bf16.mxu0 %v7261_v42 }
 0xcdb   : > { %6646 = vmatpush3.bf16.msra.mxu1 %v7262_v56  ;;  %6618 = vmatpush3.bf16.msra.mxu0 %v7263_v62 }
 0xcdc   : > { %6647 = vmatprep.subr.bf16.mxu1 %v7264_v63  ;;  %6619 = vmatprep.subr.bf16.mxu0 %v7265_v2 }
 0xcdf   : > { %6648 = vmatpush3.bf16.msra.mxu1 %v7266_v3  ;;  %6620 = vmatpush3.bf16.msra.mxu0 %v7267_v1 }
 0xce0   : > { %6987 = vmatprep.subr.bf16.mxu1 %v8451_v6 }
 0xd81   : > { %v2829_v51 = vpop.f32.mrf.mxu0  ;;  %v2882_v22 = vpop.f32.mrf.mxu1 }
 0xd82   : > { %v8480_v23 = vadd.f32 %v2829_v51, %v8466_v20  ;;  %v8483_v5 = vadd.f32 %v2882_v22, %v8470_v0 }
 0xd83   : > { %v2831_v29 = vpop.f32.mrf.mxu0  ;;  %v2884_v33 = vpop.f32.mrf.mxu1 }
 0xd84   : > { %v2901_v34 = vmul.f32 %v8480_v23, %v8480_v23  ;;  %v2903_v10 = vmul.f32 %v8483_v5, %v8483_v5  ;;  %v8490_v28 = vadd.f32 %v2831_v29, %v8473_v21  ;;  %v8493_v30 = vadd.f32 %v2884_v33, %v8477_v52 }
 0xd85   : > { %v2833_v15 = vpop.f32.mrf.mxu0  ;;  %v2886_v4 = vpop.f32.mrf.mxu1 }
 0xd86   : > { %v2917_v32 = vmul.f32 %v2901_v34, %v8480_v23  ;;  %v2919_v19 = vmul.f32 %v2903_v10, %v8483_v5  ;;  %v2902_v35 = vmul.f32 %v8490_v28, %v8490_v28  ;;  %v2904_v43 = vmul.f32 %v8493_v30, %v8493_v30 }
 0xd87   : > { %v8502_v44 = vadd.f32 %v2833_v15, %v8466_v20  ;;  %v8505_v37 = vadd.f32 %v2886_v4, %v8470_v0  ;;  %v2835_v36 = vpop.f32.mrf.mxu0  ;;  %v2888_v46 = vpop.f32.mrf.mxu1 }
 0xd88   : > { %v2933_v47 = vmul.f32 0.044715, %v2917_v32  ;;  %v2935_v38 = vmul.f32 0.044715, %v2919_v19  ;;  %v2918_v39 = vmul.f32 %v2902_v35, %v8490_v28  ;;  %v2920_v27 = vmul.f32 %v2904_v43, %v8493_v30 }
 0xd89   : > { %v2905_v31 = vmul.f32 %v8502_v44, %v8502_v44  ;;  %v2907_v40 = vmul.f32 %v8505_v37, %v8505_v37  ;;  %v8514_v41 = vadd.f32 %v2835_v36, %v8473_v21  ;;  %v8517_v45 = vadd.f32 %v2888_v46, %v8477_v52  ;;  %v2839_v48 = vpop.f32.mrf.mxu0  ;;  %v2892_v49 = vpop.f32.mrf.mxu1 }
 0xd8a   : > { %v2949_v50 = vadd.f32 %v2933_v47, %v8480_v23  ;;  %v2951_v54 = vadd.f32 %v2935_v38, %v8483_v5  ;;  %v2934_v58 = vmul.f32 0.044715, %v2918_v39  ;;  %v2936_v59 = vmul.f32 0.044715, %v2920_v27 }
 0xd8b   : > { %v2921_v55 = vmul.f32 %v2905_v31, %v8502_v44  ;;  %v2923_v42 = vmul.f32 %v2907_v40, %v8505_v37  ;;  %v2906_v56 = vmul.f32 %v8514_v41, %v8514_v41  ;;  %v2908_v62 = vmul.f32 %v8517_v45, %v8517_v45  ;;  %v2841_v14 = vpop.f32.mrf.mxu0  ;;  %v2894_v34 = vpop.f32.mrf.mxu1 }
 0xd8c   : > { %v2965_v63 = vmul.f32 0.7978846, %v2949_v50  ;;  %v2967_v2 = vmul.f32 0.7978846, %v2951_v54  ;;  %v2950_v3 = vadd.f32 %v2934_v58, %v8490_v28  ;;  %v2952_v1 = vadd.f32 %v2936_v59, %v8493_v30 }
 0xd8d   : > { %v2937_v51 = vmul.f32 0.044715, %v2921_v55  ;;  %v2939_v22 = vmul.f32 0.044715, %v2923_v42  ;;  %v2922_v29 = vmul.f32 %v2906_v56, %v8514_v41  ;;  %v2924_v33 = vmul.f32 %v2908_v62, %v8517_v45  ;;  %v2843_v47 = vpop.f32.mrf.mxu0  ;;  %v2896_v31 = vpop.f32.mrf.mxu1 }
 0xd8e   : > { %7484 = vtanh.f32 %v2965_v63  ;;  %v2966_v10 = vmul.f32 0.7978846, %v2950_v3  ;;  %v2968_v15 = vmul.f32 0.7978846, %v2952_v1  ;;  %v8532_v4 = vadd.f32 %v2839_v48, %v8466_v20 }
 0xd8f   : > { %7486 = vtanh.f32 %v2967_v2  ;;  %v2953_v32 = vadd.f32 %v2937_v51, %v8502_v44  ;;  %v2955_v19 = vadd.f32 %v2939_v22, %v8505_v37  ;;  %v2938_v35 = vmul.f32 0.044715, %v2922_v29  ;;  %v2845_v62 = vpop.f32.mrf.mxu0  ;;  %v2898_v1 = vpop.f32.mrf.mxu1 }
 0xd90   : > { %7488 = vtanh.f32 %v2966_v10  ;;  %v2940_v43 = vmul.f32 0.044715, %v2924_v33  ;;  %v2909_v36 = vmul.f32 %v8532_v4, %v8532_v4  ;;  %v8539_v46 = vadd.f32 %v2892_v49, %v8470_v0 }
 0xd91   : > { %7490 = vtanh.f32 %v2968_v15  ;;  %v2969_v38 = vmul.f32 0.7978846, %v2953_v32  ;;  %v2971_v39 = vmul.f32 0.7978846, %v2955_v19  ;;  %v2954_v27 = vadd.f32 %v2938_v35, %v8514_v41 }
 0xd92   : > { %v2956_v40 = vadd.f32 %v2940_v43, %v8517_v45  ;;  %v2925_v48 = vmul.f32 %v2909_v36, %v8532_v4  ;;  %v2911_v50 = vmul.f32 %v8539_v46, %v8539_v46  ;;  %v8547_v54 = vadd.f32 %v2841_v14, %v8473_v21 }
 0xd93   : > { %7492 = vtanh.f32 %v2969_v38  ;;  %v2970_v49 = vmul.f32 0.7978846, %v2954_v27  ;;  %v8550_v58 = vadd.f32 %v2894_v34, %v8477_v52  ;;  %v8553_v59 = vadd.f32 %v2843_v47, %v8466_v20 }
 0xd94   : > { %7494 = vtanh.f32 %v2971_v39  ;;  %v2972_v55 = vmul.f32 0.7978846, %v2956_v40  ;;  %v2941_v42 = vmul.f32 0.044715, %v2925_v48  ;;  %v2927_v56 = vmul.f32 %v2911_v50, %v8539_v46 }
 0xd95   : > { %7496 = vtanh.f32 %v2970_v49  ;;  %v2910_v63 = vmul.f32 %v8547_v54, %v8547_v54  ;;  %v2912_v2 = vmul.f32 %v8550_v58, %v8550_v58  ;;  %v2913_v3 = vmul.f32 %v8553_v59, %v8553_v59 }
 0xd96   : > { %7498 = vtanh.f32 %v2972_v55  ;;  %v2957_v20 = vadd.f32 %v2941_v42, %v8532_v4  ;;  %v2943_v14 = vmul.f32 0.044715, %v2927_v56  ;;  %v8564_v51 = vadd.f32 %v2896_v31, %v8470_v0 }
 0xd97   : > { %v2926_v22 = vmul.f32 %v2910_v63, %v8547_v54  ;;  %v2928_v29 = vmul.f32 %v2912_v2, %v8550_v58  ;;  %v2929_v33 = vmul.f32 %v2913_v3, %v8553_v59  ;;  %v8570_v34 = vadd.f32 %v2845_v62, %v8473_v21 }
 0xd98   : > { %v2973_v10 = vmul.f32 0.7978846, %v2957_v20  ;;  %v2959_v15 = vadd.f32 %v2943_v14, %v8539_v46  ;;  %v2915_v32 = vmul.f32 %v8564_v51, %v8564_v51  ;;  %v8576_v19 = vadd.f32 %v2898_v1, %v8477_v52 }
 0xd99   : > { %v2942_v0 = vmul.f32 0.044715, %v2926_v22  ;;  %v2944_v35 = vmul.f32 0.044715, %v2928_v29  ;;  %v2945_v43 = vmul.f32 0.044715, %v2929_v33  ;;  %v2914_v36 = vmul.f32 %v8570_v34, %v8570_v34 }
 0xd9a   : > { %v2975_v47 = vmul.f32 0.7978846, %v2959_v15  ;;  %v2931_v38 = vmul.f32 %v2915_v32, %v8564_v51  ;;  %v2916_v21 = vmul.f32 %v8576_v19, %v8576_v19  ;;  %7500 = vtanh.f32 %v2973_v10 }
 0xd9b   : > { %v7485_v39 = vpop.eup %7484  ;;  %v2958_v27 = vadd.f32 %v2942_v0, %v8547_v54  ;;  %v2960_v31 = vadd.f32 %v2944_v35, %v8550_v58  ;;  %v2961_v52 = vadd.f32 %v2945_v43, %v8553_v59  ;;  %v2930_v40 = vmul.f32 %v2914_v36, %v8570_v34 }
 0xd9c   : > { %v7487_v48 = vpop.eup %7486  ;;  %v2947_v50 = vmul.f32 0.044715, %v2931_v38  ;;  %v2932_v49 = vmul.f32 %v2916_v21, %v8576_v19  ;;  %7502 = vtanh.f32 %v2975_v47  ;;  %v2997_v22 = vadd.f32 1.0, %v7485_v39 }
 0xd9d   : > { %v7489_v55 = vpop.eup %7488  ;;  %v2974_v42 = vmul.f32 0.7978846, %v2958_v27  ;;  %v2976_v56 = vmul.f32 0.7978846, %v2960_v31  ;;  %v2977_v63 = vmul.f32 0.7978846, %v2961_v52 }
 0xd9e   : > { %v7491_v62 = vpop.eup %7490  ;;  %v2963_v2 = vadd.f32 %v2947_v50, %v8564_v51  ;;  %v2946_v3 = vmul.f32 0.044715, %v2930_v40  ;;  %v2948_v1 = vmul.f32 0.044715, %v2932_v49  ;;  %v2998_v20 = vadd.f32 1.0, %v7489_v55 }
 0xd9f   : > { %7504 = vtanh.f32 %v2974_v42  ;;  %v2999_v32 = vadd.f32 1.0, %v7487_v48  ;;  %v3000_v39 = vadd.f32 1.0, %v7491_v62  ;;  %v3013_v52 = vmul.f32 0.5, %v2997_v22 }
 0xda0   : > { %v7493_v14 = vpop.eup %7492  ;;  %7506 = vtanh.f32 %v2976_v56  ;;  %v2979_v29 = vmul.f32 0.7978846, %v2963_v2  ;;  %v2962_v33 = vadd.f32 %v2946_v3, %v8570_v34  ;;  %v2964_v0 = vadd.f32 %v2948_v1, %v8576_v19 }
 0xda1   : > { %v7495_v15 = vpop.eup %7494  ;;  %v3001_v10 = vadd.f32 1.0, %v7493_v14  ;;  %7508 = vtanh.f32 %v2977_v63  ;;  %v3014_v47 = vmul.f32 0.5, %v2998_v20  ;;  %v3015_v49 = vmul.f32 0.5, %v2999_v32 }
 0xda2   : > { %v7497_v35 = vpop.eup %7496  ;;  %v3003_v43 = vadd.f32 1.0, %v7495_v15  ;;  %7510 = vtanh.f32 %v2979_v29  ;;  %v2978_v36 = vmul.f32 0.7978846, %v2962_v33  ;;  %v2980_v27 = vmul.f32 0.7978846, %v2964_v0 }
 0xda3   : > { %v7499_v38 = vpop.eup %7498  ;;  %v3017_v21 = vmul.f32 0.5, %v3001_v10  ;;  %v3002_v31 = vadd.f32 1.0, %v7497_v35  ;;  %v3016_v55 = vmul.f32 0.5, %v3000_v39  ;;  %v3030_v2 = vmul.f32 %v3014_v47, %v8490_v28  ;;  %v7269_v28 = vld [vmem:[%s9392_s11 + $0x70] sm:$0xff]   ;;  %v7270_v10 = vld [vmem:[%s9392_s11 + $0x68] sm:$0xff]  }
 0xda4   : > { %v3019_v40 = vmul.f32 0.5, %v3003_v43  ;;  %7512 = vtanh.f32 %v2978_v36  ;;  %v3004_v50 = vadd.f32 1.0, %v7499_v38  ;;  %v3029_v1 = vmul.f32 %v3013_v52, %v8480_v23 }
 0xda5   : > { %7514 = vtanh.f32 %v2980_v27  ;;  %v3018_v48 = vmul.f32 0.5, %v3002_v31  ;;  %v3033_v42 = vmul.f32 %v3017_v21, %v8502_v44  ;;  %v3032_v62 = vmul.f32 %v3016_v55, %v8493_v30 }
 0xda6   : > { %v3020_v56 = vmul.f32 0.5, %v3004_v50  ;;  %v3035_v63 = vmul.f32 %v3019_v40, %v8505_v37  ;;  %v3031_v14 = vmul.f32 %v3015_v49, %v8483_v5  ;;  %v7271_v50 = vld [vmem:[%s9392_s11 + $0x60] sm:$0xff]  }
 0xda7   : > { %v3034_v3 = vmul.f32 %v3018_v48, %v8514_v41  ;;  %v7501_v29 = vpop.eup %7500  ;;  %v3045_v33 = vpack.c.bf16 %v3033_v42, %v3029_v1 }
 0xda8   : > { %v3036_v20 = vmul.f32 %v3020_v56, %v8517_v45  ;;  %v3047_v32 = vpack.c.bf16 %v3035_v63, %v3031_v14  ;;  %v3005_v0 = vadd.f32 1.0, %v7501_v29 }
 0xda9   : > { %v3046_v22 = vpack.c.bf16 %v3034_v3, %v3030_v2  ;;  %v7503_v44 = vpop.eup %7502 }
 0xdaa   : > { %v3048_v15 = vpack.c.bf16 %v3036_v20, %v3032_v62  ;;  %v3007_v43 = vadd.f32 1.0, %v7503_v44  ;;  %v3021_v40 = vmul.f32 0.5, %v3005_v0 }
 0xdab   : > { %3341 = vmatprep.mubr.bf16.mxu0 %v3046_v22 }
 0xdac   : > { %v7505_v37 = vpop.eup %7504  ;;  %3390 = vmatprep.mubr.bf16.mxu1 %v3048_v15  ;;  %3342 = vmatmul.mubr.bf16.vlgmr.msra.gmra.mxu0 %v3045_v33  ;;  %v3023_v48 = vmul.f32 0.5, %v3007_v43  ;;  %v3037_v62 = vmul.f32 %v3021_v40, %v8532_v4  ;;  %v7274_v4 = vld [vmem:[%s9392_s11 + $0x48] sm:$0xff]  }
 0xdad   : > { %v7507_v23 = vpop.eup %7506  ;;  %3391 = vmatmul.mubr.bf16.vlgmr.msra.gmra.mxu1 %v3047_v32  ;;  %v3006_v5 = vadd.f32 1.0, %v7505_v37 }
 0xdae   : > { %v7509_v30 = vpop.eup %7508  ;;  %6988 = vmatpush3.bf16.msra.mxu1 %v8451_v6  ;;  %v3008_v45 = vadd.f32 1.0, %v7507_v23  ;;  %v3039_v14 = vmul.f32 %v3023_v48, %v8539_v46  ;;  %v7275_v46 = vld [vmem:[%s9392_s11 + $0x40] sm:$0xff]  }
 0xdaf   : > { %v7511_v41 = vpop.eup %7510  ;;  %6989 = vmatprep.subr.bf16.mxu1 %v7269_v28  ;;  %v3009_v35 = vadd.f32 1.0, %v7509_v30  ;;  %v3022_v31 = vmul.f32 0.5, %v3006_v5 }
 0xdb0   : > { %v3011_v36 = vadd.f32 1.0, %v7511_v41  ;;  %v3024_v52 = vmul.f32 0.5, %v3008_v45  ;;  %v6198_v41 = vld [vmem:[%s9403_s22] ss:$0 sm:$0xff] }
 0xdb1   : > { %v7513_v47 = vpop.eup %7512  ;;  %v3025_v38 = vmul.f32 0.5, %v3009_v35  ;;  %v3038_v56 = vmul.f32 %v3022_v31, %v8547_v54 }
 0xdb2   : > { %v7515_v21 = vpop.eup %7514  ;;  %6990 = vmatpush3.bf16.msra.mxu1 %v7269_v28  ;;  %v3010_v27 = vadd.f32 1.0, %v7513_v47  ;;  %v3027_v39 = vmul.f32 0.5, %v3011_v36  ;;  %v3040_v3 = vmul.f32 %v3024_v52, %v8550_v58  ;;  %v7273_v58 = vld [vmem:[%s9392_s11 + $0x50] sm:$0xff]  }
 0xdb3   : > { %v3012_v6 = vadd.f32 1.0, %v7515_v21  ;;  %6991 = vmatprep.subr.bf16.mxu1 %v7270_v10  ;;  %v3041_v42 = vmul.f32 %v3025_v38, %v8553_v59  ;;  %v7272_v59 = vld [vmem:[%s9392_s11 + $0x58] sm:$0xff]  }
 0xdb4   : > { %v3026_v49 = vmul.f32 0.5, %v3010_v27  ;;  %v3043_v2 = vmul.f32 %v3027_v39, %v8564_v51 }
 0xdb5   : > { %v3028_v55 = vmul.f32 0.5, %v3012_v6  ;;  %v3049_v22 = vpack.c.bf16 %v3041_v42, %v3037_v62 }
 0xdb6   : > { %v3042_v63 = vmul.f32 %v3026_v49, %v8570_v34  ;;  %6992 = vmatpush3.bf16.msra.mxu1 %v7270_v10  ;;  %v3051_v34 = vpack.c.bf16 %v3043_v2, %v3039_v14 }
 0xdb7   : > { %v3044_v1 = vmul.f32 %v3028_v55, %v8576_v19  ;;  %6993 = vmatprep.subr.bf16.mxu1 %v7271_v50 }
 0xdb8   : > { %v3050_v20 = vpack.c.bf16 %v3042_v63, %v3038_v56 }
 0xdb9   : > { %v3052_v54 = vpack.c.bf16 %v3044_v1, %v3040_v3  ;;  %v6246_v3 = vld [vmem:[%s9393_s12 + $0x1] ss:$0 sm:$0xff] }
 0xdba   : > { %3349 = vmatprep.mubr.bf16.mxu0 %v3050_v20  ;;  %6994 = vmatpush3.bf16.msra.mxu1 %v7271_v50 }
 0xdbb   : > { %3398 = vmatprep.mubr.bf16.mxu1 %v3052_v54  ;;  %3350 = vmatmul.mubr.bf16.gmra.mxu0 %v3049_v22 }
 0xdbc   : > { %3399 = vmatmul.mubr.bf16.gmra.mxu1 %v3051_v34  ;;  %6995 = vmatprep.subr.bf16.mxu1 %v7272_v59 }
 0xdbd   : > { %7003 = vmatprep.mubr.bf16.mxu1 %v7892_v13 }
 0xdbe   : > { %6996 = vmatpush3.bf16.msra.mxu1 %v7272_v59 }
 0xdbf   : > { %6997 = vmatprep.subr.bf16.mxu1 %v7273_v58 }
 0xdc2   : > { %6998 = vmatpush3.bf16.msra.mxu1 %v7273_v58 }
 0xdc3   : > { %6999 = vmatprep.subr.bf16.mxu1 %v7274_v4 }
 0xdc6   : > { %7000 = vmatpush3.bf16.msra.mxu1 %v7274_v4 }
 0xdc7   : > { %7001 = vmatprep.subr.bf16.mxu1 %v7275_v46 }
 0xdca   : > { %7002 = vmatpush3.bf16.msra.mxu1 %v7275_v46 }
 0xdcd   : > { %7004 = vmatmul.mubr.bf16.vlgmr.msra.gmra.mxu1 %v7890_v12 }
 0xe6c   : > { %v6621_v51 = vpop.f32.mrf.mxu0 }
 0xe6d   : > { %v6649_v19 = vpop.f32.mrf.mxu1 }
 0xe6e   : > { %v6622_v29 = vpop.f32.mrf.mxu0 }
 0xe6f   : > { %v6623_v33 = vadd.f32 %v6622_v29, %v6621_v51  ;;  %v6650_v15 = vpop.f32.mrf.mxu1 }
 0xe70   : > { %v6651_v44 = vadd.f32 %v6650_v15, %v6649_v19  ;;  %v6624_v32 = vpop.f32.mrf.mxu0 }
 0xe71   : > { %v6652_v28 = vpop.f32.mrf.mxu1 }
 0xe72   : > { %v3393_v37 = vadd.f32 %v6651_v44, %v6623_v33  ;;  %v6625_v23 = vpop.f32.mrf.mxu0 }
 0xe73   : > { %v6626_v30 = vadd.f32 %v6625_v23, %v6624_v32  ;;  %v6653_v5 = vpop.f32.mrf.mxu1 }
 0xe74   : > { %v3407_v45 = vadd.f32 %v3393_v37, %v8210_v57  ;;  %v6654_v10 = vadd.f32 %v6653_v5, %v6652_v28 }
 0xe76   : > { %v3396_v0 = vadd.f32 %v6654_v10, %v6626_v30  ;;  %v8635_v35 = vadd.f32 %v6198_v41, %v3407_v45  ;;  %v7276_v10 = vld [vmem:[%s9445_s9 + $0x78] sm:$0xff]  }
 0xe77   : > { %6967 = vmatprep.subr.bf16.mxu0 %v7276_v10 }
 0xe78   : > { %v3408_v43 = vadd.f32 %v3396_v0, %v8217_v53  ;;  %3426 = vadd.xlane.f32.xlu0 %v8635_v35  ;;  %6968 = vmatpush3.bf16.msra.mxu0 %v7276_v10  ;;  %v7277_v0 = vld [vmem:[%s9445_s9 + $0x70] sm:$0xff]   ;;  %v7291_v10 = vld [vmem:[%s9394_s13 + $0x40] sm:$0xff]  }
 0xe79   : > { %6969 = vmatprep.subr.bf16.mxu0 %v7277_v0 }
 0xe7a   : > { %v8639_v36 = vadd.f32 %v6198_v41, %v3408_v43  ;;  %v7278_v43 = vld [vmem:[%s9445_s9 + $0x68] sm:$0xff]  }
 0xe7b   : > { %v6627_v47 = vpop.f32.mrf.mxu0 }
 0xe7c   : > { %v6655_v38 = vpop.f32.mrf.mxu1  ;;  %3428 = vadd.xlane.f32.xlu1 %v8639_v36  ;;  %6970 = vmatpush3.bf16.msra.mxu0 %v7277_v0 }
 0xe7d   : > { %v6628_v21 = vpop.f32.mrf.mxu0  ;;  %6971 = vmatprep.subr.bf16.mxu0 %v7278_v43 }
 0xe7e   : > { %v6629_v27 = vadd.f32 %v6628_v21, %v6627_v47  ;;  %v6656_v31 = vpop.f32.mrf.mxu1  ;;  %v7279_v47 = vld [vmem:[%s9445_s9 + $0x60] sm:$0xff]   ;;  %v7281_v21 = vld [vmem:[%s9445_s9 + $0x50] sm:$0xff]  }
 0xe7f   : > { %v6657_v39 = vadd.f32 %v6656_v31, %v6655_v38  ;;  %v6630_v6 = vpop.f32.mrf.mxu0  ;;  %v7280_v38 = vld [vmem:[%s9445_s9 + $0x58] sm:$0xff]   ;;  %v7283_v31 = vld [vmem:[%s9445_s9 + $0x40] sm:$0xff]  }
 0xe80   : > { %v6658_v57 = vpop.f32.mrf.mxu1  ;;  %6972 = vmatpush3.bf16.msra.mxu0 %v7278_v43 }
 0xe81   : > { %v3401_v52 = vadd.f32 %v6657_v39, %v6629_v27  ;;  %v6631_v40 = vpop.f32.mrf.mxu0  ;;  %6973 = vmatprep.subr.bf16.mxu0 %v7279_v47  ;;  %v7282_v27 = vld [vmem:[%s9445_s9 + $0x48] sm:$0xff]   ;;  %v7284_v39 = vld [vmem:[%s9394_s13 + $0x78] sm:$0xff]  }
 0xe82   : > { %v6632_v50 = vadd.f32 %v6631_v40, %v6630_v6  ;;  %v6659_v49 = vpop.f32.mrf.mxu1 }
 0xe83   : > { %v3409_v53 = vadd.f32 %v3401_v52, %v8221_v61  ;;  %v6660_v48 = vadd.f32 %v6659_v49, %v6658_v57 }
 0xe84   : > { %6974 = vmatpush3.bf16.msra.mxu0 %v7279_v47 }
 0xe85   : > { %v3404_v55 = vadd.f32 %v6660_v48, %v6632_v50  ;;  %v8643_v42 = vadd.f32 %v6198_v41, %v3409_v53  ;;  %6975 = vmatprep.subr.bf16.mxu0 %v7280_v38 }
 0xe87   : > { %v3410_v56 = vadd.f32 %v3404_v55, %v8215_v60  ;;  %3430 = vadd.xlane.f32.xlu0 %v8643_v42 }
 0xe88   : > { %6976 = vmatpush3.bf16.msra.mxu0 %v7280_v38  ;;  %v6220_v38 = vld [vmem:[%s9391_s10 + $0x1] ss:$0 sm:$0xff] }
 0xe89   : > { %v8647_v63 = vadd.f32 %v6198_v41, %v3410_v56  ;;  %6977 = vmatprep.subr.bf16.mxu0 %v7281_v21 }
 0xe8b   : > { %3432 = vadd.xlane.f32.xlu1 %v8647_v63 }
 0xe8c   : > { %6978 = vmatpush3.bf16.msra.mxu0 %v7281_v21 }
 0xe8d   : > { %v7005_v2 = vpop.f32.mrf.mxu1  ;;  %6979 = vmatprep.subr.bf16.mxu0 %v7282_v27 }
 0xe8e   : > { %v3730_v61 = vadd.f32 %v7005_v2, %v6246_v3 }
 0xe8f   : > { %v3721_v1 = vpop.f32.mrf.mxu1 }
 0xe90   : > { %v3722_v59 = vadd.f32 %v6246_v3, %v3721_v1  ;;  %6980 = vmatpush3.bf16.msra.mxu0 %v7282_v27 }
 0xe91   : > { %v7006_v62 = vpop.f32.mrf.mxu1  ;;  %6981 = vmatprep.subr.bf16.mxu0 %v7283_v31 }
 0xe92   : > { %v3733_v20 = vadd.f32 %v7006_v62, %v6246_v3  ;;  %v6201_v62 = vld [vmem:[%s9446_s30 + $0x1] ss:$0 sm:$0xff] }
 0xe93   : > { %v3724_v14 = vpop.f32.mrf.mxu1 }
 0xe94   : > { %v8653_v54 = vpack.c.bf16 %v3733_v20, %v3730_v61  ;;  %v3725_v60 = vadd.f32 %v6246_v3, %v3724_v14  ;;  %6982 = vmatpush3.bf16.msra.mxu0 %v7283_v31 }
 0xe95   : > { %7007 = vmatprep.subr.bf16.mxu0 %v7284_v39 }
 0xe96   : > { %v8655_v22 = vpack.c.bf16 %v3725_v60, %v3722_v59  ;;  %7131 = vmatprep.subr.msk.bf16.mxu1 %vm881_vm0, %v8653_v54  ;;  %v3891_v34 = vsel %vm881_vm0, %v8653_v54, 0  ;;  %v6202_v60 = vld [vmem:[%s9447_s8 + $0x1] ss:$0 sm:$0xff] }
 0xe97   : > { %7028 = vmatpush3.bf16.xpose.msra.mxu1 %v3891_v34 }
 0xe98   : > { %7132 = vmatprep.subr.msk.bf16.mxu1 %vm881_vm0, %v8655_v22  ;;  %v3888_v58 = vsel %vm881_vm0, %v8655_v22, 0 }
 0xe9f   : > { %7030 = vmatpush3.bf16.xpose.msra.mxu1 %v3888_v58 }
 0xf01   : > { %v3427_v4 = vpop.xlane.xlu0 %3426 }
 0xf02   : > { %v3434_v46 = vmul.f32 0.0078125, %v3427_v4 }
 0xf04   : > { %v3438_v51 = vsub.f32 %v8635_v35, %v3434_v46 }
 0xf05   : > { %v3429_v19 = vpop.xlane.xlu1 %3428 }
 0xf06   : > { %v3435_v29 = vmul.f32 0.0078125, %v3429_v19  ;;  %v3442_v33 = vmul.f32 %v3438_v51, %v3438_v51 }
 0xf08   : > { %v3439_v15 = vsub.f32 %v8639_v36, %v3435_v29  ;;  %3446 = vadd.xlane.f32.xlu0 %v3442_v33 }
 0xf0a   : > { %v3443_v44 = vmul.f32 %v3439_v15, %v3439_v15 }
 0xf0c   : > { %3448 = vadd.xlane.f32.xlu1 %v3443_v44 }
 0xf10   : > { %v3431_v32 = vpop.xlane.xlu0 %3430 }
 0xf11   : > { %v3436_v28 = vmul.f32 0.0078125, %v3431_v32 }
 0xf13   : > { %v8668_v37 = vsub.f32 %v8643_v42, %v3436_v28 }
 0xf14   : > { %v3433_v23 = vpop.xlane.xlu1 %3432 }
 0xf15   : > { %v3437_v30 = vmul.f32 0.0078125, %v3433_v23  ;;  %v3444_v5 = vmul.f32 %v8668_v37, %v8668_v37 }
 0xf17   : > { %v3441_v41 = vsub.f32 %v8647_v63, %v3437_v30  ;;  %3450 = vadd.xlane.f32.xlu0 %v3444_v5  ;;  %v7285_v30 = vld [vmem:[%s9394_s13 + $0x70] sm:$0xff]   ;;  %v7287_v5 = vld [vmem:[%s9394_s13 + $0x60] sm:$0xff]  }
 0xf19   : > { %v3445_v45 = vmul.f32 %v3441_v41, %v3441_v41 }
 0xf1b   : > { %3452 = vadd.xlane.f32.xlu1 %v3445_v45  ;;  %v7290_v45 = vld [vmem:[%s9394_s13 + $0x48] sm:$0xff]  }
 0xf91   : > { %v3447_v6 = vpop.xlane.xlu0 %3446 }
 0xf92   : > { %v3454_v57 = vmul.f32 0.0078125, %v3447_v6 }
 0xf94   : > { %v3458_v52 = vadd.f32 1e-06, %v3454_v57 }
 0xf95   : > { %v3449_v40 = vpop.xlane.xlu1 %3448 }
 0xf96   : > { %7516 = vrsqrt.f32 %v3458_v52  ;;  %v3455_v50 = vmul.f32 0.0078125, %v3449_v40  ;;  %v6272_v40 = vld [vmem:[%s9395_s14 + $0x1] ss:$0 sm:$0xff] }
 0xf98   : > { %v3459_v49 = vadd.f32 1e-06, %v3455_v50 }
 0xf9a   : > { %7518 = vrsqrt.f32 %v3459_v49 }
 0xfa0   : > { %v3451_v53 = vpop.xlane.xlu0 %3450 }
 0xfa1   : > { %v3456_v48 = vmul.f32 0.0078125, %v3451_v53 }
 0xfa3   : > { %v7517_v55 = vpop.eup %7516  ;;  %v3460_v56 = vadd.f32 1e-06, %v3456_v48 }
 0xfa4   : > { %v3453_v2 = vpop.xlane.xlu1 %3452  ;;  %v3466_v3 = vmul.f32 %v7517_v55, %v3438_v51 }
 0xfa5   : > { %7520 = vrsqrt.f32 %v3460_v56  ;;  %v3457_v1 = vmul.f32 0.0078125, %v3453_v2 }
 0xfa6   : > { %v3476_v59 = vmul.f32 %v6201_v62, %v3466_v3 }
 0xfa7   : > { %v7519_v61 = vpop.eup %7518  ;;  %v3461_v20 = vadd.f32 1e-06, %v3457_v1 }
 0xfa8   : > { %v3467_v14 = vmul.f32 %v7519_v61, %v3439_v15  ;;  %v3486_v58 = vadd.f32 %v6202_v60, %v3476_v59 }
 0xfa9   : > { %7522 = vrsqrt.f32 %v3461_v20 }
 0xfaa   : > { %v3477_v34 = vmul.f32 %v6201_v62, %v3467_v14 }
 0xfac   : > { %v3487_v4 = vadd.f32 %v6202_v60, %v3477_v34 }
 0xfae   : > { %v3490_v46 = vpack.c.bf16 %v3487_v4, %v3486_v58 }
 0xfb0   : > { %6983 = vmatprep.mubr.bf16.mxu0 %v3490_v46 }
 0xfb2   : > { %v7521_v51 = vpop.eup %7520 }
 0xfb3   : > { %v3468_v19 = vmul.f32 %v7521_v51, %v8668_v37  ;;  %v7286_v37 = vld [vmem:[%s9394_s13 + $0x68] sm:$0xff]  }
 0xfb5   : > { %v3478_v44 = vmul.f32 %v6201_v62, %v3468_v19 }
 0xfb6   : > { %v7523_v29 = vpop.eup %7522 }
 0xfb7   : > { %v3469_v33 = vmul.f32 %v7523_v29, %v3441_v41  ;;  %v3488_v28 = vadd.f32 %v6202_v60, %v3478_v44  ;;  %v7288_v41 = vld [vmem:[%s9394_s13 + $0x58] sm:$0xff]  }
 0xfb9   : > { %v3479_v32 = vmul.f32 %v6201_v62, %v3469_v33 }
 0xfbb   : > { %v3489_v15 = vadd.f32 %v6202_v60, %v3479_v32 }
 0xfbd   : > { %v3491_v23 = vpack.c.bf16 %v3489_v15, %v3488_v28 }
 0xfbf   : > { %6984 = vmatmul.mubr.bf16.vlgmr.msra.gmra.mxu0 %v3491_v23 }
 0xfc0   : > { %7008 = vmatpush3.bf16.msra.mxu0 %v7284_v39  ;;  %7023 = vmatprep.mubr.bf16.mxu0 %v7892_v13  ;;  %v7289_v13 = vld [vmem:[%s9394_s13 + $0x50] sm:$0xff]  }
 0xfc1   : > { %7009 = vmatprep.subr.bf16.mxu0 %v7285_v30 }
 0xfc4   : > { %7010 = vmatpush3.bf16.msra.mxu0 %v7285_v30 }
 0xfc5   : > { %7011 = vmatprep.subr.bf16.mxu0 %v7286_v37 }
 0xfc8   : > { %7012 = vmatpush3.bf16.msra.mxu0 %v7286_v37 }
 0xfc9   : > { %7013 = vmatprep.subr.bf16.mxu0 %v7287_v5 }
 0xfcc   : > { %7014 = vmatpush3.bf16.msra.mxu0 %v7287_v5 }
 0xfcd   : > { %7015 = vmatprep.subr.bf16.mxu0 %v7288_v41 }
 0xfd0   : > { %7016 = vmatpush3.bf16.msra.mxu0 %v7288_v41 }
 0xfd1   : > { %7017 = vmatprep.subr.bf16.mxu0 %v7289_v13 }
 0xfd4   : > { %7018 = vmatpush3.bf16.msra.mxu0 %v7289_v13 }
 0xfd5   : > { %7019 = vmatprep.subr.bf16.mxu0 %v7290_v45 }
 0xfd8   : > { %7020 = vmatpush3.bf16.msra.mxu0 %v7290_v45 }
 0xfd9   : > { %7021 = vmatprep.subr.bf16.mxu0 %v7291_v10 }
 0xfdc   : > { %7022 = vmatpush3.bf16.msra.mxu0 %v7291_v10 }
 0xfdf   : > { %7024 = vmatmul.mubr.bf16.vlgmr.msra.gmra.mxu0 %v7890_v12 }
0x107f   : > { %v6985_v0 = vpop.f32.mrf.mxu0 }
0x1080   : > { %v3608_v6 = vadd.f32 %v6985_v0, %v6220_v38 }
0x1081   : > { %v3599_v43 = vpop.f32.mrf.mxu0 }
0x1082   : > { %v3600_v31 = vadd.f32 %v6220_v38, %v3599_v43 }
0x1083   : > { %v6986_v47 = vpop.f32.mrf.mxu0 }
0x1084   : > { %v3611_v21 = vadd.f32 %v6986_v47, %v6220_v38 }
0x1085   : > { %v3602_v27 = vpop.f32.mrf.mxu0 }
0x1086   : > { %v3603_v39 = vadd.f32 %v6220_v38, %v3602_v27  ;;  %v8735_v52 = vpack.c.bf16 %v3611_v21, %v3608_v6 }
0x1088   : > { %v8733_v57 = vpack.c.bf16 %v3603_v39, %v3600_v31 }
0x108a   : > { %7031 = vmatprep.mubr.msk.bf16.mxu1 %vm881_vm0, %v8733_v57 }
0x108b   : > { %7032 = vmatmul.mubr.msk.bf16.vlgmr.msra.gmra.mxu1 %vm881_vm0, %v8735_v52 }
0x109f   : > { %v7025_v12 = vpop.f32.mrf.mxu0 }
0x10a0   : > { %v3852_v53 = vadd.f32 %v7025_v12, %v6272_v40 }
0x10a1   : > { %v3843_v50 = vpop.f32.mrf.mxu0 }
0x10a2   : > { %v3844_v56 = vadd.f32 %v6272_v40, %v3843_v50 }
0x10a3   : > { %v7026_v49 = vpop.f32.mrf.mxu0 }
0x10a4   : > { %v3855_v48 = vadd.f32 %v7026_v49, %v6272_v40 }
0x10a5   : > { %v3846_v55 = vpop.f32.mrf.mxu0 }
0x10a6   : > { %v8744_v2 = vpack.c.bf16 %v3855_v48, %v3852_v53  ;;  %v3847_v3 = vadd.f32 %v6272_v40, %v3846_v55 }
0x10a8   : > { %v8746_v1 = vpack.c.bf16 %v3847_v3, %v3844_v56  ;;  %7035 = vmatprep.subr.bf16.mxu1 %v8744_v2 }
0x10a9   : > { %7036 = vmatpush3.bf16.msra.mxu1 %v8744_v2 }
0x10aa   : > { %7037 = vmatprep.subr.bf16.mxu1 %v8746_v1 }
0x10ad   : > { %7038 = vmatpush3.bf16.msra.mxu1 %v8746_v1 }
0x114b   : > { %v7033_v62 = vpop.f32.mrf.mxu1 }
0x114c   : > { %v3944_v60 = vsel %vm6057_vm12, %v7033_v62, -1e+30 }
0x114d   : > { %v3927_v61 = vpop.f32.mrf.mxu1  ;;  %v3952_v4 = vsel %vm881_vm0, %v3944_v60, -inf }
0x114e   : > { %v3942_v20 = vsel %vm7812_vm8, %v3927_v61, -1e+30 }
0x114f   : > { %v7034_v14 = vpop.f32.mrf.mxu1  ;;  %v3946_v59 = vsel %vm881_vm0, %v3942_v20, -inf }
0x1150   : > { %3947 = vmax.xlane.f32.xlu0 %v3946_v59  ;;  %v3945_v51 = vsel %vm7817_vm9, %v7034_v14, -1e+30 }
0x1151   : > { %v3930_v34 = vpop.f32.mrf.mxu1  ;;  %v3955_v19 = vsel %vm881_vm0, %v3945_v51, -inf }
0x1152   : > { %v3943_v58 = vsel %vm8020_vm13, %v3930_v34, -1e+30 }
0x1153   : > { %v3949_v46 = vsel %vm881_vm0, %v3943_v58, -inf }
0x1154   : > { %3953 = vmax.xlane.f32.xlu0 %v3952_v4  ;;  %3950 = vmax.xlane.f32.xlu1 %v3949_v46  ;;  %v7292_v4 = vld [vmem:[%s9396_s15 + $0x48] sm:$0xff]   ;;  %v7293_v46 = vld [vmem:[%s9396_s15 + $0x40] sm:$0xff]  }
0x1158   : > { %3956 = vmax.xlane.f32.xlu1 %v3955_v19 }
0x11d9   : > { %v3948_v29 = vpop.xlane.xlu0 %3947 }
0x11da   : > { %v3958_v33 = vsub.f32 %v3942_v20, %v3948_v29 }
0x11dc   : > { %v3962_v23 = vmul.f32 1.442695, %v3958_v33 }
0x11dd   : > { %v3954_v44 = vpop.xlane.xlu0 %3953  ;;  %v3951_v32 = vpop.xlane.xlu1 %3950 }
0x11de   : > { %v3960_v28 = vsub.f32 %v3944_v60, %v3954_v44  ;;  %v3959_v15 = vsub.f32 %v3943_v58, %v3951_v32 }
0x11e0   : > { %v3966_v30 = vmul.f32 1.442695, %v3960_v28  ;;  %v3964_v37 = vmul.f32 1.442695, %v3959_v15 }
0x11e1   : > { %v3957_v5 = vpop.xlane.xlu1 %3956 }
0x11e2   : > { %7524 = vpow2.f32 %v3966_v30  ;;  %v3961_v41 = vsub.f32 %v3945_v51, %v3957_v5 }
0x11e3   : > { %7526 = vpow2.f32 %v3964_v37 }
0x11e4   : > { %7528 = vpow2.f32 %v3962_v23  ;;  %v3968_v13 = vmul.f32 1.442695, %v3961_v41 }
0x11e6   : > { %7530 = vpow2.f32 %v3968_v13 }
0x11ef   : > { %v7525_v45 = vpop.eup %7524 }
0x11f0   : > { %v7527_v10 = vpop.eup %7526  ;;  %v3976_v0 = vsel %vm881_vm0, %v7525_v45, 0.0 }
0x11f1   : > { %v7529_v43 = vpop.eup %7528  ;;  %3977 = vadd.xlane.f32.xlu0 %v3976_v0  ;;  %v3973_v47 = vsel %vm881_vm0, %v7527_v10, 0.0 }
0x11f2   : > { %3974 = vadd.xlane.f32.xlu1 %v3973_v47  ;;  %v3970_v21 = vsel %vm881_vm0, %v7529_v43, 0.0 }
0x11f3   : > { %v7531_v38 = vpop.eup %7530 }
0x11f4   : > { %v3979_v27 = vsel %vm881_vm0, %v7531_v38, 0.0 }
0x11f5   : > { %3971 = vadd.xlane.f32.xlu0 %v3970_v21 }
0x11f6   : > { %3980 = vadd.xlane.f32.xlu1 %v3979_v27 }
0x1207   : > { %4057 = vrot.lane.b32.xlu1 %v8655_v22, %s9450_s29 }
0x120b   : > { %4051 = vrot.lane.b32.xlu1 %v8733_v57, %s9450_s29  ;;  %4059 = vrot.lane.b32.xlu0 %v8653_v54, %s9450_s29 }
0x120f   : > { %4053 = vrot.lane.b32.xlu1 %v8735_v52, %s9450_s29 }
0x127a   : > { %v3978_v31 = vpop.xlane.xlu0 %3977 }
0x127b   : > { %v3975_v39 = vpop.xlane.xlu1 %3974 }
0x127c   : > { %7532 = vrcp.f32 %v3975_v39 }
0x127d   : > { %7534 = vrcp.f32 %v3978_v31 }
0x127e   : > { %v3972_v6 = vpop.xlane.xlu0 %3971 }
0x127f   : > { %7536 = vrcp.f32 %v3972_v6  ;;  %v3981_v12 = vpop.xlane.xlu1 %3980 }
0x1280   : > { %7538 = vrcp.f32 %v3981_v12 }
0x1282   : > { %v4060_v40 = vpop.permute.xlu0 %4059 }
0x1283   : > { %7133 = vmatprep.subr.msk.bf16.mxu1 %vm881_vm0, %v4060_v40  ;;  %v4058_v48 = vpop.permute.xlu1 %4057  ;;  %v4071_v59 = vsel %vm881_vm0, %v4060_v40, 0 }
0x1284   : > { %v4068_v34 = vsel %vm881_vm0, %v4058_v48, 0 }
0x1287   : > { %v4052_v60 = vpop.permute.xlu1 %4051 }
0x1289   : > { %v7533_v50 = vpop.eup %7532 }
0x128a   : > { %v7535_v49 = vpop.eup %7534  ;;  %v3987_v3 = vmul.f32 %v7533_v50, %v7527_v10 }
0x128b   : > { %v3988_v62 = vmul.f32 %v7535_v49, %v7525_v45  ;;  %v4054_v58 = vpop.permute.xlu1 %4053 }
0x128c   : > { %v7537_v53 = vpop.eup %7536 }
0x128d   : > { %v7539_v55 = vpop.eup %7538  ;;  %v3986_v56 = vmul.f32 %v7537_v53, %v7529_v43 }
0x128e   : > { %v3989_v61 = vmul.f32 %v7539_v55, %v7531_v38 }
0x128f   : > { %v3990_v20 = vpack.c.bf16 %v3987_v3, %v3986_v56 }
0x1290   : > { %v3991_v14 = vpack.c.bf16 %v3989_v61, %v3988_v62 }
0x1291   : > { %7039 = vmatprep.mubr.msk.bf16.mxu1 %vm881_vm0, %v3990_v20 }
0x1292   : > { %7040 = vmatmul.mubr.msk.bf16.vlgmr.msra.gmra.mxu1 %vm881_vm0, %v3991_v14 }
0x1293   : > { %7044 = vmatpush3.bf16.xpose.msra.mxu1 %v4071_v59  ;;  %7047 = vmatprep.mubr.msk.bf16.mxu1 %vm881_vm0, %v4052_v60 }
0x1294   : > { %7134 = vmatprep.subr.msk.bf16.mxu1 %vm881_vm0, %v4058_v48 }
0x129b   : > { %7046 = vmatpush3.bf16.xpose.msra.mxu1 %v4068_v34 }
0x129c   : > { %7067 = vmatprep.subr.bf16.mxu1 %v7292_v4 }
0x12a2   : > { %7048 = vmatmul.mubr.msk.bf16.vlgmr.msra.gmra.mxu1 %vm881_vm0, %v4054_v58 }
0x12a3   : > { %7068 = vmatpush3.bf16.msra.mxu1 %v7292_v4 }
0x12a4   : > { %7069 = vmatprep.subr.bf16.mxu1 %v7293_v46 }
0x12a7   : > { %7070 = vmatpush3.bf16.msra.mxu1 %v7293_v46 }
0x1352   : > { %v7041_v51 = vpop.f32.mrf.mxu1 }
0x1354   : > { %v4032_v19 = vpop.f32.mrf.mxu1 }
0x1356   : > { %v7042_v29 = vpop.f32.mrf.mxu1 }
0x1357   : > { %v4048_v32 = vpack.c.bf16 %v7042_v29, %v7041_v51 }
0x1358   : > { %v4035_v33 = vpop.f32.mrf.mxu1 }
0x1359   : > { %v4047_v44 = vpack.c.bf16 %v4035_v33, %v4032_v19 }
0x135b   : > { %7071 = vmatprep.mubr.msk.bf16.mxu1 %vm881_vm0, %v4047_v44 }
0x135c   : > { %7072 = vmatmul.mubr.msk.bf16.vlgmr.msra.gmra.mxu1 %vm881_vm0, %v4048_v32 }
0x1362   : > { %v7049_v28 = vpop.f32.mrf.mxu1 }
0x1363   : > { %v4124_v5 = vsel %vm6057_vm12, %v7049_v28, -1e+30 }
0x1364   : > { %v4107_v15 = vpop.f32.mrf.mxu1  ;;  %v4132_v45 = vsel %vm881_vm0, %v4124_v5, -inf }
0x1365   : > { %v4122_v23 = vsel %vm7812_vm8, %v4107_v15, -1e+30  ;;  %v7295_v15 = vld [vmem:[%s9396_s15 + $0x50] sm:$0xff]  }
0x1366   : > { %v7050_v30 = vpop.f32.mrf.mxu1  ;;  %v4126_v37 = vsel %vm881_vm0, %v4122_v23, -inf }
0x1367   : > { %4127 = vmax.xlane.f32.xlu0 %v4126_v37  ;;  %v4125_v0 = vsel %vm7817_vm9, %v7050_v30, -1e+30 }
0x1368   : > { %v4110_v41 = vpop.f32.mrf.mxu1  ;;  %v4135_v43 = vsel %vm881_vm0, %v4125_v0, -inf }
0x1369   : > { %v4123_v13 = vsel %vm8020_vm13, %v4110_v41, -1e+30 }
0x136a   : > { %v4129_v10 = vsel %vm881_vm0, %v4123_v13, -inf }
0x136b   : > { %4133 = vmax.xlane.f32.xlu0 %v4132_v45  ;;  %4130 = vmax.xlane.f32.xlu1 %v4129_v10 }
0x136f   : > { %4136 = vmax.xlane.f32.xlu0 %v4135_v43 }
0x13f0   : > { %v4128_v47 = vpop.xlane.xlu0 %4127 }
0x13f1   : > { %v4138_v38 = vsub.f32 %v4122_v23, %v4128_v47 }
0x13f3   : > { %v4142_v39 = vmul.f32 1.442695, %v4138_v38 }
0x13f4   : > { %v4134_v21 = vpop.xlane.xlu0 %4133  ;;  %v4131_v27 = vpop.xlane.xlu1 %4130 }
0x13f5   : > { %v4140_v31 = vsub.f32 %v4124_v5, %v4134_v21  ;;  %v4139_v12 = vsub.f32 %v4123_v13, %v4131_v27 }
0x13f7   : > { %v4146_v6 = vmul.f32 1.442695, %v4140_v31  ;;  %v4144_v49 = vmul.f32 1.442695, %v4139_v12 }
0x13f8   : > { %v4137_v40 = vpop.xlane.xlu0 %4136 }
0x13f9   : > { %7540 = vpow2.f32 %v4146_v6  ;;  %v4141_v50 = vsub.f32 %v4125_v0, %v4137_v40 }
0x13fa   : > { %7542 = vpow2.f32 %v4142_v39 }
0x13fb   : > { %v4148_v53 = vmul.f32 1.442695, %v4141_v50 }
0x13fd   : > { %7544 = vpow2.f32 %v4148_v53 }
0x13fe   : > { %7546 = vpow2.f32 %v4144_v49 }
0x1406   : > { %v7541_v48 = vpop.eup %7540 }
0x1407   : > { %v4156_v55 = vsel %vm881_vm0, %v7541_v48, 0.0  ;;  %v7543_v56 = vpop.eup %7542 }
0x1408   : > { %4157 = vadd.xlane.f32.xlu0 %v4156_v55  ;;  %v4150_v62 = vsel %vm881_vm0, %v7543_v56, 0.0 }
0x140a   : > { %v7545_v3 = vpop.eup %7544 }
0x140b   : > { %v4159_v61 = vsel %vm881_vm0, %v7545_v3, 0.0  ;;  %v7547_v20 = vpop.eup %7546 }
0x140c   : > { %4151 = vadd.xlane.f32.xlu0 %v4150_v62  ;;  %4160 = vadd.xlane.f32.xlu1 %v4159_v61  ;;  %v4153_v14 = vsel %vm881_vm0, %v7547_v20, 0.0 }
0x1410   : > { %4154 = vadd.xlane.f32.xlu1 %v4153_v14 }
0x1421   : > { %4174 = vrot.lane.b32.xlu1 %v8746_v1, %s9450_s29 }
0x1422   : > { %4176 = vrot.lane.b32.xlu0 %v8744_v2, %s9450_s29 }
0x1425   : > { %4377 = vrot.lane.b32.xlu1 %v8653_v54, %s9451_s5 }
0x1426   : > { %4371 = vrot.lane.b32.xlu0 %v8733_v57, %s9451_s5 }
0x1429   : > { %4375 = vrot.lane.b32.xlu1 %v8655_v22, %s9451_s5 }
0x142a   : > { %4630 = vrot.lane.b32.xlu0 %v8653_v54, %s9452_s3 }
0x142d   : > { %4373 = vrot.lane.b32.xlu1 %v8735_v52, %s9451_s5 }
0x142e   : > { %4624 = vrot.lane.b32.xlu0 %v8733_v57, %s9452_s3  ;;  %v7294_v57 = vld [vmem:[%s9396_s15 + $0x58] sm:$0xff]  }
0x1431   : > { %4628 = vrot.lane.b32.xlu1 %v8655_v22, %s9452_s3 }
0x1435   : > { %4626 = vrot.lane.b32.xlu1 %v8735_v52, %s9452_s3 }
0x1491   : > { %v4158_v59 = vpop.xlane.xlu0 %4157 }
0x1495   : > { %v4152_v60 = vpop.xlane.xlu0 %4151  ;;  %v4161_v34 = vpop.xlane.xlu1 %4160 }
0x1496   : > { %7548 = vrcp.f32 %v4161_v34 }
0x1497   : > { %7550 = vrcp.f32 %v4152_v60 }
0x1498   : > { %7552 = vrcp.f32 %v4158_v59 }
0x1499   : > { %v4177_v58 = vpop.permute.xlu0 %4176  ;;  %v4155_v54 = vpop.xlane.xlu1 %4154 }
0x149a   : > { %7554 = vrcp.f32 %v4155_v54  ;;  %7051 = vmatprep.subr.bf16.mxu0 %v4177_v58 }
0x149b   : > { %7052 = vmatpush3.bf16.msra.mxu0 %v4177_v58 }
0x149d   : > { %v4175_v4 = vpop.permute.xlu1 %4174  ;;  %v4372_v10 = vpop.permute.xlu0 %4371 }
0x149e   : > { %7053 = vmatprep.subr.bf16.mxu0 %v4175_v4 }
0x149f   : > { %7054 = vmatpush3.bf16.msra.mxu0 %v4175_v4 }
0x14a0   : > { %7059 = vmatprep.subr.bf16.mxu0 %v7294_v57 }
0x14a1   : > { %v4378_v23 = vpop.permute.xlu1 %4377  ;;  %v4631_v38 = vpop.permute.xlu0 %4630 }
0x14a2   : > { %v4389_v0 = vsel %vm881_vm0, %v4378_v23, 0  ;;  %v4642_v27 = vsel %vm881_vm0, %v4631_v38, 0 }
0x14a3   : > { %v7549_v22 = vpop.eup %7548 }
0x14a4   : > { %v7551_v52 = vpop.eup %7550  ;;  %v4169_v19 = vmul.f32 %v7549_v22, %v7545_v3 }
0x14a5   : > { %v7553_v46 = vpop.eup %7552  ;;  %v4166_v29 = vmul.f32 %v7551_v52, %v7543_v56  ;;  %v4376_v43 = vpop.permute.xlu1 %4375 }
0x14a6   : > { %v4168_v44 = vmul.f32 %v7553_v46, %v7541_v48  ;;  %v4386_v47 = vsel %vm881_vm0, %v4376_v43, 0  ;;  %v4625_v31 = vpop.permute.xlu0 %4624 }
0x14a7   : > { %v7555_v51 = vpop.eup %7554 }
0x14a8   : > { %v4167_v33 = vmul.f32 %v7555_v51, %v7547_v20  ;;  %v4171_v28 = vpack.c.bf16 %v4169_v19, %v4168_v44 }
0x14a9   : > { %v4374_v21 = vpop.permute.xlu1 %4373 }
0x14aa   : > { %v4170_v32 = vpack.c.bf16 %v4167_v33, %v4166_v29 }
0x14ac   : > { %7055 = vmatprep.mubr.msk.bf16.mxu0 %vm881_vm0, %v4170_v32 }
0x14ad   : > { %7056 = vmatmul.mubr.msk.bf16.vlgmr.msra.gmra.mxu0 %vm881_vm0, %v4171_v28  ;;  %v4629_v39 = vpop.permute.xlu1 %4628 }
0x14ae   : > { %7060 = vmatpush3.bf16.msra.mxu0 %v7294_v57  ;;  %v4639_v6 = vsel %vm881_vm0, %v4629_v39, 0 }
0x14af   : > { %7061 = vmatprep.subr.bf16.mxu0 %v7295_v15 }
0x14b1   : > { %v4627_v12 = vpop.permute.xlu1 %4626 }
0x14b2   : > { %7062 = vmatpush3.bf16.msra.mxu0 %v7295_v15 }
0x14b3   : > { %7135 = vmatprep.subr.msk.bf16.mxu0 %vm881_vm0, %v4378_v23 }
0x156d   : > { %v7057_v30 = vpop.f32.mrf.mxu0 }
0x156f   : > { %v4220_v37 = vpop.f32.mrf.mxu0 }
0x1571   : > { %v7058_v5 = vpop.f32.mrf.mxu0 }
0x1572   : > { %v4236_v45 = vpack.c.bf16 %v7058_v5, %v7057_v30 }
0x1573   : > { %v4223_v41 = vpop.f32.mrf.mxu0 }
0x1574   : > { %v4235_v13 = vpack.c.bf16 %v4223_v41, %v4220_v37 }
0x1576   : > { %7063 = vmatprep.mubr.msk.bf16.mxu0 %vm881_vm0, %v4235_v13 }
0x1577   : > { %7064 = vmatmul.mubr.msk.bf16.vlgmr.msra.gmra.mxu0 %vm881_vm0, %v4236_v45 }
0x1578   : > { %7076 = vmatpush3.bf16.xpose.msra.mxu0 %v4389_v0  ;;  %7079 = vmatprep.mubr.msk.bf16.mxu0 %vm881_vm0, %v4372_v10 }
0x1579   : > { %7136 = vmatprep.subr.msk.bf16.mxu0 %vm881_vm0, %v4376_v43 }
0x1580   : > { %7078 = vmatpush3.bf16.xpose.msra.mxu0 %v4386_v47 }
0x1581   : > { %7137 = vmatprep.subr.msk.bf16.mxu0 %vm881_vm0, %v4631_v38 }
0x1587   : > { %7080 = vmatmul.mubr.msk.bf16.vlgmr.msra.gmra.mxu0 %vm881_vm0, %v4374_v21 }
0x1588   : > { %7100 = vmatpush3.bf16.xpose.msra.mxu0 %v4642_v27  ;;  %7103 = vmatprep.mubr.msk.bf16.mxu0 %vm881_vm0, %v4625_v31 }
0x1589   : > { %7138 = vmatprep.subr.msk.bf16.mxu0 %vm881_vm0, %v4629_v39 }
0x1590   : > { %7102 = vmatpush3.bf16.xpose.msra.mxu0 %v4639_v6 }
0x1597   : > { %7104 = vmatmul.mubr.msk.bf16.vlgmr.msra.gmra.mxu0 %vm881_vm0, %v4627_v12 }
0x1598   : > { %5211 = vmatprep.mubr.bf16.mxu0 %v7636_v11 }
0x1637   : > { %v8851_v40 = vpop.f32.mrf.mxu0 }
0x1639   : > { %v8853_v50 = vpop.f32.mrf.mxu0 }
0x163b   : > { %v8855_v49 = vpop.f32.mrf.mxu0 }
0x163d   : > { %v8857_v53 = vpop.f32.mrf.mxu0 }
0x1647   : > { %v7081_v48 = vpop.f32.mrf.mxu0 }
0x1648   : > { %v4442_v61 = vsel %vm6057_vm12, %v7081_v48, -1e+30 }
0x1649   : > { %v4425_v55 = vpop.f32.mrf.mxu0  ;;  %v4450_v59 = vsel %vm881_vm0, %v4442_v61, -inf }
0x164a   : > { %v4440_v56 = vsel %vm7812_vm8, %v4425_v55, -1e+30 }
0x164b   : > { %v4444_v3 = vsel %vm881_vm0, %v4440_v56, -inf  ;;  %v7082_v62 = vpop.f32.mrf.mxu0 }
0x164c   : > { %4445 = vmax.xlane.f32.xlu0 %v4444_v3  ;;  %v4443_v34 = vsel %vm7817_vm9, %v7082_v62, -1e+30 }
0x164d   : > { %v4428_v20 = vpop.f32.mrf.mxu0  ;;  %v4453_v58 = vsel %vm881_vm0, %v4443_v34, -inf }
0x164e   : > { %v4441_v14 = vsel %vm8020_vm13, %v4428_v20, -1e+30 }
0x164f   : > { %v4447_v60 = vsel %vm881_vm0, %v4441_v14, -inf }
0x1650   : > { %4451 = vmax.xlane.f32.xlu0 %v4450_v59  ;;  %4448 = vmax.xlane.f32.xlu1 %v4447_v60 }
0x1654   : > { %4454 = vmax.xlane.f32.xlu0 %v4453_v58 }
0x1657   : > { %v7105_v45 = vpop.f32.mrf.mxu0 }
0x1658   : > { %v4695_v21 = vsel %vm6057_vm12, %v7105_v45, -1e+30  ;;  %v7296_v45 = vld [vmem:[%s9396_s15 + $0x68] sm:$0xff]  }
0x1659   : > { %v4678_v10 = vpop.f32.mrf.mxu0  ;;  %v4703_v31 = vsel %vm881_vm0, %v4695_v21, -inf }
0x165a   : > { %v4693_v27 = vsel %vm7812_vm8, %v4678_v10, -1e+30  ;;  %v7297_v10 = vld [vmem:[%s9396_s15 + $0x60] sm:$0xff]  }
0x165b   : > { %v7106_v0 = vpop.f32.mrf.mxu0  ;;  %v4697_v39 = vsel %vm881_vm0, %v4693_v27, -inf }
0x165c   : > { %v4696_v6 = vsel %vm7817_vm9, %v7106_v0, -1e+30  ;;  %v7073_v0 = vpop.f32.mrf.mxu1 }
0x165d   : > { %v4681_v43 = vpop.f32.mrf.mxu0  ;;  %v4706_v17 = vsel %vm881_vm0, %v4696_v6, -inf }
0x165e   : > { %v4694_v47 = vsel %vm8020_vm13, %v4681_v43, -1e+30  ;;  %v4356_v43 = vpop.f32.mrf.mxu1 }
0x165f   : > { %v4700_v38 = vsel %vm881_vm0, %v4694_v47, -inf }
0x16d5   : > { %v4446_v54 = vpop.xlane.xlu0 %4445 }
0x16d6   : > { %v4456_v57 = vsub.f32 %v4440_v56, %v4446_v54 }
0x16d8   : > { %v4460_v46 = vmul.f32 1.442695, %v4456_v57 }
0x16d9   : > { %v4452_v4 = vpop.xlane.xlu0 %4451  ;;  %v4449_v22 = vpop.xlane.xlu1 %4448 }
0x16da   : > { %v4458_v52 = vsub.f32 %v4442_v61, %v4452_v4  ;;  %v4457_v19 = vsub.f32 %v4441_v14, %v4449_v22 }
0x16dc   : > { %v4464_v51 = vmul.f32 1.442695, %v4458_v52  ;;  %v4462_v44 = vmul.f32 1.442695, %v4457_v19 }
0x16dd   : > { %v4455_v29 = vpop.xlane.xlu0 %4454 }
0x16de   : > { %7556 = vpow2.f32 %v4464_v51  ;;  %v4459_v33 = vsub.f32 %v4443_v34, %v4455_v29 }
0x16df   : > { %7558 = vpow2.f32 %v4460_v46 }
0x16e0   : > { %v4466_v32 = vmul.f32 1.442695, %v4459_v33 }
0x16e2   : > { %7560 = vpow2.f32 %v4466_v32 }
0x16e3   : > { %7562 = vpow2.f32 %v4462_v44 }
0x16eb   : > { %v7557_v28 = vpop.eup %7556 }
0x16ec   : > { %v4474_v15 = vsel %vm881_vm0, %v7557_v28, 0.0  ;;  %v7559_v23 = vpop.eup %7558 }
0x16ed   : > { %4475 = vadd.xlane.f32.xlu0 %v4474_v15  ;;  %v4468_v37 = vsel %vm881_vm0, %v7559_v23, 0.0 }
0x16ef   : > { %v7561_v30 = vpop.eup %7560 }
0x16f0   : > { %v4477_v5 = vsel %vm881_vm0, %v7561_v30, 0.0  ;;  %v7563_v41 = vpop.eup %7562 }
0x16f1   : > { %4469 = vadd.xlane.f32.xlu0 %v4468_v37  ;;  %4478 = vadd.xlane.f32.xlu1 %v4477_v5  ;;  %v4471_v13 = vsel %vm881_vm0, %v7563_v41, 0.0 }
0x16f5   : > { %4472 = vadd.xlane.f32.xlu1 %v4471_v13 }
0x1706   : > { %4490 = vrot.lane.b32.xlu1 %v8746_v1, %s9451_s5 }
0x1707   : > { %4492 = vrot.lane.b32.xlu0 %v8744_v2, %s9451_s5 }
0x1726   : > { %4701 = vmax.xlane.f32.xlu0 %v4700_v38 }
0x172a   : > { %4704 = vmax.xlane.f32.xlu0 %v4703_v31  ;;  %4698 = vmax.xlane.f32.xlu1 %v4697_v39 }
0x172e   : > { %4707 = vmax.xlane.f32.xlu1 %v4706_v17 }
0x1776   : > { %v4476_v12 = vpop.xlane.xlu0 %4475 }
0x177a   : > { %v4470_v48 = vpop.xlane.xlu0 %4469  ;;  %v4479_v24 = vpop.xlane.xlu1 %4478 }
0x177b   : > { %7564 = vrcp.f32 %v4479_v24 }
0x177c   : > { %7566 = vrcp.f32 %v4470_v48 }
0x177d   : > { %7568 = vrcp.f32 %v4476_v12 }
0x177e   : > { %v4493_v25 = vpop.permute.xlu0 %4492  ;;  %v4473_v55 = vpop.xlane.xlu1 %4472 }
0x177f   : > { %7570 = vrcp.f32 %v4473_v55  ;;  %7083 = vmatprep.subr.bf16.mxu1 %v4493_v25 }
0x1780   : > { %7084 = vmatpush3.bf16.msra.mxu1 %v4493_v25 }
0x1782   : > { %v4491_v56 = vpop.permute.xlu1 %4490 }
0x1783   : > { %7085 = vmatprep.subr.bf16.mxu1 %v4491_v56 }
0x1784   : > { %7086 = vmatpush3.bf16.msra.mxu1 %v4491_v56 }
0x1785   : > { %7091 = vmatprep.subr.bf16.mxu1 %v7296_v45 }
0x1788   : > { %v7565_v26 = vpop.eup %7564 }
0x1789   : > { %v7567_v3 = vpop.eup %7566  ;;  %v4487_v20 = vmul.f32 %v7565_v26, %v7561_v30 }
0x178a   : > { %v7569_v62 = vpop.eup %7568  ;;  %v4484_v14 = vmul.f32 %v7567_v3, %v7559_v23 }
0x178b   : > { %v4486_v60 = vmul.f32 %v7569_v62, %v7557_v28 }
0x178c   : > { %v7571_v61 = vpop.eup %7570 }
0x178d   : > { %v4485_v59 = vmul.f32 %v7571_v61, %v7563_v41  ;;  %v4489_v58 = vpack.c.bf16 %v4487_v20, %v4486_v60 }
0x178f   : > { %v4488_v34 = vpack.c.bf16 %v4485_v59, %v4484_v14 }
0x1791   : > { %7087 = vmatprep.mubr.msk.bf16.mxu1 %vm881_vm0, %v4488_v34  ;;  %v7298_v34 = vld [vmem:[%s9396_s15 + $0x78] sm:$0xff]  }
0x1792   : > { %7088 = vmatmul.mubr.msk.bf16.vlgmr.msra.gmra.mxu1 %vm881_vm0, %v4489_v58  ;;  %v7299_v58 = vld [vmem:[%s9396_s15 + $0x70] sm:$0xff]  }
0x1793   : > { %7092 = vmatpush3.bf16.msra.mxu1 %v7296_v45 }
0x1794   : > { %7093 = vmatprep.subr.bf16.mxu1 %v7297_v10 }
0x1797   : > { %7094 = vmatpush3.bf16.msra.mxu1 %v7297_v10  ;;  %v6330_v10 = vld [vmem:[%s9397_s16 + $0x1] ss:$0 sm:$0xff] }
0x17af   : > { %v4702_v54 = vpop.xlane.xlu0 %4701 }
0x17b0   : > { %v4710_v46 = vsub.f32 %v4694_v47, %v4702_v54  ;;  %v7074_v47 = vpop.f32.mrf.mxu1  ;;  %v4365_v54 = vadd.f32 %v7073_v0, %v8851_v40 }
0x17b2   : > { %v4715_v44 = vmul.f32 1.442695, %v4710_v46  ;;  %v4359_v38 = vpop.f32.mrf.mxu1  ;;  %v4368_v46 = vadd.f32 %v7074_v47, %v8855_v49 }
0x17b3   : > { %v4705_v57 = vpop.xlane.xlu0 %4704  ;;  %v4699_v4 = vpop.xlane.xlu1 %4698 }
0x17b4   : > { %v4711_v22 = vsub.f32 %v4695_v21, %v4705_v57  ;;  %v4709_v52 = vsub.f32 %v4693_v27, %v4699_v4  ;;  %v4357_v4 = vadd.f32 %v4356_v43, %v8853_v50 }
0x17b6   : > { %v4717_v51 = vmul.f32 1.442695, %v4711_v22  ;;  %v4713_v19 = vmul.f32 1.442695, %v4709_v52 }
0x17b7   : > { %v4708_v29 = vpop.xlane.xlu1 %4707 }
0x17b8   : > { %7572 = vpow2.f32 %v4717_v51  ;;  %v4712_v33 = vsub.f32 %v4696_v6, %v4708_v29  ;;  %v4360_v29 = vadd.f32 %v4359_v38, %v8857_v53 }
0x17b9   : > { %7574 = vpow2.f32 %v4713_v19 }
0x17ba   : > { %v4719_v32 = vmul.f32 1.442695, %v4712_v33 }
0x17bc   : > { %7576 = vpow2.f32 %v4719_v32 }
0x17bd   : > { %7578 = vpow2.f32 %v4715_v44 }
0x17c5   : > { %v7573_v28 = vpop.eup %7572 }
0x17c6   : > { %v4727_v15 = vsel %vm881_vm0, %v7573_v28, 0.0  ;;  %v7575_v23 = vpop.eup %7574 }
0x17c7   : > { %4728 = vadd.xlane.f32.xlu0 %v4727_v15  ;;  %v4721_v37 = vsel %vm881_vm0, %v7575_v23, 0.0 }
0x17c9   : > { %v7577_v30 = vpop.eup %7576 }
0x17ca   : > { %v4730_v5 = vsel %vm881_vm0, %v7577_v30, 0.0  ;;  %v7579_v41 = vpop.eup %7578 }
0x17cb   : > { %4722 = vadd.xlane.f32.xlu0 %v4721_v37  ;;  %4731 = vadd.xlane.f32.xlu1 %v4730_v5  ;;  %v4724_v13 = vsel %vm881_vm0, %v7579_v41, 0.0 }
0x17cf   : > { %4725 = vadd.xlane.f32.xlu1 %v4724_v13 }
0x17e0   : > { %4743 = vrot.lane.b32.xlu1 %v8746_v1, %s9452_s3 }
0x17e1   : > { %4745 = vrot.lane.b32.xlu0 %v8744_v2, %s9452_s3 }
0x1850   : > { %v4729_v21 = vpop.xlane.xlu0 %4728 }
0x1852   : > { %v7089_v27 = vpop.f32.mrf.mxu1 }
0x1854   : > { %v4536_v31 = vpop.f32.mrf.mxu1  ;;  %v4723_v39 = vpop.xlane.xlu0 %4722 }
0x1855   : > { %v4732_v6 = vpop.xlane.xlu1 %4731 }
0x1856   : > { %v7090_v17 = vpop.f32.mrf.mxu1  ;;  %7580 = vrcp.f32 %v4732_v6  ;;  %v7305_v6 = vld [vmem:[%s9400_s19 + $0x1ec] ss:$16 sps:$4 sm:$0xff]  }
0x1857   : > { %7582 = vrcp.f32 %v4723_v39  ;;  %v4552_v25 = vpack.c.bf16 %v7090_v17, %v7089_v27 }
0x1858   : > { %v4539_v12 = vpop.f32.mrf.mxu1  ;;  %v4746_v48 = vpop.permute.xlu0 %4745  ;;  %7584 = vrcp.f32 %v4729_v21 }
0x1859   : > { %v4551_v24 = vpack.c.bf16 %v4539_v12, %v4536_v31  ;;  %v4726_v1 = vpop.xlane.xlu1 %4725  ;;  %7107 = vmatprep.subr.bf16.mxu1 %v4746_v48 }
0x185a   : > { %7586 = vrcp.f32 %v4726_v1 }
0x185b   : > { %7095 = vmatprep.mubr.msk.bf16.mxu1 %vm881_vm0, %v4551_v24 }
0x185c   : > { %7096 = vmatmul.mubr.msk.bf16.vlgmr.msra.gmra.mxu1 %vm881_vm0, %v4552_v25 }
0x185d   : > { %7108 = vmatpush3.bf16.msra.mxu1 %v4746_v48  ;;  %v4744_v2 = vpop.permute.xlu1 %4743 }
0x185e   : > { %7109 = vmatprep.subr.bf16.mxu1 %v4744_v2 }
0x1861   : > { %7110 = vmatpush3.bf16.msra.mxu1 %v4744_v2 }
0x1862   : > { %7115 = vmatprep.subr.bf16.mxu1 %v7298_v34 }
0x1863   : > { %v7581_v55 = vpop.eup %7580 }
0x1864   : > { %v7583_v56 = vpop.eup %7582  ;;  %v4740_v62 = vmul.f32 %v7581_v55, %v7577_v30 }
0x1865   : > { %v7585_v26 = vpop.eup %7584  ;;  %v4737_v61 = vmul.f32 %v7583_v56, %v7575_v23 }
0x1866   : > { %v4739_v14 = vmul.f32 %v7585_v26, %v7573_v28 }
0x1867   : > { %v7587_v3 = vpop.eup %7586 }
0x1868   : > { %v4738_v20 = vmul.f32 %v7587_v3, %v7579_v41  ;;  %v4742_v60 = vpack.c.bf16 %v4740_v62, %v4739_v14 }
0x186a   : > { %v4741_v59 = vpack.c.bf16 %v4738_v20, %v4737_v61 }
0x186c   : > { %7111 = vmatprep.mubr.msk.bf16.mxu1 %vm881_vm0, %v4741_v59 }
0x186d   : > { %7112 = vmatmul.mubr.msk.bf16.vlgmr.msra.gmra.mxu1 %vm881_vm0, %v4742_v60  ;;  %v7308_v60 = vld [vmem:[%s9400_s19 + $0x1c4] ss:$16 sps:$4 sm:$0xff]  }
0x186e   : > { %7116 = vmatpush3.bf16.msra.mxu1 %v7298_v34  ;;  %v7311_v34 = vld [vmem:[%s9400_s19 + $0x1cc] ss:$16 sps:$4 sm:$0xff]  }
0x186f   : > { %7117 = vmatprep.subr.bf16.mxu1 %v7299_v58 }
0x1872   : > { %7118 = vmatpush3.bf16.msra.mxu1 %v7299_v58  ;;  %v7306_v58 = vld [vmem:[%s9400_s19 + $0x1c0] ss:$16 sps:$4 sm:$0xff]  }
0x1873   : > { %5232 = vmatprep.subr.bf16.mxu1 %v7305_v6 }
0x191c   : > { %v7097_v57 = vpop.f32.mrf.mxu1 }
0x191d   : > { %v4622_v22 = vadd.f32 %v7097_v57, %v4365_v54  ;;  %v7309_v54 = vld [vmem:[%s9400_s19 + $0x1c8] ss:$16 sps:$4 sm:$0xff]   ;;  %v7314_v57 = vld [vmem:[%s9400_s19 + $0x1a4] ss:$16 sps:$4 sm:$0xff]  }
0x191e   : > { %v4605_v52 = vpop.f32.mrf.mxu1 }
0x191f   : > { %v4620_v51 = vadd.f32 %v4605_v52, %v4357_v4  ;;  %v7317_v4 = vld [vmem:[%s9400_s19 + $0x1ac] ss:$16 sps:$4 sm:$0xff]   ;;  %v7315_v52 = vld [vmem:[%s9400_s19 + $0x1a8] ss:$16 sps:$4 sm:$0xff]  }
0x1920   : > { %v7098_v19 = vpop.f32.mrf.mxu1 }
0x1921   : > { %v4623_v33 = vadd.f32 %v7098_v19, %v4368_v46  ;;  %v7320_v46 = vld [vmem:[%s9400_s19 + $0x184] ss:$16 sps:$4 sm:$0xff]   ;;  %v7318_v19 = vld [vmem:[%s9400_s19 + $0x180] ss:$16 sps:$4 sm:$0xff]  }
0x1922   : > { %v4608_v44 = vpop.f32.mrf.mxu1 }
0x1923   : > { %v4621_v32 = vadd.f32 %v4608_v44, %v4360_v29  ;;  %v7321_v29 = vld [vmem:[%s9400_s19 + $0x188] ss:$16 sps:$4 sm:$0xff]   ;;  %v7326_v44 = vld [vmem:[%s9400_s19 + $0x164] ss:$16 sps:$4 sm:$0xff]  }
0x192d   : > { %v7113_v28 = vpop.f32.mrf.mxu1 }
0x192f   : > { %v4789_v15 = vpop.f32.mrf.mxu1 }
0x1931   : > { %v7114_v23 = vpop.f32.mrf.mxu1 }
0x1932   : > { %v4805_v40 = vpack.c.bf16 %v7114_v23, %v7113_v28  ;;  %v7329_v28 = vld [vmem:[%s9400_s19 + $0x16c] ss:$16 sps:$4 sm:$0xff]  }
0x1933   : > { %v4792_v30 = vpop.f32.mrf.mxu1  ;;  %v7335_v23 = vld [vmem:[%s9400_s19 + $0x14c] ss:$16 sps:$4 sm:$0xff]  }
0x1934   : > { %v4804_v37 = vpack.c.bf16 %v4792_v30, %v4789_v15  ;;  %v7332_v15 = vld [vmem:[%s9400_s19 + $0x144] ss:$16 sps:$4 sm:$0xff]   ;;  %v7330_v30 = vld [vmem:[%s9400_s19 + $0x140] ss:$16 sps:$4 sm:$0xff]  }
0x1936   : > { %7119 = vmatprep.mubr.msk.bf16.mxu1 %vm881_vm0, %v4804_v37  ;;  %v7333_v37 = vld [vmem:[%s9400_s19 + $0x148] ss:$16 sps:$4 sm:$0xff]  }
0x1937   : > { %7120 = vmatmul.mubr.msk.bf16.vlgmr.msra.gmra.mxu1 %vm881_vm0, %v4805_v40  ;;  %v7338_v40 = vld [vmem:[%s9400_s19 + $0x124] ss:$16 sps:$4 sm:$0xff]  }
0x1938   : > { %5264 = vmatprep.mubr.bf16.mxu1 %v7636_v11 }
0x19f7   : > { %v7121_v50 = vpop.f32.mrf.mxu1 }
0x19f8   : > { %v4875_v0 = vadd.f32 %v7121_v50, %v4622_v22  ;;  %v7312_v22 = vld [vmem:[%s9400_s19 + $0x1a0] ss:$16 sps:$4 sm:$0xff]   ;;  %v7341_v50 = vld [vmem:[%s9400_s19 + $0x12c] ss:$16 sps:$4 sm:$0xff]  }
0x19f9   : > { %v4858_v49 = vpop.f32.mrf.mxu1 }
0x19fa   : > { %v4873_v5 = vadd.f32 %v4858_v49, %v4620_v51  ;;  %v4879_v27 = vadd.f32 %v4875_v0, %v8643_v42  ;;  %v7302_v42 = vld [vmem:[%s9400_s19 + $0x1e4] ss:$16 sps:$4 sm:$0xff]   ;;  %v7323_v51 = vld [vmem:[%s9400_s19 + $0x18c] ss:$16 sps:$4 sm:$0xff]   ;;  %v7336_v49 = vld [vmem:[%s9400_s19 + $0x120] ss:$16 sps:$4 sm:$0xff]  }
0x19fb   : > { %v7122_v41 = vpop.f32.mrf.mxu1  ;;  %5179 = vmatprep.subr.bf16.mxu0 %v7302_v42 }
0x19fc   : > { %v4877_v53 = vadd.f32 %v4873_v5, %v8635_v35  ;;  %v4876_v13 = vadd.f32 %v7122_v41, %v4623_v33  ;;  %v8940_v39 = vadd.f32 %v6330_v10, %v4879_v27  ;;  %v7324_v33 = vld [vmem:[%s9400_s19 + $0x160] ss:$16 sps:$4 sm:$0xff]   ;;  %v7339_v5 = vld [vmem:[%s9400_s19 + $0x128] ss:$16 sps:$4 sm:$0xff]   ;;  %v7344_v41 = vld [vmem:[%s9400_s19 + $0x104] ss:$16 sps:$4 sm:$0xff]  }
0x19fd   : > { %v4861_v45 = vpop.f32.mrf.mxu1 }
0x19fe   : > { %v4880_v43 = vadd.f32 %v4876_v13, %v8647_v63  ;;  %v4874_v47 = vadd.f32 %v4861_v45, %v4621_v32  ;;  %v8929_v38 = vadd.f32 %v6330_v10, %v4877_v53  ;;  %v7303_v63 = vld [vmem:[%s9400_s19 + $0x1e8] ss:$16 sps:$4 sm:$0xff]   ;;  %v7347_v53 = vld [vmem:[%s9400_s19 + $0x10c] ss:$16 sps:$4 sm:$0xff]   ;;  %v7342_v13 = vld [vmem:[%s9400_s19 + $0x100] ss:$16 sps:$4 sm:$0xff]  }
0x19ff   : > { %5233 = vmatpush1.bf16.msra.mxu1 %v7303_v63  ;;  %v7327_v32 = vld [vmem:[%s9400_s19 + $0x168] ss:$16 sps:$4 sm:$0xff]  }
0x1a00   : > { %v4878_v21 = vadd.f32 %v4874_v47, %v8639_v36  ;;  %4897 = vadd.xlane.f32.xlu1 %v8929_v38  ;;  %v8934_v31 = vadd.f32 %v6330_v10, %v4880_v43  ;;  %v7300_v36 = vld [vmem:[%s9400_s19 + $0x1e0] ss:$16 sps:$4 sm:$0xff]   ;;  %5234 = vmatprep.subr.bf16.mxu1 %v7311_v34  ;;  %v7345_v45 = vld [vmem:[%s9400_s19 + $0x108] ss:$16 sps:$4 sm:$0xff]  }
0x1a01   : > { %5180 = vmatpush1.bf16.msra.mxu0 %v7300_v36 }
0x1a02   : > { %v8936_v35 = vadd.f32 %v6330_v10, %v4878_v21  ;;  %5181 = vmatprep.subr.bf16.mxu0 %v7308_v60 }
0x1a03   : > { %5235 = vmatpush1.bf16.msra.mxu1 %v7309_v54 }
0x1a04   : > { %4903 = vadd.xlane.f32.xlu1 %v8934_v31  ;;  %4899 = vadd.xlane.f32.xlu0 %v8936_v35 }
0x1a05   : > { %5182 = vmatpush1.bf16.msra.mxu0 %v7306_v58  ;;  %5236 = vmatprep.subr.bf16.mxu1 %v7317_v4 }
0x1a06   : > { %5183 = vmatprep.subr.bf16.mxu0 %v7314_v57 }
0x1a07   : > { %5237 = vmatpush1.bf16.msra.mxu1 %v7315_v52 }
0x1a08   : > { %4901 = vadd.xlane.f32.xlu0 %v8940_v39  ;;  %5238 = vmatprep.subr.bf16.mxu1 %v7323_v51  ;;  %v7351_v51 = vld [vmem:[%s9402_s21 + $0x1b8] sm:$0xff]  }
0x1a09   : > { %5184 = vmatpush1.bf16.msra.mxu0 %v7312_v22 }
0x1a0a   : > { %5185 = vmatprep.subr.bf16.mxu0 %v7320_v46  ;;  %v7350_v46 = vld [vmem:[%s9402_s21 + $0x138] sm:$0xff]  }
0x1a0b   : > { %5239 = vmatpush1.bf16.msra.mxu1 %v7321_v29  ;;  %v7353_v29 = vld [vmem:[%s9402_s21 + $0x1f0] sm:$0xff]  }
0x1a0c   : > { %5240 = vmatprep.subr.bf16.mxu1 %v7329_v28  ;;  %v7357_v28 = vld [vmem:[%s9402_s21 + $0x1e8] sm:$0xff]  }
0x1a0d   : > { %5186 = vmatpush1.bf16.msra.mxu0 %v7318_v19  ;;  %v7352_v19 = vld [vmem:[%s9402_s21 + $0x170] sm:$0xff]  }
0x1a0e   : > { %5187 = vmatprep.subr.bf16.mxu0 %v7326_v44  ;;  %v7355_v44 = vld [vmem:[%s9402_s21 + $0x1b0] sm:$0xff]  }
0x1a0f   : > { %5241 = vmatpush1.bf16.msra.mxu1 %v7327_v32  ;;  %v7356_v32 = vld [vmem:[%s9402_s21 + $0x168] sm:$0xff]  }
0x1a10   : > { %5242 = vmatprep.subr.bf16.mxu1 %v7335_v23  ;;  %v7359_v23 = vld [vmem:[%s9402_s21 + $0x1a8] sm:$0xff]  }
0x1a11   : > { %5188 = vmatpush1.bf16.msra.mxu0 %v7324_v33  ;;  %v7354_v33 = vld [vmem:[%s9402_s21 + $0x130] sm:$0xff]  }
0x1a12   : > { %5189 = vmatprep.subr.bf16.mxu0 %v7332_v15  ;;  %v7358_v15 = vld [vmem:[%s9402_s21 + $0x128] sm:$0xff]  }
0x1a13   : > { %5243 = vmatpush1.bf16.msra.mxu1 %v7333_v37  ;;  %v7361_v37 = vld [vmem:[%s9402_s21 + $0x1e0] sm:$0xff]  }
0x1a14   : > { %5244 = vmatprep.subr.bf16.mxu1 %v7341_v50  ;;  %v7363_v50 = vld [vmem:[%s9402_s21 + $0x1a0] sm:$0xff]  }
0x1a15   : > { %5190 = vmatpush1.bf16.msra.mxu0 %v7330_v30  ;;  %v7360_v30 = vld [vmem:[%s9402_s21 + $0x160] sm:$0xff]  }
0x1a16   : > { %5191 = vmatprep.subr.bf16.mxu0 %v7338_v40  ;;  %v7362_v40 = vld [vmem:[%s9402_s21 + $0x120] sm:$0xff]  }
0x1a17   : > { %5245 = vmatpush1.bf16.msra.mxu1 %v7339_v5  ;;  %v7365_v5 = vld [vmem:[%s9402_s21 + $0x1d8] sm:$0xff]  }
0x1a18   : > { %5246 = vmatprep.subr.bf16.mxu1 %v7347_v53  ;;  %v7367_v53 = vld [vmem:[%s9402_s21 + $0x198] sm:$0xff]  }
0x1a19   : > { %5192 = vmatpush1.bf16.msra.mxu0 %v7336_v49  ;;  %v7364_v49 = vld [vmem:[%s9402_s21 + $0x158] sm:$0xff]  }
0x1a1a   : > { %5193 = vmatprep.subr.bf16.mxu0 %v7344_v41  ;;  %v7366_v41 = vld [vmem:[%s9402_s21 + $0x118] sm:$0xff]  }
0x1a1b   : > { %5247 = vmatpush1.bf16.msra.mxu1 %v7345_v45  ;;  %v7369_v45 = vld [vmem:[%s9402_s21 + $0x1d0] sm:$0xff]  }
0x1a1d   : > { %5194 = vmatpush1.bf16.msra.mxu0 %v7342_v13  ;;  %v7368_v13 = vld [vmem:[%s9402_s21 + $0x150] sm:$0xff]  }
0x1a89   : > { %v4898_v17 = vpop.xlane.xlu1 %4897 }
0x1a8a   : > { %v4905_v12 = vmul.f32 0.0078125, %v4898_v17 }
0x1a8c   : > { %v8956_v48 = vsub.f32 %v8929_v38, %v4905_v12 }
0x1a8d   : > { %v4904_v24 = vpop.xlane.xlu1 %4903  ;;  %v4900_v1 = vpop.xlane.xlu0 %4899 }
0x1a8e   : > { %v4908_v25 = vmul.f32 0.0078125, %v4904_v24  ;;  %v4906_v2 = vmul.f32 0.0078125, %v4900_v1  ;;  %v4913_v55 = vmul.f32 %v8956_v48, %v8956_v48 }
0x1a90   : > { %v8961_v56 = vsub.f32 %v8936_v35, %v4906_v2  ;;  %4917 = vadd.xlane.f32.xlu0 %v4913_v55  ;;  %v8964_v3 = vsub.f32 %v8934_v31, %v4908_v25  ;;  %v6333_v25 = vld [vmem:[%s9398_s17 + $0x1] ss:$0 sm:$0xff] }
0x1a91   : > { %v4902_v26 = vpop.xlane.xlu0 %4901 }
0x1a92   : > { %v4907_v62 = vmul.f32 0.0078125, %v4902_v26  ;;  %v4914_v61 = vmul.f32 %v8961_v56, %v8961_v56  ;;  %v4916_v14 = vmul.f32 %v8964_v3, %v8964_v3 }
0x1a94   : > { %v8969_v20 = vsub.f32 %v8940_v39, %v4907_v62  ;;  %4919 = vadd.xlane.f32.xlu1 %v4914_v61  ;;  %v6334_v62 = vld [vmem:[%s9399_s18 + $0x1] ss:$0 sm:$0xff] }
0x1a96   : > { %v4915_v59 = vmul.f32 %v8969_v20, %v8969_v20 }
0x1a98   : > { %4923 = vadd.xlane.f32.xlu1 %v4916_v14  ;;  %4921 = vadd.xlane.f32.xlu0 %v4915_v59 }
0x1b19   : > { %v4918_v10 = vpop.xlane.xlu0 %4917 }
0x1b1a   : > { %v4925_v0 = vmul.f32 0.0078125, %v4918_v10  ;;  %v7370_v10 = vld [vmem:[%s9402_s21 + $0x110] sm:$0xff]  }
0x1b1c   : > { %v4929_v43 = vadd.f32 1e-06, %v4925_v0  ;;  %v7371_v0 = vld [vmem:[%s9402_s21 + $0x190] sm:$0xff]  }
0x1b1d   : > { %v4920_v47 = vpop.xlane.xlu1 %4919 }
0x1b1e   : > { %7588 = vrsqrt.f32 %v4929_v43  ;;  %v4926_v21 = vmul.f32 0.0078125, %v4920_v47  ;;  %v7372_v43 = vld [vmem:[%s9402_s21 + $0x148] sm:$0xff]  }
0x1b1f   : > { %v7373_v47 = vld [vmem:[%s9402_s21 + $0x1c8] sm:$0xff]  }
0x1b20   : > { %v4930_v27 = vadd.f32 1e-06, %v4926_v21  ;;  %v7374_v21 = vld [vmem:[%s9402_s21 + $0x108] sm:$0xff]  }
0x1b21   : > { %v4924_v36 = vpop.xlane.xlu1 %4923  ;;  %v4922_v42 = vpop.xlane.xlu0 %4921 }
0x1b22   : > { %7590 = vrsqrt.f32 %v4930_v27  ;;  %v4928_v63 = vmul.f32 0.0078125, %v4924_v36  ;;  %v4927_v6 = vmul.f32 0.0078125, %v4922_v42  ;;  %v7375_v27 = vld [vmem:[%s9402_s21 + $0x188] sm:$0xff]   ;;  %v7376_v36 = vld [vmem:[%s9402_s21 + $0x140] sm:$0xff]  }
0x1b23   : > { %v7377_v42 = vld [vmem:[%s9402_s21 + $0x1c0] sm:$0xff]  }
0x1b24   : > { %v4932_v17 = vadd.f32 1e-06, %v4928_v63  ;;  %v4931_v12 = vadd.f32 1e-06, %v4927_v6  ;;  %v7378_v63 = vld [vmem:[%s9402_s21 + $0x100] sm:$0xff]  }
0x1b25   : > { %v7379_v6 = vld [vmem:[%s9402_s21 + $0x180] sm:$0xff]  }
0x1b26   : > { %7592 = vrsqrt.f32 %v4932_v17  ;;  %v7382_v17 = vld [vmem:[%s9404_s23 + $0x74] ss:$8 sps:$4 sm:$0xff]  }
0x1b27   : > { %7594 = vrsqrt.f32 %v4931_v12  ;;  %v6367_v12 = vld [vmem:[%s9401_s20 + $0x4] sm:$0xf] }
0x1b2b   : > { %v7589_v24 = vpop.eup %7588 }
0x1b2c   : > { %v4937_v1 = vmul.f32 %v7589_v24, %v8956_v48  ;;  %v9174_v24 = vrot.slane %v6367_v12, %v8455_v7 }
0x1b2e   : > { %v4947_v26 = vmul.f32 %v6333_v25, %v4937_v1  ;;  %v9178_v1 = vrot.slane %v6367_v12, %v2625_v8 }
0x1b2f   : > { %v7591_v2 = vpop.eup %7590 }
0x1b30   : > { %v4938_v55 = vmul.f32 %v7591_v2, %v8961_v56  ;;  %v4957_v60 = vadd.f32 %v6334_v62, %v4947_v26  ;;  %v9185_v2 = vrot.slane %v6367_v12, %v2629_v18 }
0x1b32   : > { %v4948_v61 = vmul.f32 %v6333_v25, %v4938_v55 }
0x1b33   : > { %v7593_v14 = vpop.eup %7592 }
0x1b34   : > { %v7595_v59 = vpop.eup %7594  ;;  %v4958_v34 = vadd.f32 %v6334_v62, %v4948_v61  ;;  %v4940_v58 = vmul.f32 %v7593_v14, %v8964_v3  ;;  %v7348_v3 = vld [vmem:[%s9402_s21 + $0x178] sm:$0xff]  }
0x1b35   : > { %v4939_v48 = vmul.f32 %v7595_v59, %v8969_v20  ;;  %v7349_v20 = vld [vmem:[%s9402_s21 + $0x1f8] sm:$0xff]   ;;  %6739 = vmatprep.subr.bf16.mxu0 %v7348_v3 }
0x1b36   : > { %v4961_v54 = vpack.c.bf16 %v4958_v34, %v4957_v60  ;;  %v4950_v57 = vmul.f32 %v6333_v25, %v4940_v58  ;;  %6767 = vmatprep.subr.bf16.mxu1 %v7349_v20 }
0x1b37   : > { %v4949_v4 = vmul.f32 %v6333_v25, %v4939_v48  ;;  %v9181_v25 = vrot.slane %v6367_v12, %v8462_v16 }
0x1b38   : > { %5212 = vmatmul.mubr.bf16.vlgmr.msra.gmra.mxu0 %v4961_v54  ;;  %5265 = vmatmul.mubr.bf16.vlgmr.msra.gmra.mxu1 %v4961_v54  ;;  %v4960_v22 = vadd.f32 %v6334_v62, %v4950_v57 }
0x1b39   : > { %5221 = vmatprep.mubr.bf16.mxu0 %v7636_v11  ;;  %5274 = vmatprep.mubr.bf16.mxu1 %v7636_v11  ;;  %v4959_v56 = vadd.f32 %v6334_v62, %v4949_v4 }
0x1b3a   : > { %6740 = vmatpush3.bf16.msra.mxu0 %v7350_v46  ;;  %6768 = vmatpush3.bf16.msra.mxu1 %v7351_v51 }
0x1b3b   : > { %v4962_v52 = vpack.c.bf16 %v4960_v22, %v4959_v56  ;;  %6741 = vmatprep.subr.bf16.mxu0 %v7352_v19  ;;  %6769 = vmatprep.subr.bf16.mxu1 %v7353_v29 }
0x1b3e   : > { %6742 = vmatpush3.bf16.msra.mxu0 %v7354_v33  ;;  %6770 = vmatpush3.bf16.msra.mxu1 %v7355_v44 }
0x1b3f   : > { %6743 = vmatprep.subr.bf16.mxu0 %v7356_v32  ;;  %6771 = vmatprep.subr.bf16.mxu1 %v7357_v28 }
0x1b40   : > { %5222 = vmatmul.mubr.bf16.gmra.mxu0 %v4962_v52  ;;  %5275 = vmatmul.mubr.bf16.gmra.mxu1 %v4962_v52 }
0x1b42   : > { %6744 = vmatpush3.bf16.msra.mxu0 %v7358_v15  ;;  %6772 = vmatpush3.bf16.msra.mxu1 %v7359_v23 }
0x1b43   : > { %6745 = vmatprep.subr.bf16.mxu0 %v7360_v30  ;;  %6773 = vmatprep.subr.bf16.mxu1 %v7361_v37 }
0x1b46   : > { %6746 = vmatpush3.bf16.msra.mxu0 %v7362_v40  ;;  %6774 = vmatpush3.bf16.msra.mxu1 %v7363_v50 }
0x1b47   : > { %6747 = vmatprep.subr.bf16.mxu0 %v7364_v49  ;;  %6775 = vmatprep.subr.bf16.mxu1 %v7365_v5 }
0x1b4a   : > { %6748 = vmatpush3.bf16.msra.mxu0 %v7366_v41  ;;  %6776 = vmatpush3.bf16.msra.mxu1 %v7367_v53 }
0x1b4b   : > { %6749 = vmatprep.subr.bf16.mxu0 %v7368_v13  ;;  %6777 = vmatprep.subr.bf16.mxu1 %v7369_v45 }
0x1b4e   : > { %6750 = vmatpush3.bf16.msra.mxu0 %v7370_v10  ;;  %6778 = vmatpush3.bf16.msra.mxu1 %v7371_v0 }
0x1b4f   : > { %6751 = vmatprep.subr.bf16.mxu0 %v7372_v43  ;;  %6779 = vmatprep.subr.bf16.mxu1 %v7373_v47 }
0x1b52   : > { %6752 = vmatpush3.bf16.msra.mxu0 %v7374_v21  ;;  %6780 = vmatpush3.bf16.msra.mxu1 %v7375_v27 }
0x1b53   : > { %6753 = vmatprep.subr.bf16.mxu0 %v7376_v36  ;;  %6781 = vmatprep.subr.bf16.mxu1 %v7377_v42 }
0x1b56   : > { %6754 = vmatpush3.bf16.msra.mxu0 %v7378_v63  ;;  %6782 = vmatpush3.bf16.msra.mxu1 %v7379_v6 }
0x1b57   : > { %5918 = vmatprep.subr.bf16.mxu0 %v7382_v17 }
0x1bf8   : > { %v5213_v55 = vpop.f32.mrf.mxu0  ;;  %v5266_v26 = vpop.f32.mrf.mxu1 }
0x1bf9   : > { %v9188_v62 = vadd.f32 %v5213_v55, %v9174_v24  ;;  %v9191_v61 = vadd.f32 %v5266_v26, %v9178_v1 }
0x1bfa   : > { %v5215_v14 = vpop.f32.mrf.mxu0  ;;  %v5268_v59 = vpop.f32.mrf.mxu1 }
0x1bfb   : > { %v5285_v8 = vmul.f32 %v9188_v62, %v9188_v62  ;;  %v5287_v60 = vmul.f32 %v9191_v61, %v9191_v61  ;;  %v9198_v9 = vadd.f32 %v5215_v14, %v9181_v25  ;;  %v9201_v18 = vadd.f32 %v5268_v59, %v9185_v2 }
0x1bfc   : > { %v5217_v34 = vpop.f32.mrf.mxu0  ;;  %v5270_v58 = vpop.f32.mrf.mxu1 }
0x1bfd   : > { %v5301_v48 = vmul.f32 %v5285_v8, %v9188_v62  ;;  %v5303_v54 = vmul.f32 %v5287_v60, %v9191_v61  ;;  %v5286_v57 = vmul.f32 %v9198_v9, %v9198_v9  ;;  %v5288_v4 = vmul.f32 %v9201_v18, %v9201_v18 }
0x1bfe   : > { %v9210_v56 = vadd.f32 %v5217_v34, %v9174_v24  ;;  %v9213_v22 = vadd.f32 %v5270_v58, %v9178_v1  ;;  %v5219_v52 = vpop.f32.mrf.mxu0  ;;  %v5272_v3 = vpop.f32.mrf.mxu1 }
0x1bff   : > { %v5317_v20 = vmul.f32 0.044715, %v5301_v48  ;;  %v5319_v46 = vmul.f32 0.044715, %v5303_v54  ;;  %v5302_v51 = vmul.f32 %v5286_v57, %v9198_v9  ;;  %v5304_v19 = vmul.f32 %v5288_v4, %v9201_v18 }
0x1c00   : > { %v5289_v29 = vmul.f32 %v9210_v56, %v9210_v56  ;;  %v5291_v33 = vmul.f32 %v9213_v22, %v9213_v22  ;;  %v9222_v44 = vadd.f32 %v5219_v52, %v9181_v25  ;;  %v9225_v32 = vadd.f32 %v5272_v3, %v9185_v2  ;;  %v5223_v28 = vpop.f32.mrf.mxu0  ;;  %v5276_v15 = vpop.f32.mrf.mxu1 }
0x1c01   : > { %v5333_v23 = vadd.f32 %v5317_v20, %v9188_v62  ;;  %v5335_v30 = vadd.f32 %v5319_v46, %v9191_v61  ;;  %v5318_v37 = vmul.f32 0.044715, %v5302_v51  ;;  %v5320_v40 = vmul.f32 0.044715, %v5304_v19 }
0x1c02   : > { %v5305_v50 = vmul.f32 %v5289_v29, %v9210_v56  ;;  %v5307_v49 = vmul.f32 %v5291_v33, %v9213_v22  ;;  %v5290_v5 = vmul.f32 %v9222_v44, %v9222_v44  ;;  %v5292_v41 = vmul.f32 %v9225_v32, %v9225_v32  ;;  %v5225_v0 = vpop.f32.mrf.mxu0  ;;  %v5278_v36 = vpop.f32.mrf.mxu1 }
0x1c03   : > { %v5349_v53 = vmul.f32 0.7978846, %v5333_v23  ;;  %v5351_v13 = vmul.f32 0.7978846, %v5335_v30  ;;  %v5334_v45 = vadd.f32 %v5318_v37, %v9198_v9  ;;  %v5336_v10 = vadd.f32 %v5320_v40, %v9201_v18 }
0x1c04   : > { %v5321_v43 = vmul.f32 0.044715, %v5305_v50  ;;  %v5323_v47 = vmul.f32 0.044715, %v5307_v49  ;;  %v5306_v21 = vmul.f32 %v5290_v5, %v9222_v44  ;;  %v5308_v27 = vmul.f32 %v5292_v41, %v9225_v32  ;;  %v5227_v8 = vpop.f32.mrf.mxu0  ;;  %v5280_v48 = vpop.f32.mrf.mxu1 }
0x1c05   : > { %7596 = vtanh.f32 %v5349_v53  ;;  %v5350_v42 = vmul.f32 0.7978846, %v5334_v45  ;;  %v5352_v63 = vmul.f32 0.7978846, %v5336_v10  ;;  %v9240_v6 = vadd.f32 %v5223_v28, %v9174_v24 }
0x1c06   : > { %7598 = vtanh.f32 %v5351_v13  ;;  %v5337_v17 = vadd.f32 %v5321_v43, %v9210_v56  ;;  %v5339_v12 = vadd.f32 %v5323_v47, %v9213_v22  ;;  %v5322_v55 = vmul.f32 0.044715, %v5306_v21  ;;  %v5229_v33 = vpop.f32.mrf.mxu0  ;;  %v5282_v30 = vpop.f32.mrf.mxu1 }
0x1c07   : > { %7600 = vtanh.f32 %v5350_v42  ;;  %v5324_v26 = vmul.f32 0.044715, %v5308_v27  ;;  %v5293_v14 = vmul.f32 %v9240_v6, %v9240_v6  ;;  %v9247_v59 = vadd.f32 %v5276_v15, %v9178_v1 }
0x1c08   : > { %7602 = vtanh.f32 %v5352_v63  ;;  %v5353_v60 = vmul.f32 0.7978846, %v5337_v17  ;;  %v5355_v34 = vmul.f32 0.7978846, %v5339_v12  ;;  %v5338_v58 = vadd.f32 %v5322_v55, %v9222_v44 }
0x1c09   : > { %v5340_v54 = vadd.f32 %v5324_v26, %v9225_v32  ;;  %v5309_v57 = vmul.f32 %v5293_v14, %v9240_v6  ;;  %v5295_v4 = vmul.f32 %v9247_v59, %v9247_v59  ;;  %v9255_v52 = vadd.f32 %v5225_v0, %v9181_v25 }
0x1c0a   : > { %7604 = vtanh.f32 %v5353_v60  ;;  %v5354_v3 = vmul.f32 0.7978846, %v5338_v58  ;;  %v9258_v20 = vadd.f32 %v5278_v36, %v9185_v2  ;;  %v9261_v46 = vadd.f32 %v5227_v8, %v9174_v24 }
0x1c0b   : > { %7606 = vtanh.f32 %v5355_v34  ;;  %v5356_v51 = vmul.f32 0.7978846, %v5340_v54  ;;  %v5325_v19 = vmul.f32 0.044715, %v5309_v57  ;;  %v5311_v29 = vmul.f32 %v5295_v4, %v9247_v59 }
0x1c0c   : > { %7608 = vtanh.f32 %v5354_v3  ;;  %v5294_v28 = vmul.f32 %v9255_v52, %v9255_v52  ;;  %v5296_v15 = vmul.f32 %v9258_v20, %v9258_v20  ;;  %v5297_v23 = vmul.f32 %v9261_v46, %v9261_v46 }
0x1c0d   : > { %7610 = vtanh.f32 %v5356_v51  ;;  %v5341_v24 = vadd.f32 %v5325_v19, %v9240_v6  ;;  %v5327_v37 = vmul.f32 0.044715, %v5311_v29  ;;  %v9272_v40 = vadd.f32 %v5280_v48, %v9178_v1 }
0x1c0e   : > { %v5310_v50 = vmul.f32 %v5294_v28, %v9255_v52  ;;  %v5312_v49 = vmul.f32 %v5296_v15, %v9258_v20  ;;  %v5313_v5 = vmul.f32 %v5297_v23, %v9261_v46  ;;  %v9278_v41 = vadd.f32 %v5229_v33, %v9181_v25 }
0x1c0f   : > { %v5357_v53 = vmul.f32 0.7978846, %v5341_v24  ;;  %v5343_v13 = vadd.f32 %v5327_v37, %v9247_v59  ;;  %v5299_v45 = vmul.f32 %v9272_v40, %v9272_v40  ;;  %v9284_v10 = vadd.f32 %v5282_v30, %v9185_v2 }
0x1c10   : > { %v5326_v1 = vmul.f32 0.044715, %v5310_v50  ;;  %v5328_v0 = vmul.f32 0.044715, %v5312_v49  ;;  %v5329_v43 = vmul.f32 0.044715, %v5313_v5  ;;  %v5298_v47 = vmul.f32 %v9278_v41, %v9278_v41 }
0x1c11   : > { %v5359_v21 = vmul.f32 0.7978846, %v5343_v13  ;;  %v5315_v27 = vmul.f32 %v5299_v45, %v9272_v40  ;;  %v5300_v25 = vmul.f32 %v9284_v10, %v9284_v10  ;;  %7612 = vtanh.f32 %v5357_v53 }
0x1c12   : > { %v7597_v36 = vpop.eup %7596  ;;  %v5342_v42 = vadd.f32 %v5326_v1, %v9255_v52  ;;  %v5344_v63 = vadd.f32 %v5328_v0, %v9258_v20  ;;  %v5345_v2 = vadd.f32 %v5329_v43, %v9261_v46  ;;  %v5314_v17 = vmul.f32 %v5298_v47, %v9278_v41 }
0x1c13   : > { %v7599_v12 = vpop.eup %7598  ;;  %v5331_v55 = vmul.f32 0.044715, %v5315_v27  ;;  %v5316_v26 = vmul.f32 %v5300_v25, %v9284_v10  ;;  %7614 = vtanh.f32 %v5359_v21  ;;  %v5381_v51 = vadd.f32 1.0, %v7597_v36 }
0x1c14   : > { %v7601_v14 = vpop.eup %7600  ;;  %v5358_v8 = vmul.f32 0.7978846, %v5342_v42  ;;  %v5360_v60 = vmul.f32 0.7978846, %v5344_v63  ;;  %v5361_v58 = vmul.f32 0.7978846, %v5345_v2 }
0x1c15   : > { %v7603_v34 = vpop.eup %7602  ;;  %v5347_v48 = vadd.f32 %v5331_v55, %v9272_v40  ;;  %v5330_v54 = vmul.f32 0.044715, %v5314_v17  ;;  %v5332_v57 = vmul.f32 0.044715, %v5316_v26  ;;  %v5382_v4 = vadd.f32 1.0, %v7601_v14 }
0x1c16   : > { %7616 = vtanh.f32 %v5358_v8  ;;  %v5383_v28 = vadd.f32 1.0, %v7599_v12  ;;  %v5384_v45 = vadd.f32 1.0, %v7603_v34  ;;  %v5397_v1 = vmul.f32 0.5, %v5381_v51 }
0x1c17   : > { %v7605_v3 = vpop.eup %7604  ;;  %7618 = vtanh.f32 %v5360_v60  ;;  %v5363_v19 = vmul.f32 0.7978846, %v5347_v48  ;;  %v5346_v29 = vadd.f32 %v5330_v54, %v9278_v41  ;;  %v5348_v23 = vadd.f32 %v5332_v57, %v9284_v10  ;;  %v7388_v48 = vld [vmem:[%s9404_s23 + $0x54] ss:$8 sps:$4 sm:$0xff]  }
0x1c18   : > { %v7607_v33 = vpop.eup %7606  ;;  %v5385_v15 = vadd.f32 1.0, %v7605_v3  ;;  %7620 = vtanh.f32 %v5361_v58  ;;  %v5398_v50 = vmul.f32 0.5, %v5382_v4  ;;  %v5399_v47 = vmul.f32 0.5, %v5383_v28  ;;  %v7386_v28 = vld [vmem:[%s9404_s23 + $0x50] ss:$8 sps:$4 sm:$0xff]  }
0x1c19   : > { %v7609_v30 = vpop.eup %7608  ;;  %v5387_v24 = vadd.f32 1.0, %v7607_v33  ;;  %7622 = vtanh.f32 %v5363_v19  ;;  %v5362_v37 = vmul.f32 0.7978846, %v5346_v29  ;;  %v5364_v53 = vmul.f32 0.7978846, %v5348_v23 }
0x1c1a   : > { %v7611_v49 = vpop.eup %7610  ;;  %v5401_v5 = vmul.f32 0.5, %v5385_v15  ;;  %v5386_v13 = vadd.f32 1.0, %v7609_v30  ;;  %v5400_v27 = vmul.f32 0.5, %v5384_v45  ;;  %v5414_v63 = vmul.f32 %v5398_v50, %v9198_v9  ;;  %v7385_v9 = vld [vmem:[%s9404_s23 + $0x64] ss:$8 sps:$4 sm:$0xff]  }
0x1c1b   : > { %v5403_v0 = vmul.f32 0.5, %v5387_v24  ;;  %7624 = vtanh.f32 %v5362_v37  ;;  %v5388_v43 = vadd.f32 1.0, %v7611_v49  ;;  %v5413_v17 = vmul.f32 %v5397_v1, %v9188_v62  ;;  %v7391_v37 = vld [vmem:[%s9404_s23 + $0x44] ss:$8 sps:$4 sm:$0xff]  }
0x1c1c   : > { %7626 = vtanh.f32 %v5364_v53  ;;  %v5402_v21 = vmul.f32 0.5, %v5386_v13  ;;  %v5417_v25 = vmul.f32 %v5401_v5, %v9210_v56  ;;  %v5416_v12 = vmul.f32 %v5400_v27, %v9201_v18  ;;  %v7380_v56 = vld [vmem:[%s9404_s23 + $0x70] ss:$8 sps:$4 sm:$0xff]  }
0x1c1d   : > { %v5404_v36 = vmul.f32 0.5, %v5388_v43  ;;  %v5419_v42 = vmul.f32 %v5403_v0, %v9213_v22  ;;  %v5415_v26 = vmul.f32 %v5399_v47, %v9191_v61  ;;  %v7383_v61 = vld [vmem:[%s9404_s23 + $0x60] ss:$8 sps:$4 sm:$0xff]  }
0x1c1e   : > { %v5418_v2 = vmul.f32 %v5402_v21, %v9222_v44  ;;  %v7613_v8 = vpop.eup %7612  ;;  %v5429_v60 = vpack.c.bf16 %v5417_v25, %v5413_v17  ;;  %v7389_v0 = vld [vmem:[%s9404_s23 + $0x40] ss:$8 sps:$4 sm:$0xff]  }
0x1c1f   : > { %v5420_v55 = vmul.f32 %v5404_v36, %v9225_v32  ;;  %v5431_v62 = vpack.c.bf16 %v5419_v42, %v5415_v26  ;;  %v5389_v4 = vadd.f32 1.0, %v7613_v8 }
0x1c20   : > { %v5430_v14 = vpack.c.bf16 %v5418_v2, %v5414_v63  ;;  %v7615_v44 = vpop.eup %7614 }
0x1c21   : > { %v5432_v22 = vpack.c.bf16 %v5420_v55, %v5416_v12  ;;  %v5391_v51 = vadd.f32 1.0, %v7615_v44  ;;  %v5405_v5 = vmul.f32 0.5, %v5389_v4  ;;  %v7401_v12 = vld [vmem:[%s9404_s23] ss:$8 sps:$4 sm:$0xff]  }
0x1c22   : > { %5726 = vmatprep.mubr.bf16.mxu0 %v5430_v14 }
0x1c23   : > { %v7617_v18 = vpop.eup %7616  ;;  %5775 = vmatprep.mubr.bf16.mxu1 %v5432_v22  ;;  %5727 = vmatmul.mubr.bf16.vlgmr.msra.gmra.mxu0 %v5429_v60  ;;  %v5407_v13 = vmul.f32 0.5, %v5391_v51  ;;  %v5421_v36 = vmul.f32 %v5405_v5, %v9240_v6  ;;  %v7394_v6 = vld [vmem:[%s9404_s23 + $0x34] ss:$8 sps:$4 sm:$0xff]  }
0x1c24   : > { %v7619_v32 = vpop.eup %7618  ;;  %5776 = vmatmul.mubr.bf16.vlgmr.msra.gmra.mxu1 %v5431_v62  ;;  %5919 = vmatpush1.bf16.msra.mxu0 %v7380_v56  ;;  %v5390_v58 = vadd.f32 1.0, %v7617_v18 }
0x1c25   : > { %v7621_v34 = vpop.eup %7620  ;;  %5920 = vmatprep.subr.bf16.mxu0 %v7385_v9  ;;  %v5392_v57 = vadd.f32 1.0, %v7619_v32 }
0x1c26   : > { %v7623_v54 = vpop.eup %7622  ;;  %v5393_v3 = vadd.f32 1.0, %v7621_v34  ;;  %v5406_v30 = vmul.f32 0.5, %v5390_v58 }
0x1c27   : > { %v5395_v19 = vadd.f32 1.0, %v7623_v54  ;;  %v5408_v49 = vmul.f32 0.5, %v5392_v57 }
0x1c28   : > { %v7625_v29 = vpop.eup %7624  ;;  %v5409_v33 = vmul.f32 0.5, %v5393_v3  ;;  %5921 = vmatpush1.bf16.msra.mxu0 %v7383_v61  ;;  %v5422_v43 = vmul.f32 %v5406_v30, %v9255_v52  ;;  %v7392_v52 = vld [vmem:[%s9404_s23 + $0x30] ss:$8 sps:$4 sm:$0xff]  }
0x1c29   : > { %v7627_v15 = vpop.eup %7626  ;;  %v5394_v23 = vadd.f32 1.0, %v7625_v29  ;;  %v5411_v24 = vmul.f32 0.5, %v5395_v19  ;;  %5922 = vmatprep.subr.bf16.mxu0 %v7388_v48  ;;  %v5424_v27 = vmul.f32 %v5408_v49, %v9258_v20  ;;  %v7397_v20 = vld [vmem:[%s9404_s23 + $0x24] ss:$8 sps:$4 sm:$0xff]   ;;  %v6497_v48 = vld [vmem:[%s9403_s22 + $0x1] ss:$0 sm:$0xff] }
0x1c2a   : > { %v5396_v50 = vadd.f32 1.0, %v7627_v15  ;;  %v5425_v1 = vmul.f32 %v5409_v33, %v9261_v46  ;;  %v5423_v46 = vmul.f32 %v5407_v13, %v9247_v59  ;;  %v7395_v59 = vld [vmem:[%s9404_s23 + $0x20] ss:$8 sps:$4 sm:$0xff]  }
0x1c2b   : > { %v5410_v53 = vmul.f32 0.5, %v5394_v23  ;;  %v5427_v21 = vmul.f32 %v5411_v24, %v9272_v40  ;;  %v7400_v40 = vld [vmem:[%s9404_s23 + $0x14] ss:$8 sps:$4 sm:$0xff]  }
0x1c2c   : > { %v5412_v45 = vmul.f32 0.5, %v5396_v50  ;;  %5923 = vmatpush1.bf16.msra.mxu0 %v7386_v28  ;;  %v5433_v2 = vpack.c.bf16 %v5425_v1, %v5421_v36 }
0x1c2d   : > { %v5426_v47 = vmul.f32 %v5410_v53, %v9278_v41  ;;  %5924 = vmatprep.subr.bf16.mxu0 %v7391_v37  ;;  %v5435_v17 = vpack.c.bf16 %v5427_v21, %v5423_v46  ;;  %v7398_v41 = vld [vmem:[%s9404_s23 + $0x10] ss:$8 sps:$4 sm:$0xff]  }
0x1c2e   : > { %v5428_v25 = vmul.f32 %v5412_v45, %v9284_v10  ;;  %v7403_v10 = vld [vmem:[%s9404_s23 + $0x4] ss:$8 sps:$4 sm:$0xff]  }
0x1c2f   : > { %v5434_v42 = vpack.c.bf16 %v5426_v47, %v5422_v43 }
0x1c30   : > { %v5436_v63 = vpack.c.bf16 %v5428_v25, %v5424_v27  ;;  %5925 = vmatpush1.bf16.msra.mxu0 %v7389_v0  ;;  %v5826_v0 = vld [vmem:[%s9405_s24] sm:$0x3] }
0x1c31   : > { %5734 = vmatprep.mubr.bf16.mxu0 %v5434_v42  ;;  %5926 = vmatprep.subr.bf16.mxu0 %v7394_v6  ;;  %v5835_v43 = vrot.slane %v5826_v0, %v8462_v16 }
0x1c32   : > { %5783 = vmatprep.mubr.bf16.mxu1 %v5436_v63  ;;  %5735 = vmatmul.mubr.bf16.gmra.mxu0 %v5433_v2 }
0x1c33   : > { %5784 = vmatmul.mubr.bf16.gmra.mxu1 %v5435_v17  ;;  %5950 = vmatprep.mubr.bf16.mxu0 %v7636_v11 }
0x1c34   : > { %5927 = vmatpush1.bf16.msra.mxu0 %v7392_v52 }
0x1c35   : > { %5928 = vmatprep.subr.bf16.mxu0 %v7397_v20 }
0x1c38   : > { %5929 = vmatpush1.bf16.msra.mxu0 %v7395_v59 }
0x1c39   : > { %5930 = vmatprep.subr.bf16.mxu0 %v7400_v40 }
0x1c3c   : > { %5931 = vmatpush1.bf16.msra.mxu0 %v7398_v41 }
0x1c3d   : > { %5932 = vmatprep.subr.bf16.mxu0 %v7403_v10 }
0x1c40   : > { %5933 = vmatpush1.bf16.msra.mxu0 %v7401_v12 }
0x1ce3   : > { %v6755_v55 = vpop.f32.mrf.mxu0 }
0x1ce4   : > { %v6783_v26 = vpop.f32.mrf.mxu1 }
0x1ce5   : > { %v6756_v14 = vpop.f32.mrf.mxu0 }
0x1ce6   : > { %v6757_v56 = vadd.f32 %v6756_v14, %v6755_v55  ;;  %v6784_v8 = vpop.f32.mrf.mxu1 }
0x1ce7   : > { %v6785_v60 = vadd.f32 %v6784_v8, %v6783_v26  ;;  %v6758_v22 = vpop.f32.mrf.mxu0 }
0x1ce8   : > { %v6786_v9 = vpop.f32.mrf.mxu1 }
0x1ce9   : > { %v5778_v44 = vadd.f32 %v6785_v60, %v6757_v56  ;;  %v6759_v62 = vpop.f32.mrf.mxu0 }
0x1cea   : > { %v6760_v18 = vadd.f32 %v6759_v62, %v6758_v22  ;;  %v6787_v32 = vpop.f32.mrf.mxu1 }
0x1ceb   : > { %v6788_v61 = vadd.f32 %v6787_v32, %v6786_v9  ;;  %v5792_v34 = vadd.f32 %v5778_v44, %v8929_v38 }
0x1ced   : > { %v5781_v58 = vadd.f32 %v6788_v61, %v6760_v18  ;;  %v5804_v57 = vadd.f32 %v6497_v48, %v5792_v34 }
0x1cef   : > { %v5793_v54 = vadd.f32 %v5781_v58, %v8936_v35 }
0x1cf1   : > { %v5805_v4 = vadd.f32 %v6497_v48, %v5793_v54 }
0x1cf2   : > { %v6761_v3 = vpop.f32.mrf.mxu0 }
0x1cf3   : > { %v5808_v51 = vpack.c.bf16 %v5805_v4, %v5804_v57  ;;  %v6789_v19 = vpop.f32.mrf.mxu1 }
0x1cf4   : > { %v6762_v29 = vpop.f32.mrf.mxu0 }
0x1cf5   : > { %v6763_v33 = vadd.f32 %v6762_v29, %v6761_v3  ;;  %v6790_v28 = vpop.f32.mrf.mxu1  ;;  %5951 = vmatmul.mubr.bf16.vlgmr.msra.gmra.mxu0 %v5808_v51 }
0x1cf6   : > { %v6791_v15 = vadd.f32 %v6790_v28, %v6789_v19  ;;  %v6764_v23 = vpop.f32.mrf.mxu0  ;;  %5960 = vmatprep.mubr.bf16.mxu0 %v7636_v11  ;;  %v5831_v11 = vrot.slane %v5826_v0, %v8455_v7 }
0x1cf7   : > { %v6792_v38 = vpop.f32.mrf.mxu1 }
0x1cf8   : > { %v5786_v30 = vadd.f32 %v6791_v15, %v6763_v33  ;;  %v6765_v24 = vpop.f32.mrf.mxu0 }
0x1cf9   : > { %v6766_v37 = vadd.f32 %v6765_v24, %v6764_v23  ;;  %v6793_v50 = vpop.f32.mrf.mxu1 }
0x1cfa   : > { %v6794_v35 = vadd.f32 %v6793_v50, %v6792_v38  ;;  %v5794_v49 = vadd.f32 %v5786_v30, %v8940_v39 }
0x1cfc   : > { %v5789_v5 = vadd.f32 %v6794_v35, %v6766_v37  ;;  %v5806_v13 = vadd.f32 %v6497_v48, %v5794_v49 }
0x1cfe   : > { %v5795_v53 = vadd.f32 %v5789_v5, %v8934_v31 }
0x1d00   : > { %v5807_v45 = vadd.f32 %v6497_v48, %v5795_v53 }
0x1d02   : > { %v5809_v1 = vpack.c.bf16 %v5807_v45, %v5806_v13 }
0x1d04   : > { %5961 = vmatmul.mubr.bf16.gmra.mxu0 %v5809_v1 }
0x1db5   : > { %v5952_v39 = vpop.f32.mrf.mxu0 }
0x1db6   : > { %v5953_v47 = vadd.f32 %v5952_v39, %v5831_v11 }
0x1db7   : > { %v5954_v31 = vpop.f32.mrf.mxu0 }
0x1db8   : > { %5971 = vst [vmem:[%s784_s7] sm:$0xff] %v5953_v47  ;;  %v5955_v21 = vadd.f32 %v5954_v31, %v5835_v43 }
0x1db9   : > { %v5956_v27 = vpop.f32.mrf.mxu0 }
0x1dba   : > { %5972 = vst [vmem:[%s784_s7 + $0x8] sm:$0xff] %v5955_v21  ;;  %v5957_v25 = vadd.f32 %v5956_v27, %v5831_v11 }
0x1dbb   : > { %v5958_v36 = vpop.f32.mrf.mxu0 }
0x1dbc   : > { %5973 = vst [vmem:[%s784_s7 + $0x10] sm:$0xff] %v5957_v25  ;;  %v5959_v42 = vadd.f32 %v5958_v36, %v5835_v43 }
0x1dbe   : > { %5974 = vst [vmem:[%s784_s7 + $0x18] sm:$0xff] %v5959_v42 }
0x1dc4   : > { %v5962_v46 = vpop.f32.mrf.mxu0 }
0x1dc5   : > { %v5963_v7 = vadd.f32 %v5962_v46, %v5831_v11 }
0x1dc6   : > { %v5964_v63 = vpop.f32.mrf.mxu0 }
0x1dc7   : > { %5975 = vst [vmem:[%s784_s7 + $0x20] sm:$0xff] %v5963_v7  ;;  %v5965_v16 = vadd.f32 %v5964_v63, %v5835_v43 }
0x1dc8   : > { %v5966_v2 = vpop.f32.mrf.mxu0 }
0x1dc9   : > { %5976 = vst [vmem:[%s784_s7 + $0x28] sm:$0xff] %v5965_v16  ;;  %v5967_v17 = vadd.f32 %v5966_v2, %v5831_v11 }
0x1dca   : > { %v5968_v52 = vpop.f32.mrf.mxu0 }
0x1dcb   : > { %5977 = vst [vmem:[%s784_s7 + $0x30] sm:$0xff] %v5967_v17  ;;  %v5969_v6 = vadd.f32 %v5968_v52, %v5835_v43 }
0x1dcd   : > { %5978 = vst [vmem:[%s784_s7 + $0x38] sm:$0xff] %v5969_v6 }
0x1dce PF: > { %s9453_s2 = sld [smem:[#allocation2_spill]] }
0x1dd4   : > { %s35_s29 = sadd.s32 1, %s9453_s2  }
0x1dd5   : > { %p32_p4 = scmp.ge.s32.totalorder %s35_s29, 4  }
0x1dd7   :  { %34 = sbr.rel (!%p32_p4) target bundleno = 11 (0xb), region = 169 }

</bundles_post_ra>
